<compile_context>
chip_gen: v7x
topology: tpu7x:2x2x1
jax: 0.10.0
libtpu: 0.0.40
codegen_flags: <defaults>
</compile_context>

<pallas_src>
import functools

import jax
import jax.numpy as jnp
from jax import lax
from jax.experimental import pallas as pl
from jax.experimental.pallas import tpu as pltpu


# ----------------------------------------------------------------------------
# Fused kernel: (1x1 conv + BN + LeakyReLU) -> in-VMEM zero-padded hidden ->
#               (3x3 conv + BN + LeakyReLU) -> residual add.
# One grid step per batch image.
# ----------------------------------------------------------------------------
def _res_layer_kernel(x_ref, w1_ref, b1_ref, w2_ref, b2_ref, o_ref,
                      hp_ref, acc_ref, *, H, W):
    Cmid = w1_ref.shape[-1]

    # ---- layer1: 1x1 conv (BN folded) as a bf16 MXU matmul, f32 accumulation.
    h = jnp.dot(x_ref[0], w1_ref[...], preferred_element_type=jnp.float32)
    h = h + b1_ref[...]
    h = jnp.maximum(h, 0.1 * h)                      # LeakyReLU(0.1)

    # ---- zero only the 1-pixel halo border; interior is overwritten each step.
    zrow = jnp.zeros((1, W + 2, Cmid), jnp.float32)
    zcol = jnp.zeros((H, 1, Cmid), jnp.float32)
    hp_ref[0:1, :, :] = zrow
    hp_ref[H + 1:H + 2, :, :] = zrow
    hp_ref[1:H + 1, 0:1, :] = zcol
    hp_ref[1:H + 1, W + 1:W + 2, :] = zcol
    hp_ref[1:H + 1, 1:W + 1, :] = h.reshape(H, W, Cmid)   # W % 8 == 0 -> view

    # ---- layer2: 3x3 conv (pad=1) as 9 shifted bf16 MXU matmuls, accumulated
    #      into a VMEM f32 scratch ref (bounds live ranges across the taps).
    acc_ref[...] = jnp.zeros_like(acc_ref)
    for t in range(9):
        dy, dx = t // 3, t % 3
        patch = hp_ref[dy:dy + H, dx:dx + W, :].reshape(H * W, Cmid)
        acc_ref[...] += jnp.dot(patch.astype(jnp.bfloat16), w2_ref[t],
                                preferred_element_type=jnp.float32)

    # ---- epilogue: bias, LeakyReLU, residual add (x re-read, not kept live).
    y = acc_ref[...] + b2_ref[...]
    y = jnp.maximum(y, 0.1 * y)                      # LeakyReLU(0.1)
    y = y + x_ref[0].astype(jnp.float32)
    o_ref[0] = y.astype(o_ref.dtype)


def res_layer(x_nchw, params):
    B, Cin, H, W = x_nchw.shape
    Cmid = params["w1"].shape[-1]

    # NCHW -> NHWC -> flattened-pixel slab (boundary-only reshapes), bf16 input.
    x = jnp.transpose(x_nchw, (0, 2, 3, 1)).reshape(B, H * W, Cin)
    x = x.astype(jnp.bfloat16)

    out = pl.pallas_call(
        functools.partial(_res_layer_kernel, H=H, W=W),
        out_shape=jax.ShapeDtypeStruct((B, H * W, Cin), jnp.float32),
        grid_spec=pltpu.PrefetchScalarGridSpec(
            num_scalar_prefetch=0,
            grid=(B,),
            in_specs=[
                pl.BlockSpec((1, H * W, Cin), lambda b: (b, 0, 0)),    # x (bf16)
                pl.BlockSpec((Cin, Cmid), lambda b: (0, 0)),           # w1 (bf16, BN folded)
                pl.BlockSpec((1, Cmid), lambda b: (0, 0)),             # b1 (f32)
                pl.BlockSpec((9, Cmid, Cin), lambda b: (0, 0, 0)),     # w2 taps (bf16, BN folded)
                pl.BlockSpec((1, Cin), lambda b: (0, 0)),              # b2 (f32)
            ],
            out_specs=pl.BlockSpec((1, H * W, Cin), lambda b: (b, 0, 0)),
            scratch_shapes=[
                pltpu.VMEM((H + 2, W + 2, Cmid), jnp.float32),         # padded hidden
                pltpu.VMEM((H * W, Cin), jnp.float32),                 # f32 accumulator
            ],
        ),
        compiler_params=pltpu.CompilerParams(
            dimension_semantics=("parallel",),
            vmem_limit_bytes=32 * 1024 * 1024,
        ),
    )(x, params["w1"], params["b1"], params["w2"], params["b2"])

    out = out.reshape(B, H, W, Cin)
    return jnp.transpose(out, (0, 3, 1, 2))          # back to NCHW


# ----------------------------------------------------------------------------
# Parameter setup: deterministic synthetic conv weights + eval-mode BN fold.
# The BN scale is folded into the conv weights (f32), then the weights are cast
# to bf16 for the kernel; only the bias survives into the kernel epilogue.
# ----------------------------------------------------------------------------
def _bn_fold(key, c, eps=1e-5):
    kg, kb, km, kv = jax.random.split(key, 4)
    gamma = 1.0 + 0.1 * jax.random.normal(kg, (c,), jnp.float32)
    beta = 0.1 * jax.random.normal(kb, (c,), jnp.float32)
    mean = 0.1 * jax.random.normal(km, (c,), jnp.float32)
    var = jnp.abs(1.0 + 0.1 * jax.random.normal(kv, (c,), jnp.float32))
    scale = gamma / jnp.sqrt(var + eps)
    bias = beta - mean * scale
    return scale, bias


def init_res_layer_params(key, in_channels):
    mid = in_channels // 2
    k1, k2, k3, k4 = jax.random.split(key, 4)
    # 1x1 conv weight as (Cin, Cmid); 3x3 conv weight HWIO -> tap-major (9, Cmid, Cin).
    w1 = 0.1 * jax.random.normal(k1, (in_channels, mid), jnp.float32)
    w2 = 0.1 * jax.random.normal(k2, (3, 3, mid, in_channels), jnp.float32)
    s1, b1 = _bn_fold(k3, mid)
    s2, b2 = _bn_fold(k4, in_channels)
    w1f = w1 * s1.reshape(1, mid)
    w2f = w2 * s2.reshape(1, 1, 1, in_channels)
    w1_bf = w1f.astype(jnp.bfloat16)
    w2_bf = w2f.reshape(9, mid, in_channels).astype(jnp.bfloat16)  # row t = dy*3+dx
    return dict(
        w1=w1_bf,
        b1=b1.reshape(1, mid),
        w2=w2_bf,
        b2=b2.reshape(1, in_channels),
        # f32 copies of the *quantized* weights, for the reference path.
        w1_ref=w1_bf.astype(jnp.float32),
        w2_hwio_ref=w2_bf.astype(jnp.float32).reshape(3, 3, mid, in_channels),
    )


# ----------------------------------------------------------------------------
# Pure-JAX reference (quantized at the same points as the kernel's bf16 path).
# ----------------------------------------------------------------------------
def res_layer_ref(x_nchw, params):
    x = jnp.transpose(x_nchw, (0, 2, 3, 1))
    x = x.astype(jnp.bfloat16).astype(jnp.float32)   # kernel sees bf16 x
    Cin = x.shape[-1]
    mid = params["w1"].shape[-1]

    def lrelu(z):
        return jnp.where(z > 0, z, 0.1 * z)

    w1_hwio = params["w1_ref"].reshape(1, 1, Cin, mid)
    h = lax.conv_general_dilated(
        x, w1_hwio, (1, 1), "SAME",
        dimension_numbers=("NHWC", "HWIO", "NHWC"),
        precision=lax.Precision.HIGHEST,
    ) + params["b1"].reshape(1, 1, 1, mid)
    h = lrelu(h)
    h = h.astype(jnp.bfloat16).astype(jnp.float32)   # kernel feeds bf16 hidden to layer 2

    out = lax.conv_general_dilated(
        h, params["w2_hwio_ref"], (1, 1), "SAME",
        dimension_numbers=("NHWC", "HWIO", "NHWC"),
        precision=lax.Precision.HIGHEST,
    ) + params["b2"].reshape(1, 1, 1, Cin)
    out = lrelu(out)

    y = x + out
    return jnp.transpose(y, (0, 3, 1, 2))


if __name__ == "__main__":
    key = jax.random.PRNGKey(0)
    kx, kp = jax.random.split(key)

    B, Cin, H, W = 2, 4, 16, 16
    x = jax.random.normal(kx, (B, Cin, H, W), jnp.float32)
    params = init_res_layer_params(kp, Cin)

    y = res_layer(x, params)
    y = jax.block_until_ready(y)
    assert y.shape == (B, Cin, H, W), y.shape

    y_ref = res_layer_ref(x, params)
    assert jnp.allclose(y, y_ref, rtol=1e-3, atol=1e-3), float(jnp.max(jnp.abs(y - y_ref)))

    print("KERNEL_OK")
</pallas_src>

<mosaic_0001>
module attributes {stable_mosaic.version = 11 : i64} {
  func.func @_res_layer_kernel(%arg0: i32, %arg1: memref<1x256x4xbf16, #tpu.memory_space<vmem>>, %arg2: memref<4x2xbf16, #tpu.memory_space<vmem>>, %arg3: memref<1x2xf32, #tpu.memory_space<vmem>>, %arg4: memref<9x2x4xbf16, #tpu.memory_space<vmem>>, %arg5: memref<1x4xf32, #tpu.memory_space<vmem>>, %arg6: memref<1x256x4xf32, #tpu.memory_space<vmem>>, %arg7: memref<18x18x2xf32, #tpu.memory_space<vmem>>, %arg8: memref<256x4xf32, #tpu.memory_space<vmem>>) attributes {dimension_semantics = [#tpu.dimension_semantics<parallel>], iteration_bounds = array<i64: 2>, scalar_prefetch = 0 : i64, scratch_operands = 2 : i64, tpu.core_type = #tpu.core_type<tc>, window_params = [{transform_indices = @transform_0, window_bounds = array<i64: 1, 256, 4>}, {pipeline_mode = #tpu.pipeline_mode<synchronous>, transform_indices = @transform_1, window_bounds = array<i64: 4, 2>}, {pipeline_mode = #tpu.pipeline_mode<synchronous>, transform_indices = @transform_2, window_bounds = array<i64: 1, 2>}, {pipeline_mode = #tpu.pipeline_mode<synchronous>, transform_indices = @transform_3, window_bounds = array<i64: 9, 2, 4>}, {pipeline_mode = #tpu.pipeline_mode<synchronous>, transform_indices = @transform_4, window_bounds = array<i64: 1, 4>}, {transform_indices = @transform_5, window_bounds = array<i64: 1, 256, 4>}]} {
    %c0 = arith.constant 0 : index
    %c0_0 = arith.constant 0 : index
    %c0_1 = arith.constant 0 : index
    %0 = vector.load %arg1[%c0, %c0_0, %c0_1] : memref<1x256x4xbf16, #tpu.memory_space<vmem>>, vector<1x256x4xbf16>
    %1 = vector.shape_cast %0 : vector<1x256x4xbf16> to vector<256x4xbf16>
    %c0_2 = arith.constant 0 : index
    %c0_3 = arith.constant 0 : index
    %2 = vector.load %arg2[%c0_2, %c0_3] : memref<4x2xbf16, #tpu.memory_space<vmem>>, vector<4x2xbf16>
    %cst = arith.constant dense<0.000000e+00> : vector<256x2xf32>
    %3 = tpu.matmul %1, %2, %cst {dimension_numbers = #tpu.dot_dimension_numbers<[1], [0], [0], [1], [0, 0, 1, 1], [], []>} : vector<256x4xbf16>, vector<4x2xbf16>, vector<256x2xf32> -> vector<256x2xf32>
    %c0_4 = arith.constant 0 : index
    %c0_5 = arith.constant 0 : index
    %4 = vector.load %arg3[%c0_4, %c0_5] : memref<1x2xf32, #tpu.memory_space<vmem>>, vector<1x2xf32>
    %5 = vector.broadcast %4 : vector<1x2xf32> to vector<256x2xf32>
    %6 = arith.addf %3, %5 : vector<256x2xf32>
    %cst_6 = arith.constant 1.000000e-01 : f32
    %7 = vector.broadcast %cst_6 : f32 to vector<256x2xf32>
    %8 = arith.mulf %7, %6 : vector<256x2xf32>
    %9 = arith.maximumf %6, %8 : vector<256x2xf32>
    %cst_7 = arith.constant 0.000000e+00 : f32
    %10 = vector.broadcast %cst_7 : f32 to vector<1x18x2xf32>
    %cst_8 = arith.constant 0.000000e+00 : f32
    %11 = vector.broadcast %cst_8 : f32 to vector<16x1x2xf32>
    %c0_9 = arith.constant 0 : index
    %c0_10 = arith.constant 0 : index
    %c0_11 = arith.constant 0 : index
    %12 = vector.load %arg7[%c0_9, %c0_10, %c0_11] : memref<18x18x2xf32, #tpu.memory_space<vmem>>, vector<1x18x2xf32>
    tpu.vector_store %arg7[%c0_9, %c0_10, %c0_11], %10 {strides = array<i32>} : memref<18x18x2xf32, #tpu.memory_space<vmem>>, vector<1x18x2xf32>,
    %c17 = arith.constant 17 : index
    %c0_12 = arith.constant 0 : index
    %c0_13 = arith.constant 0 : index
    %13 = vector.load %arg7[%c17, %c0_12, %c0_13] : memref<18x18x2xf32, #tpu.memory_space<vmem>>, vector<1x18x2xf32>
    tpu.vector_store %arg7[%c17, %c0_12, %c0_13], %10 {strides = array<i32>} : memref<18x18x2xf32, #tpu.memory_space<vmem>>, vector<1x18x2xf32>,
    %c1 = arith.constant 1 : index
    %c0_14 = arith.constant 0 : index
    %c0_15 = arith.constant 0 : index
    %14 = vector.load %arg7[%c1, %c0_14, %c0_15] : memref<18x18x2xf32, #tpu.memory_space<vmem>>, vector<16x1x2xf32>
    tpu.vector_store %arg7[%c1, %c0_14, %c0_15], %11 {strides = array<i32>} : memref<18x18x2xf32, #tpu.memory_space<vmem>>, vector<16x1x2xf32>,
    %c1_16 = arith.constant 1 : index
    %c17_17 = arith.constant 17 : index
    %c0_18 = arith.constant 0 : index
    %15 = vector.load %arg7[%c1_16, %c17_17, %c0_18] : memref<18x18x2xf32, #tpu.memory_space<vmem>>, vector<16x1x2xf32>
    tpu.vector_store %arg7[%c1_16, %c17_17, %c0_18], %11 {strides = array<i32>} : memref<18x18x2xf32, #tpu.memory_space<vmem>>, vector<16x1x2xf32>,
    %16 = vector.shape_cast %9 : vector<256x2xf32> to vector<16x16x2xf32>
    %c1_19 = arith.constant 1 : index
    %c1_20 = arith.constant 1 : index
    %c0_21 = arith.constant 0 : index
    %17 = vector.load %arg7[%c1_19, %c1_20, %c0_21] : memref<18x18x2xf32, #tpu.memory_space<vmem>>, vector<16x16x2xf32>
    tpu.vector_store %arg7[%c1_19, %c1_20, %c0_21], %16 {strides = array<i32>} : memref<18x18x2xf32, #tpu.memory_space<vmem>>, vector<16x16x2xf32>,
    %cst_22 = arith.constant 0.000000e+00 : f32
    %18 = vector.broadcast %cst_22 : f32 to vector<256x4xf32>
    %c0_23 = arith.constant 0 : index
    %c0_24 = arith.constant 0 : index
    %19 = vector.load %arg8[%c0_23, %c0_24] : memref<256x4xf32, #tpu.memory_space<vmem>>, vector<256x4xf32>
    tpu.vector_store %arg8[%c0_23, %c0_24], %18 {strides = array<i32>} : memref<256x4xf32, #tpu.memory_space<vmem>>, vector<256x4xf32>,
    %c0_25 = arith.constant 0 : index
    %c0_26 = arith.constant 0 : index
    %c0_27 = arith.constant 0 : index
    %20 = vector.load %arg7[%c0_25, %c0_26, %c0_27] : memref<18x18x2xf32, #tpu.memory_space<vmem>>, vector<16x16x2xf32>
    %21 = vector.shape_cast %20 : vector<16x16x2xf32> to vector<256x2xf32>
    %c0_28 = arith.constant 0 : index
    %c0_29 = arith.constant 0 : index
    %22 = vector.load %arg8[%c0_28, %c0_29] : memref<256x4xf32, #tpu.memory_space<vmem>>, vector<256x4xf32>
    %23 = arith.truncf %21 : vector<256x2xf32> to vector<256x2xbf16>
    %c0_30 = arith.constant 0 : index
    %c0_31 = arith.constant 0 : index
    %c0_32 = arith.constant 0 : index
    %24 = vector.load %arg4[%c0_30, %c0_31, %c0_32] : memref<9x2x4xbf16, #tpu.memory_space<vmem>>, vector<1x2x4xbf16>
    %25 = vector.shape_cast %24 : vector<1x2x4xbf16> to vector<2x4xbf16>
    %cst_33 = arith.constant dense<0.000000e+00> : vector<256x4xf32>
    %26 = tpu.matmul %23, %25, %cst_33 {dimension_numbers = #tpu.dot_dimension_numbers<[1], [0], [0], [1], [0, 0, 1, 1], [], []>} : vector<256x2xbf16>, vector<2x4xbf16>, vector<256x4xf32> -> vector<256x4xf32>
    %27 = arith.addf %22, %26 : vector<256x4xf32>
    %c0_34 = arith.constant 0 : index
    %c0_35 = arith.constant 0 : index
    %28 = vector.load %arg8[%c0_34, %c0_35] : memref<256x4xf32, #tpu.memory_space<vmem>>, vector<256x4xf32>
    tpu.vector_store %arg8[%c0_34, %c0_35], %27 {strides = array<i32>} : memref<256x4xf32, #tpu.memory_space<vmem>>, vector<256x4xf32>,
    %c0_36 = arith.constant 0 : index
    %c1_37 = arith.constant 1 : index
    %c0_38 = arith.constant 0 : index
    %29 = vector.load %arg7[%c0_36, %c1_37, %c0_38] : memref<18x18x2xf32, #tpu.memory_space<vmem>>, vector<16x16x2xf32>
    %30 = vector.shape_cast %29 : vector<16x16x2xf32> to vector<256x2xf32>
    %c0_39 = arith.constant 0 : index
    %c0_40 = arith.constant 0 : index
    %31 = vector.load %arg8[%c0_39, %c0_40] : memref<256x4xf32, #tpu.memory_space<vmem>>, vector<256x4xf32>
    %32 = arith.truncf %30 : vector<256x2xf32> to vector<256x2xbf16>
    %c1_41 = arith.constant 1 : index
    %c0_42 = arith.constant 0 : index
    %c0_43 = arith.constant 0 : index
    %33 = vector.load %arg4[%c1_41, %c0_42, %c0_43] : memref<9x2x4xbf16, #tpu.memory_space<vmem>>, vector<1x2x4xbf16>
    %34 = vector.shape_cast %33 : vector<1x2x4xbf16> to vector<2x4xbf16>
    %cst_44 = arith.constant dense<0.000000e+00> : vector<256x4xf32>
    %35 = tpu.matmul %32, %34, %cst_44 {dimension_numbers = #tpu.dot_dimension_numbers<[1], [0], [0], [1], [0, 0, 1, 1], [], []>} : vector<256x2xbf16>, vector<2x4xbf16>, vector<256x4xf32> -> vector<256x4xf32>
    %36 = arith.addf %31, %35 : vector<256x4xf32>
    %c0_45 = arith.constant 0 : index
    %c0_46 = arith.constant 0 : index
    %37 = vector.load %arg8[%c0_45, %c0_46] : memref<256x4xf32, #tpu.memory_space<vmem>>, vector<256x4xf32>
    tpu.vector_store %arg8[%c0_45, %c0_46], %36 {strides = array<i32>} : memref<256x4xf32, #tpu.memory_space<vmem>>, vector<256x4xf32>,
    %c0_47 = arith.constant 0 : index
    %c2 = arith.constant 2 : index
    %c0_48 = arith.constant 0 : index
    %38 = vector.load %arg7[%c0_47, %c2, %c0_48] : memref<18x18x2xf32, #tpu.memory_space<vmem>>, vector<16x16x2xf32>
    %39 = vector.shape_cast %38 : vector<16x16x2xf32> to vector<256x2xf32>
    %c0_49 = arith.constant 0 : index
    %c0_50 = arith.constant 0 : index
    %40 = vector.load %arg8[%c0_49, %c0_50] : memref<256x4xf32, #tpu.memory_space<vmem>>, vector<256x4xf32>
    %41 = arith.truncf %39 : vector<256x2xf32> to vector<256x2xbf16>
    %c2_51 = arith.constant 2 : index
    %c0_52 = arith.constant 0 : index
    %c0_53 = arith.constant 0 : index
    %42 = vector.load %arg4[%c2_51, %c0_52, %c0_53] : memref<9x2x4xbf16, #tpu.memory_space<vmem>>, vector<1x2x4xbf16>
    %43 = vector.shape_cast %42 : vector<1x2x4xbf16> to vector<2x4xbf16>
    %cst_54 = arith.constant dense<0.000000e+00> : vector<256x4xf32>
    %44 = tpu.matmul %41, %43, %cst_54 {dimension_numbers = #tpu.dot_dimension_numbers<[1], [0], [0], [1], [0, 0, 1, 1], [], []>} : vector<256x2xbf16>, vector<2x4xbf16>, vector<256x4xf32> -> vector<256x4xf32>
    %45 = arith.addf %40, %44 : vector<256x4xf32>
    %c0_55 = arith.constant 0 : index
    %c0_56 = arith.constant 0 : index
    %46 = vector.load %arg8[%c0_55, %c0_56] : memref<256x4xf32, #tpu.memory_space<vmem>>, vector<256x4xf32>
    tpu.vector_store %arg8[%c0_55, %c0_56], %45 {strides = array<i32>} : memref<256x4xf32, #tpu.memory_space<vmem>>, vector<256x4xf32>,
    %c1_57 = arith.constant 1 : index
    %c0_58 = arith.constant 0 : index
    %c0_59 = arith.constant 0 : index
    %47 = vector.load %arg7[%c1_57, %c0_58, %c0_59] : memref<18x18x2xf32, #tpu.memory_space<vmem>>, vector<16x16x2xf32>
    %48 = vector.shape_cast %47 : vector<16x16x2xf32> to vector<256x2xf32>
    %c0_60 = arith.constant 0 : index
    %c0_61 = arith.constant 0 : index
    %49 = vector.load %arg8[%c0_60, %c0_61] : memref<256x4xf32, #tpu.memory_space<vmem>>, vector<256x4xf32>
    %50 = arith.truncf %48 : vector<256x2xf32> to vector<256x2xbf16>
    %c3 = arith.constant 3 : index
    %c0_62 = arith.constant 0 : index
    %c0_63 = arith.constant 0 : index
    %51 = vector.load %arg4[%c3, %c0_62, %c0_63] : memref<9x2x4xbf16, #tpu.memory_space<vmem>>, vector<1x2x4xbf16>
    %52 = vector.shape_cast %51 : vector<1x2x4xbf16> to vector<2x4xbf16>
    %cst_64 = arith.constant dense<0.000000e+00> : vector<256x4xf32>
    %53 = tpu.matmul %50, %52, %cst_64 {dimension_numbers = #tpu.dot_dimension_numbers<[1], [0], [0], [1], [0, 0, 1, 1], [], []>} : vector<256x2xbf16>, vector<2x4xbf16>, vector<256x4xf32> -> vector<256x4xf32>
    %54 = arith.addf %49, %53 : vector<256x4xf32>
    %c0_65 = arith.constant 0 : index
    %c0_66 = arith.constant 0 : index
    %55 = vector.load %arg8[%c0_65, %c0_66] : memref<256x4xf32, #tpu.memory_space<vmem>>, vector<256x4xf32>
    tpu.vector_store %arg8[%c0_65, %c0_66], %54 {strides = array<i32>} : memref<256x4xf32, #tpu.memory_space<vmem>>, vector<256x4xf32>,
    %c1_67 = arith.constant 1 : index
    %c1_68 = arith.constant 1 : index
    %c0_69 = arith.constant 0 : index
    %56 = vector.load %arg7[%c1_67, %c1_68, %c0_69] : memref<18x18x2xf32, #tpu.memory_space<vmem>>, vector<16x16x2xf32>
    %57 = vector.shape_cast %56 : vector<16x16x2xf32> to vector<256x2xf32>
    %c0_70 = arith.constant 0 : index
    %c0_71 = arith.constant 0 : index
    %58 = vector.load %arg8[%c0_70, %c0_71] : memref<256x4xf32, #tpu.memory_space<vmem>>, vector<256x4xf32>
    %59 = arith.truncf %57 : vector<256x2xf32> to vector<256x2xbf16>
    %c4 = arith.constant 4 : index
    %c0_72 = arith.constant 0 : index
    %c0_73 = arith.constant 0 : index
    %60 = vector.load %arg4[%c4, %c0_72, %c0_73] : memref<9x2x4xbf16, #tpu.memory_space<vmem>>, vector<1x2x4xbf16>
    %61 = vector.shape_cast %60 : vector<1x2x4xbf16> to vector<2x4xbf16>
    %cst_74 = arith.constant dense<0.000000e+00> : vector<256x4xf32>
    %62 = tpu.matmul %59, %61, %cst_74 {dimension_numbers = #tpu.dot_dimension_numbers<[1], [0], [0], [1], [0, 0, 1, 1], [], []>} : vector<256x2xbf16>, vector<2x4xbf16>, vector<256x4xf32> -> vector<256x4xf32>
    %63 = arith.addf %58, %62 : vector<256x4xf32>
    %c0_75 = arith.constant 0 : index
    %c0_76 = arith.constant 0 : index
    %64 = vector.load %arg8[%c0_75, %c0_76] : memref<256x4xf32, #tpu.memory_space<vmem>>, vector<256x4xf32>
    tpu.vector_store %arg8[%c0_75, %c0_76], %63 {strides = array<i32>} : memref<256x4xf32, #tpu.memory_space<vmem>>, vector<256x4xf32>,
    %c1_77 = arith.constant 1 : index
    %c2_78 = arith.constant 2 : index
    %c0_79 = arith.constant 0 : index
    %65 = vector.load %arg7[%c1_77, %c2_78, %c0_79] : memref<18x18x2xf32, #tpu.memory_space<vmem>>, vector<16x16x2xf32>
    %66 = vector.shape_cast %65 : vector<16x16x2xf32> to vector<256x2xf32>
    %c0_80 = arith.constant 0 : index
    %c0_81 = arith.constant 0 : index
    %67 = vector.load %arg8[%c0_80, %c0_81] : memref<256x4xf32, #tpu.memory_space<vmem>>, vector<256x4xf32>
    %68 = arith.truncf %66 : vector<256x2xf32> to vector<256x2xbf16>
    %c5 = arith.constant 5 : index
    %c0_82 = arith.constant 0 : index
    %c0_83 = arith.constant 0 : index
    %69 = vector.load %arg4[%c5, %c0_82, %c0_83] : memref<9x2x4xbf16, #tpu.memory_space<vmem>>, vector<1x2x4xbf16>
    %70 = vector.shape_cast %69 : vector<1x2x4xbf16> to vector<2x4xbf16>
    %cst_84 = arith.constant dense<0.000000e+00> : vector<256x4xf32>
    %71 = tpu.matmul %68, %70, %cst_84 {dimension_numbers = #tpu.dot_dimension_numbers<[1], [0], [0], [1], [0, 0, 1, 1], [], []>} : vector<256x2xbf16>, vector<2x4xbf16>, vector<256x4xf32> -> vector<256x4xf32>
    %72 = arith.addf %67, %71 : vector<256x4xf32>
    %c0_85 = arith.constant 0 : index
    %c0_86 = arith.constant 0 : index
    %73 = vector.load %arg8[%c0_85, %c0_86] : memref<256x4xf32, #tpu.memory_space<vmem>>, vector<256x4xf32>
    tpu.vector_store %arg8[%c0_85, %c0_86], %72 {strides = array<i32>} : memref<256x4xf32, #tpu.memory_space<vmem>>, vector<256x4xf32>,
    %c2_87 = arith.constant 2 : index
    %c0_88 = arith.constant 0 : index
    %c0_89 = arith.constant 0 : index
    %74 = vector.load %arg7[%c2_87, %c0_88, %c0_89] : memref<18x18x2xf32, #tpu.memory_space<vmem>>, vector<16x16x2xf32>
    %75 = vector.shape_cast %74 : vector<16x16x2xf32> to vector<256x2xf32>
    %c0_90 = arith.constant 0 : index
    %c0_91 = arith.constant 0 : index
    %76 = vector.load %arg8[%c0_90, %c0_91] : memref<256x4xf32, #tpu.memory_space<vmem>>, vector<256x4xf32>
    %77 = arith.truncf %75 : vector<256x2xf32> to vector<256x2xbf16>
    %c6 = arith.constant 6 : index
    %c0_92 = arith.constant 0 : index
    %c0_93 = arith.constant 0 : index
    %78 = vector.load %arg4[%c6, %c0_92, %c0_93] : memref<9x2x4xbf16, #tpu.memory_space<vmem>>, vector<1x2x4xbf16>
    %79 = vector.shape_cast %78 : vector<1x2x4xbf16> to vector<2x4xbf16>
    %cst_94 = arith.constant dense<0.000000e+00> : vector<256x4xf32>
    %80 = tpu.matmul %77, %79, %cst_94 {dimension_numbers = #tpu.dot_dimension_numbers<[1], [0], [0], [1], [0, 0, 1, 1], [], []>} : vector<256x2xbf16>, vector<2x4xbf16>, vector<256x4xf32> -> vector<256x4xf32>
    %81 = arith.addf %76, %80 : vector<256x4xf32>
    %c0_95 = arith.constant 0 : index
    %c0_96 = arith.constant 0 : index
    %82 = vector.load %arg8[%c0_95, %c0_96] : memref<256x4xf32, #tpu.memory_space<vmem>>, vector<256x4xf32>
    tpu.vector_store %arg8[%c0_95, %c0_96], %81 {strides = array<i32>} : memref<256x4xf32, #tpu.memory_space<vmem>>, vector<256x4xf32>,
    %c2_97 = arith.constant 2 : index
    %c1_98 = arith.constant 1 : index
    %c0_99 = arith.constant 0 : index
    %83 = vector.load %arg7[%c2_97, %c1_98, %c0_99] : memref<18x18x2xf32, #tpu.memory_space<vmem>>, vector<16x16x2xf32>
    %84 = vector.shape_cast %83 : vector<16x16x2xf32> to vector<256x2xf32>
    %c0_100 = arith.constant 0 : index
    %c0_101 = arith.constant 0 : index
    %85 = vector.load %arg8[%c0_100, %c0_101] : memref<256x4xf32, #tpu.memory_space<vmem>>, vector<256x4xf32>
    %86 = arith.truncf %84 : vector<256x2xf32> to vector<256x2xbf16>
    %c7 = arith.constant 7 : index
    %c0_102 = arith.constant 0 : index
    %c0_103 = arith.constant 0 : index
    %87 = vector.load %arg4[%c7, %c0_102, %c0_103] : memref<9x2x4xbf16, #tpu.memory_space<vmem>>, vector<1x2x4xbf16>
    %88 = vector.shape_cast %87 : vector<1x2x4xbf16> to vector<2x4xbf16>
    %cst_104 = arith.constant dense<0.000000e+00> : vector<256x4xf32>
    %89 = tpu.matmul %86, %88, %cst_104 {dimension_numbers = #tpu.dot_dimension_numbers<[1], [0], [0], [1], [0, 0, 1, 1], [], []>} : vector<256x2xbf16>, vector<2x4xbf16>, vector<256x4xf32> -> vector<256x4xf32>
    %90 = arith.addf %85, %89 : vector<256x4xf32>
    %c0_105 = arith.constant 0 : index
    %c0_106 = arith.constant 0 : index
    %91 = vector.load %arg8[%c0_105, %c0_106] : memref<256x4xf32, #tpu.memory_space<vmem>>, vector<256x4xf32>
    tpu.vector_store %arg8[%c0_105, %c0_106], %90 {strides = array<i32>} : memref<256x4xf32, #tpu.memory_space<vmem>>, vector<256x4xf32>,
    %c2_107 = arith.constant 2 : index
    %c2_108 = arith.constant 2 : index
    %c0_109 = arith.constant 0 : index
    %92 = vector.load %arg7[%c2_107, %c2_108, %c0_109] : memref<18x18x2xf32, #tpu.memory_space<vmem>>, vector<16x16x2xf32>
    %93 = vector.shape_cast %92 : vector<16x16x2xf32> to vector<256x2xf32>
    %c0_110 = arith.constant 0 : index
    %c0_111 = arith.constant 0 : index
    %94 = vector.load %arg8[%c0_110, %c0_111] : memref<256x4xf32, #tpu.memory_space<vmem>>, vector<256x4xf32>
    %95 = arith.truncf %93 : vector<256x2xf32> to vector<256x2xbf16>
    %c8 = arith.constant 8 : index
    %c0_112 = arith.constant 0 : index
    %c0_113 = arith.constant 0 : index
    %96 = vector.load %arg4[%c8, %c0_112, %c0_113] : memref<9x2x4xbf16, #tpu.memory_space<vmem>>, vector<1x2x4xbf16>
    %97 = vector.shape_cast %96 : vector<1x2x4xbf16> to vector<2x4xbf16>
    %cst_114 = arith.constant dense<0.000000e+00> : vector<256x4xf32>
    %98 = tpu.matmul %95, %97, %cst_114 {dimension_numbers = #tpu.dot_dimension_numbers<[1], [0], [0], [1], [0, 0, 1, 1], [], []>} : vector<256x2xbf16>, vector<2x4xbf16>, vector<256x4xf32> -> vector<256x4xf32>
    %99 = arith.addf %94, %98 : vector<256x4xf32>
    %c0_115 = arith.constant 0 : index
    %c0_116 = arith.constant 0 : index
    %100 = vector.load %arg8[%c0_115, %c0_116] : memref<256x4xf32, #tpu.memory_space<vmem>>, vector<256x4xf32>
    tpu.vector_store %arg8[%c0_115, %c0_116], %99 {strides = array<i32>} : memref<256x4xf32, #tpu.memory_space<vmem>>, vector<256x4xf32>,
    %c0_117 = arith.constant 0 : index
    %c0_118 = arith.constant 0 : index
    %101 = vector.load %arg8[%c0_117, %c0_118] : memref<256x4xf32, #tpu.memory_space<vmem>>, vector<256x4xf32>
    %c0_119 = arith.constant 0 : index
    %c0_120 = arith.constant 0 : index
    %102 = vector.load %arg5[%c0_119, %c0_120] : memref<1x4xf32, #tpu.memory_space<vmem>>, vector<1x4xf32>
    %103 = vector.broadcast %102 : vector<1x4xf32> to vector<256x4xf32>
    %104 = arith.addf %101, %103 : vector<256x4xf32>
    %cst_121 = arith.constant 1.000000e-01 : f32
    %105 = vector.broadcast %cst_121 : f32 to vector<256x4xf32>
    %106 = arith.mulf %105, %104 : vector<256x4xf32>
    %107 = arith.maximumf %104, %106 : vector<256x4xf32>
    %c0_122 = arith.constant 0 : index
    %c0_123 = arith.constant 0 : index
    %c0_124 = arith.constant 0 : index
    %108 = vector.load %arg1[%c0_122, %c0_123, %c0_124] : memref<1x256x4xbf16, #tpu.memory_space<vmem>>, vector<1x256x4xbf16>
    %109 = vector.shape_cast %108 : vector<1x256x4xbf16> to vector<256x4xbf16>
    %110 = arith.extf %109 : vector<256x4xbf16> to vector<256x4xf32>
    %111 = arith.addf %107, %110 : vector<256x4xf32>
    %c0_125 = arith.constant 0 : index
    %c0_126 = arith.constant 0 : index
    %c0_127 = arith.constant 0 : index
    %112 = vector.load %arg6[%c0_125, %c0_126, %c0_127] : memref<1x256x4xf32, #tpu.memory_space<vmem>>, vector<1x256x4xf32>
    %113 = vector.shape_cast %112 : vector<1x256x4xf32> to vector<256x4xf32>
    %114 = vector.shape_cast %111 : vector<256x4xf32> to vector<1x256x4xf32>
    tpu.vector_store %arg6[%c0_125, %c0_126, %c0_127], %114 {strides = array<i32>} : memref<1x256x4xf32, #tpu.memory_space<vmem>>, vector<1x256x4xf32>,
    return
  }
  func.func @transform_0(%arg0: i32) -> (i32, i32, i32) {
    %c0_i32 = arith.constant 0 : i32
    %c0_i32_0 = arith.constant 0 : i32
    %c0_i32_1 = arith.constant 0 : i32
    return %arg0, %c0_i32, %c0_i32_0 : i32, i32, i32
  }
  func.func @transform_1(%arg0: i32) -> (i32, i32) {
    %c0_i32 = arith.constant 0 : i32
    %c0_i32_0 = arith.constant 0 : i32
    %c0_i32_1 = arith.constant 0 : i32
    return %c0_i32, %c0_i32_0 : i32, i32
  }
  func.func @transform_2(%arg0: i32) -> (i32, i32) {
    %c0_i32 = arith.constant 0 : i32
    %c0_i32_0 = arith.constant 0 : i32
    %c0_i32_1 = arith.constant 0 : i32
    return %c0_i32, %c0_i32_0 : i32, i32
  }
  func.func @transform_3(%arg0: i32) -> (i32, i32, i32) {
    %c0_i32 = arith.constant 0 : i32
    %c0_i32_0 = arith.constant 0 : i32
    %c0_i32_1 = arith.constant 0 : i32
    %c0_i32_2 = arith.constant 0 : i32
    return %c0_i32, %c0_i32_0, %c0_i32_1 : i32, i32, i32
  }
  func.func @transform_4(%arg0: i32) -> (i32, i32) {
    %c0_i32 = arith.constant 0 : i32
    %c0_i32_0 = arith.constant 0 : i32
    %c0_i32_1 = arith.constant 0 : i32
    return %c0_i32, %c0_i32_0 : i32, i32
  }
  func.func @transform_5(%arg0: i32) -> (i32, i32, i32) {
    %c0_i32 = arith.constant 0 : i32
    %c0_i32_0 = arith.constant 0 : i32
    %c0_i32_1 = arith.constant 0 : i32
    return %arg0, %c0_i32, %c0_i32_0 : i32, i32, i32
  }
}

</mosaic_0001>

<bundles_post_ra>
// kernel: tpu_custom_call.1
= control target key start
LH: loop header
LB: loop body
LE: loop exit
PB: predicated region body
PF: predicated region fallthrough
CT: control target
= control target key end

     0   :  { %s5134_s18 = smov 0   ;;  %s6201_s0 = inlined_call_operand.vmem [shape: bf16[2,256,4], index: 0, kind: input, shape index: {}]   ;;  %s6202_s1 = inlined_call_operand.vmem [shape: bf16[4,2], index: 1, kind: input, shape index: {}]   ;;  %s6203_s2 = inlined_call_operand.vmem [shape: f32[1,2], index: 2, kind: input, shape index: {}]   ;;  %s6204_s3 = inlined_call_operand.vmem [shape: bf16[9,2,4], index: 3, kind: input, shape index: {}]   ;;  %s6205_s4 = inlined_call_operand.vmem [shape: f32[1,4], index: 4, kind: input, shape index: {}]   ;;  %s6206_s5 = inlined_call_operand.vmem [shape: f32[2,256,4], index: 5, kind: output, shape index: {}]  }
   0x1 LB: > { %s4272_s19 = sadd.s32 4294967295, %s5101_s18   ;;  %p4276_p0 = scmp.ge.s32.totalorder %s5101_s18, 1  ;;  %s5101_s18 = sphi %s5134_s18, %s15_s18  }
   0x2   : > { %p187_p1 = scmp.lt.s32.totalorder %s5101_s18, 3 }
   0x4   : > { %p188_p2 = pnand %p4276_p0, %p187_p1 }
   0x5   : > { %v258_v0 = vld [vmem:[%s6202_s1] sm:$0x3] (!%p188_p2)  ;;  %vm395_vm0 = vcmask (!%p188_p2), 1041408   ;;  %p215_p3 = scmp.lt.s32.totalorder (!%p188_p2), %s4272_s19, 1  ;;  %vm346_vm1 = vcmask (!%p188_p2), 31744   ;;  %vm624_vm2 = vcmask (!%p188_p2), 15360  }
   0x6   : > { %191 = sbr.rel (%p188_p2) target bundleno = 796 (0x31c), region = 40  ;;  %5060 = vmatprep.subr.msk.bf16.mxu0 (!%p188_p2), %vm395_vm0, %v258_v0  ;;  %v397_v1 = vsel (!%p188_p2), %vm395_vm0, %v258_v0, 0  ;;  %vm634_vm3 = vcmask (!%p188_p2), 8192   ;;  %v5103_v18 = vmov (!%p188_p2), 0.0   ;;  %vm627_vm4 = vcmask (!%p188_p2), 9216  }
   0x7   : > { %4721 = vmatpush3.bf16.msra.mxu0 (!%p188_p2), %v397_v1  ;;  %625 = vst.msk [vmem:[#allocation2] sm:$0xff] (!%p188_p2), %vm624_vm2, %v5103_v18  ;;  %626 = vst.msk [vmem:[#allocation2 + $0x8] sm:$0xff] (!%p188_p2), %vm624_vm2, %v5103_v18  ;;  %vm860_vm5 = vcmask (!%p188_p2), 1040384   ;;  %v4330_v19 = vld [vmem:[%s6204_s3 + $0x1] sm:$0x1] (!%p188_p2) }
   0x8   : > { %630 = vst.msk [vmem:[#allocation2 + $0x198] sm:$0xff] (!%p188_p2), %vm624_vm2, %v5103_v18  ;;  %631 = vst.msk [vmem:[#allocation2 + $0x1a0] sm:$0xff] (!%p188_p2), %vm624_vm2, %v5103_v18  ;;  %v811_v20 = vld [vmem:[%s6204_s3] sm:$0x1] (!%p188_p2)  ;;  %5062 = vmatprep.subr.msk.bf16.mxu0 (!%p188_p2), %vm860_vm5, %v4330_v19  ;;  %v1220_v21 = vsel (!%p188_p2), %vm860_vm5, %v4330_v19, 0 }
   0x9   : > { %699 = vst.msk [vmem:[#allocation3] sm:$0xff] (!%p188_p2), %vm346_vm1, %v5103_v18  ;;  %700 = vst.msk [vmem:[#allocation3 + $0x8] sm:$0xff] (!%p188_p2), %vm346_vm1, %v5103_v18  ;;  %5061 = vmatprep.subr.msk.bf16.mxu1 (!%p188_p2), %vm860_vm5, %v811_v20  ;;  %v862_v22 = vsel (!%p188_p2), %vm860_vm5, %v811_v20, 0  ;;  %v4347_v29 = vld [vmem:[%s6204_s3 + $0x2] sm:$0x1] (!%p188_p2) }
   0xa   : > { %701 = vst.msk [vmem:[#allocation3 + $0x10] sm:$0xff] (!%p188_p2), %vm346_vm1, %v5103_v18  ;;  %702 = vst.msk [vmem:[#allocation3 + $0x18] sm:$0xff] (!%p188_p2), %vm346_vm1, %v5103_v18  ;;  %4755 = vmatpush3.bf16.msra.mxu1 (!%p188_p2), %v862_v22  ;;  %v5342_v30 = vld [vmem:[%s6204_s3 + $0x3] sm:$0x1] (!%p188_p2)  ;;  %v5349_v31 = vld [vmem:[%s6203_s2] ss:$0 sm:$0xff] (!%p188_p2) }
   0xb   : > { %703 = vst.msk [vmem:[#allocation3 + $0x20] sm:$0xff] (!%p188_p2), %vm346_vm1, %v5103_v18  ;;  %704 = vst.msk [vmem:[#allocation3 + $0x28] sm:$0xff] (!%p188_p2), %vm346_vm1, %v5103_v18  ;;  %5063 = vmatprep.subr.msk.bf16.mxu1 (!%p188_p2), %vm860_vm5, %v4347_v29  ;;  %v1936_v20 = vsel (!%p188_p2), %vm860_vm5, %v5342_v30, 0 }
   0xc   : > { %705 = vst.msk [vmem:[#allocation3 + $0x30] sm:$0xff] (!%p188_p2), %vm346_vm1, %v5103_v18  ;;  %706 = vst.msk [vmem:[#allocation3 + $0x38] sm:$0xff] (!%p188_p2), %vm346_vm1, %v5103_v18 }
   0xd   : > { %s6208_s19 = smov (!%p215_p3, %s4272_s19), 1  ;;  %707 = vst.msk [vmem:[#allocation3 + $0x40] sm:$0xff] %vm346_vm1, %v5103_v18  ;;  %708 = vst.msk [vmem:[#allocation3 + $0x48] sm:$0xff] %vm346_vm1, %v5103_v18 }
   0xe   : > { %s4469_s22 = sshll.u32 %s6208_s19, 7  ;;  %709 = vst.msk [vmem:[#allocation3 + $0x50] sm:$0xff] %vm346_vm1, %v5103_v18  ;;  %710 = vst.msk [vmem:[#allocation3 + $0x58] sm:$0xff] %vm346_vm1, %v5103_v18  ;;  %v731_v23 = vld [vmem:[#allocation2] sm:$0xff]  ;;  %v732_v24 = vld [vmem:[#allocation2 + $0x8] sm:$0xff]  ;;  %s4470_s26 = sshll.u32 %s6208_s19, 8 }
   0xf   : > { %s5151_s25 = scalar_lea.vmem %s6201_s0, %s4469_s22  ;;  %711 = vst.msk [vmem:[#allocation3 + $0x60] sm:$0xff] %vm346_vm1, %v5103_v18  ;;  %712 = vst.msk [vmem:[#allocation3 + $0x68] sm:$0xff] %vm346_vm1, %v5103_v18  ;;  %v1089_v25 = vld [vmem:[#allocation2 + $0x1] sm:$0xff]  ;;  %v795_v26 = vpack.c.bf16 %v732_v24, %v731_v23  ;;  %s6066_s19 = scalar_lea.vmem %s6206_s5, %s4470_s26 }
  0x10   : > { %v5079_v2 = vld [vmem:[%s5151_s25] sm:$0xff]   ;;  %v5080_v3 = vld [vmem:[%s5151_s25 + $0x8] sm:$0xff]   ;;  %v5081_v4 = vld [vmem:[%s5151_s25 + $0x10] sm:$0xff]   ;;  %713 = vst.msk [vmem:[#allocation3 + $0x70] sm:$0xff] %vm346_vm1, %v5103_v18 }
  0x11   : > { %4722 = vmatprep.mubr.msk.bf16.mxu0 %vm346_vm1, %v5079_v2  ;;  %v5082_v5 = vld [vmem:[%s5151_s25 + $0x18] sm:$0xff]   ;;  %v5083_v6 = vld [vmem:[%s5151_s25 + $0x20] sm:$0xff]   ;;  %v5084_v7 = vld [vmem:[%s5151_s25 + $0x28] sm:$0xff]   ;;  %714 = vst.msk [vmem:[#allocation3 + $0x78] sm:$0xff] %vm346_vm1, %v5103_v18  ;;  %4756 = vmatprep.mubr.msk.bf16.mxu1 %vm624_vm2, %v795_v26 }
  0x12   : > { %4723 = vmatmul.mubr.msk.bf16.vlgmr.msra.gmra.mrb[0].mxu0 %vm346_vm1, %v5080_v3  ;;  %v5085_v8 = vld [vmem:[%s5151_s25 + $0x30] sm:$0xff]   ;;  %v5086_v9 = vld [vmem:[%s5151_s25 + $0x38] sm:$0xff]   ;;  %v5087_v10 = vld [vmem:[%s5151_s25 + $0x40] sm:$0xff]   ;;  %715 = vst.msk [vmem:[#allocation3 + $0x80] sm:$0xff] %vm346_vm1, %v5103_v18 }
  0x13   : > { %4726 = vmatprep.mubr.msk.bf16.mxu0 %vm346_vm1, %v5081_v4  ;;  %v5088_v11 = vld [vmem:[%s5151_s25 + $0x48] sm:$0xff]   ;;  %v5089_v12 = vld [vmem:[%s5151_s25 + $0x50] sm:$0xff]   ;;  %v5090_v13 = vld [vmem:[%s5151_s25 + $0x58] sm:$0xff]   ;;  %716 = vst.msk [vmem:[#allocation3 + $0x88] sm:$0xff] %vm346_vm1, %v5103_v18  ;;  %4789 = vmatpush3.bf16.msra.mxu0 %v1220_v21 }
  0x14   : > { %v5091_v14 = vld [vmem:[%s5151_s25 + $0x60] sm:$0xff]   ;;  %v5092_v15 = vld [vmem:[%s5151_s25 + $0x68] sm:$0xff]   ;;  %v5093_v16 = vld [vmem:[%s5151_s25 + $0x70] sm:$0xff]   ;;  %717 = vst.msk [vmem:[#allocation3 + $0x90] sm:$0xff] %vm346_vm1, %v5103_v18  ;;  %5064 = vmatprep.subr.msk.bf16.mxu0 %vm860_vm5, %v5342_v30 }
  0x15   : > { %v5094_v17 = vld [vmem:[%s5151_s25 + $0x78] sm:$0xff]   ;;  %718 = vst.msk [vmem:[#allocation3 + $0x98] sm:$0xff] %vm346_vm1, %v5103_v18  ;;  %719 = vst.msk [vmem:[#allocation3 + $0xa0] sm:$0xff] %vm346_vm1, %v5103_v18  ;;  %v5389_v24 = vld [vmem:[%s6204_s3 + $0x4] sm:$0x1] }
  0x16   : > { %720 = vst.msk [vmem:[#allocation3 + $0xa8] sm:$0xff] %vm346_vm1, %v5103_v18  ;;  %721 = vst.msk [vmem:[#allocation3 + $0xb0] sm:$0xff] %vm346_vm1, %v5103_v18 }
  0x17   : > { %722 = vst.msk [vmem:[#allocation3 + $0xb8] sm:$0xff] %vm346_vm1, %v5103_v18  ;;  %723 = vst.msk [vmem:[#allocation3 + $0xc0] sm:$0xff] %vm346_vm1, %v5103_v18 }
  0x18   : > { %724 = vst.msk [vmem:[#allocation3 + $0xc8] sm:$0xff] %vm346_vm1, %v5103_v18  ;;  %725 = vst.msk [vmem:[#allocation3 + $0xd0] sm:$0xff] %vm346_vm1, %v5103_v18 }
  0x19   : > { %726 = vst.msk [vmem:[#allocation3 + $0xd8] sm:$0xff] %vm346_vm1, %v5103_v18  ;;  %727 = vst.msk [vmem:[#allocation3 + $0xe0] sm:$0xff] %vm346_vm1, %v5103_v18 }
  0x1a   : > { %4727 = vmatmul.mubr.msk.bf16.gmra.mrb[4].mxu0 %vm346_vm1, %v5082_v5  ;;  %728 = vst.msk [vmem:[#allocation3 + $0xe8] sm:$0xff] %vm346_vm1, %v5103_v18  ;;  %729 = vst.msk [vmem:[#allocation3 + $0xf0] sm:$0xff] %vm346_vm1, %v5103_v18 }
  0x1b   : > { %4730 = vmatprep.mubr.msk.bf16.mxu0 %vm346_vm1, %v5083_v6  ;;  %730 = vst.msk [vmem:[#allocation3 + $0xf8] sm:$0xff] %vm346_vm1, %v5103_v18 }
  0x1c   : > { %635 = vst.msk [vmem:[#allocation2 + $0x18] sm:$0x1] %vm634_vm3, %v5103_v18  ;;  %636 = vst.msk [vmem:[#allocation2 + $0x30] sm:$0x1] %vm634_vm3, %v5103_v18 }
  0x1d   : > { %637 = vst.msk [vmem:[#allocation2 + $0x48] sm:$0x1] %vm634_vm3, %v5103_v18  ;;  %638 = vst.msk [vmem:[#allocation2 + $0x60] sm:$0x1] %vm634_vm3, %v5103_v18 }
  0x1e   : > { %639 = vst.msk [vmem:[#allocation2 + $0x78] sm:$0x1] %vm634_vm3, %v5103_v18  ;;  %640 = vst.msk [vmem:[#allocation2 + $0x90] sm:$0x1] %vm634_vm3, %v5103_v18 }
  0x1f   : > { %641 = vst.msk [vmem:[#allocation2 + $0xa8] sm:$0x1] %vm634_vm3, %v5103_v18  ;;  %642 = vst.msk [vmem:[#allocation2 + $0xc0] sm:$0x1] %vm634_vm3, %v5103_v18 }
  0x20   : > { %643 = vst.msk [vmem:[#allocation2 + $0xd8] sm:$0x1] %vm634_vm3, %v5103_v18  ;;  %644 = vst.msk [vmem:[#allocation2 + $0xf0] sm:$0x1] %vm634_vm3, %v5103_v18 }
  0x21   : > { %645 = vst.msk [vmem:[#allocation2 + $0x108] sm:$0x1] %vm634_vm3, %v5103_v18  ;;  %646 = vst.msk [vmem:[#allocation2 + $0x120] sm:$0x1] %vm634_vm3, %v5103_v18 }
  0x22   : > { %4731 = vmatmul.mubr.msk.bf16.gmra.mrb[8].mxu0 %vm346_vm1, %v5084_v7  ;;  %647 = vst.msk [vmem:[#allocation2 + $0x138] sm:$0x1] %vm634_vm3, %v5103_v18  ;;  %648 = vst.msk [vmem:[#allocation2 + $0x150] sm:$0x1] %vm634_vm3, %v5103_v18 }
  0x23   : > { %4734 = vmatprep.mubr.msk.bf16.mxu0 %vm346_vm1, %v5085_v8  ;;  %649 = vst.msk [vmem:[#allocation2 + $0x168] sm:$0x1] %vm634_vm3, %v5103_v18  ;;  %650 = vst.msk [vmem:[#allocation2 + $0x180] sm:$0x1] %vm634_vm3, %v5103_v18 }
  0x24   : > { %651 = vst.msk [vmem:[#allocation2 + $0x29] sm:$0x1] %vm634_vm3, %v5103_v18  ;;  %652 = vst.msk [vmem:[#allocation2 + $0x41] sm:$0x1] %vm634_vm3, %v5103_v18 }
  0x25   : > { %653 = vst.msk [vmem:[#allocation2 + $0x59] sm:$0x1] %vm634_vm3, %v5103_v18  ;;  %654 = vst.msk [vmem:[#allocation2 + $0x71] sm:$0x1] %vm634_vm3, %v5103_v18 }
  0x26   : > { %655 = vst.msk [vmem:[#allocation2 + $0x89] sm:$0x1] %vm634_vm3, %v5103_v18  ;;  %656 = vst.msk [vmem:[#allocation2 + $0xa1] sm:$0x1] %vm634_vm3, %v5103_v18 }
  0x27   : > { %657 = vst.msk [vmem:[#allocation2 + $0xb9] sm:$0x1] %vm634_vm3, %v5103_v18  ;;  %658 = vst.msk [vmem:[#allocation2 + $0xd1] sm:$0x1] %vm634_vm3, %v5103_v18 }
  0x28   : > { %659 = vst.msk [vmem:[#allocation2 + $0xe9] sm:$0x1] %vm634_vm3, %v5103_v18  ;;  %660 = vst.msk [vmem:[#allocation2 + $0x101] sm:$0x1] %vm634_vm3, %v5103_v18 }
  0x29   : > { %661 = vst.msk [vmem:[#allocation2 + $0x119] sm:$0x1] %vm634_vm3, %v5103_v18  ;;  %662 = vst.msk [vmem:[#allocation2 + $0x131] sm:$0x1] %vm634_vm3, %v5103_v18 }
  0x2a   : > { %4735 = vmatmul.mubr.msk.bf16.gmra.mrb[12].mxu0 %vm346_vm1, %v5086_v9  ;;  %663 = vst.msk [vmem:[#allocation2 + $0x149] sm:$0x1] %vm634_vm3, %v5103_v18  ;;  %664 = vst.msk [vmem:[#allocation2 + $0x161] sm:$0x1] %vm634_vm3, %v5103_v18 }
  0x2b   : > { %4738 = vmatprep.mubr.msk.bf16.mxu0 %vm346_vm1, %v5087_v10  ;;  %665 = vst.msk [vmem:[#allocation2 + $0x179] sm:$0x1] %vm634_vm3, %v5103_v18  ;;  %666 = vst.msk [vmem:[#allocation2 + $0x191] sm:$0x1] %vm634_vm3, %v5103_v18 }
  0x2c   : > { %628 = vst.msk [vmem:[#allocation2 + $0x10] sm:$0x3] %vm627_vm4, %v5103_v18  ;;  %632 = vst.msk [vmem:[#allocation2 + $0x1a8] sm:$0x3] %vm627_vm4, %v5103_v18 }
  0x32   : > { %4739 = vmatmul.mubr.msk.bf16.gmra.mrb[16].mxu0 %vm346_vm1, %v5088_v11 }
  0x33   : > { %4742 = vmatprep.mubr.msk.bf16.mxu0 %vm346_vm1, %v5089_v12  ;;  %v1090_v27 = vld [vmem:[#allocation2 + $0x9] sm:$0xff] }
  0x34   : > { %v1153_v28 = vpack.c.bf16 %v1090_v27, %v1089_v25  ;;  %v5394_v25 = vld [vmem:[%s6204_s3 + $0x5] sm:$0x1] }
  0x3a   : > { %4743 = vmatmul.mubr.msk.bf16.gmra.mrb[20].mxu0 %vm346_vm1, %v5090_v13  ;;  %v1578_v13 = vsel %vm860_vm5, %v4347_v29, 0 }
  0x3b   : > { %4746 = vmatprep.mubr.msk.bf16.mxu0 %vm346_vm1, %v5091_v14 }
  0x42   : > { %4747 = vmatmul.mubr.msk.bf16.gmra.mrb[24].mxu0 %vm346_vm1, %v5092_v15 }
  0x43   : > { %4750 = vmatprep.mubr.msk.bf16.mxu0 %vm346_vm1, %v5093_v16 }
  0x4a   : > { %4751 = vmatmul.mubr.msk.bf16.gmra.mrb[28].mxu0 %vm346_vm1, %v5094_v17 }
  0x4b   : > { %4790 = vmatprep.mubr.msk.bf16.mxu0 %vm624_vm2, %v1153_v28 }
  0xe5   : > { %v4724_v32 = vpop.f32.mrb[0].mxu0 }
  0xe6   : > { %v442_v33 = vadd.f32 %v4724_v32, %v5349_v31  ;;  %v433_v34 = vpop.f32.mrb[1].mxu0 }
  0xe7   : > { %v434_v35 = vadd.f32 %v5349_v31, %v433_v34  ;;  %v4725_v36 = vpop.f32.mrb[2].mxu0 }
  0xe8   : > { %v562_v37 = vmul.f32 0.1, %v442_v33  ;;  %v445_v38 = vadd.f32 %v4725_v36, %v5349_v31  ;;  %v436_v39 = vpop.f32.mrb[3].mxu0 }
  0xe9   : > { %v560_v40 = vmul.f32 0.1, %v434_v35  ;;  %v437_v41 = vadd.f32 %v5349_v31, %v436_v39 }
  0xea   : > { %v594_v42 = vmax.f32 %v442_v33, %v562_v37  ;;  %v563_v43 = vmul.f32 0.1, %v445_v38 }
  0xeb   : > { %v592_v44 = vmax.f32 %v434_v35, %v560_v40  ;;  %v561_v45 = vmul.f32 0.1, %v437_v41 }
  0xec   : > { %669 = vst.msk [vmem:[#allocation2 + $0x31] sm:$0xff] %vm624_vm2, %v594_v42  ;;  %v595_v46 = vmax.f32 %v445_v38, %v563_v43 }
  0xed   : > { %667 = vst.msk [vmem:[#allocation2 + $0x19] sm:$0xff] %vm624_vm2, %v592_v44  ;;  %v593_v47 = vmax.f32 %v437_v41, %v561_v45  ;;  %v4728_v48 = vpop.f32.mrb[4].mxu0 }
  0xee   : > { %670 = vst.msk [vmem:[#allocation2 + $0x39] sm:$0xff] %vm624_vm2, %v595_v46  ;;  %v458_v49 = vadd.f32 %v4728_v48, %v5349_v31  ;;  %v449_v50 = vpop.f32.mrb[5].mxu0 }
  0xef   : > { %668 = vst.msk [vmem:[#allocation2 + $0x21] sm:$0xff] %vm624_vm2, %v593_v47  ;;  %v450_v51 = vadd.f32 %v5349_v31, %v449_v50  ;;  %v4729_v52 = vpop.f32.mrb[6].mxu0 }
  0xf0   : > { %v566_v53 = vmul.f32 0.1, %v458_v49  ;;  %v461_v54 = vadd.f32 %v4729_v52, %v5349_v31  ;;  %v452_v55 = vpop.f32.mrb[7].mxu0 }
  0xf1   : > { %v564_v56 = vmul.f32 0.1, %v450_v51  ;;  %v453_v57 = vadd.f32 %v5349_v31, %v452_v55 }
  0xf2   : > { %v598_v58 = vmax.f32 %v458_v49, %v566_v53  ;;  %v567_v59 = vmul.f32 0.1, %v461_v54 }
  0xf3   : > { %v596_v60 = vmax.f32 %v450_v51, %v564_v56  ;;  %v565_v61 = vmul.f32 0.1, %v453_v57  ;;  %v735_v14 = vld [vmem:[#allocation2 + $0x30] sm:$0xff] }
  0xf4   : > { %673 = vst.msk [vmem:[#allocation2 + $0x61] sm:$0xff] %vm624_vm2, %v598_v58  ;;  %v599_v62 = vmax.f32 %v461_v54, %v567_v59  ;;  %v733_v1 = vld [vmem:[#allocation2 + $0x18] sm:$0xff] }
  0xf5   : > { %671 = vst.msk [vmem:[#allocation2 + $0x49] sm:$0xff] %vm624_vm2, %v596_v60  ;;  %v597_v63 = vmax.f32 %v453_v57, %v565_v61  ;;  %v4732_v0 = vpop.f32.mrb[8].mxu0  ;;  %v1091_v2 = vld [vmem:[#allocation2 + $0x19] sm:$0xff]  ;;  %v1093_v19 = vld [vmem:[#allocation2 + $0x31] sm:$0xff] }
  0xf6   : > { %v736_v3 = vld [vmem:[#allocation2 + $0x38] sm:$0xff]  ;;  %674 = vst.msk [vmem:[#allocation2 + $0x69] sm:$0xff] %vm624_vm2, %v599_v62  ;;  %v474_v4 = vadd.f32 %v4732_v0, %v5349_v31  ;;  %v465_v5 = vpop.f32.mrb[9].mxu0  ;;  %v734_v6 = vld [vmem:[#allocation2 + $0x20] sm:$0xff] }
  0xf7   : > { %v1092_v7 = vld [vmem:[#allocation2 + $0x21] sm:$0xff]  ;;  %v1094_v8 = vld [vmem:[#allocation2 + $0x39] sm:$0xff]  ;;  %672 = vst.msk [vmem:[#allocation2 + $0x51] sm:$0xff] %vm624_vm2, %v597_v63  ;;  %v466_v9 = vadd.f32 %v5349_v31, %v465_v5  ;;  %v4733_v10 = vpop.f32.mrb[10].mxu0  ;;  %v5369_v11 = vpack.c.bf16 %v734_v6, %v733_v1  ;;  %v5375_v18 = vpack.c.bf16 %v736_v3, %v735_v14 }
  0xf8   : > { %v5371_v12 = vpack.c.bf16 %v1092_v7, %v1091_v2  ;;  %v570_v15 = vmul.f32 0.1, %v474_v4  ;;  %v477_v16 = vadd.f32 %v4733_v10, %v5349_v31  ;;  %v468_v17 = vpop.f32.mrb[11].mxu0  ;;  %v5384_v23 = vpack.c.bf16 %v1094_v8, %v1093_v19 }
  0xf9   : > { %v568_v21 = vmul.f32 0.1, %v466_v9  ;;  %v469_v22 = vadd.f32 %v5349_v31, %v468_v17  ;;  %4757 = vmatmul.mubr.msk.bf16.vlgmr.msra.gmra.mrb[0].mxu1 %vm624_vm2, %v5369_v11 }
  0xfa   : > { %4791 = vmatmul.mubr.msk.bf16.vlgmr.msra.gmra.mrb[32].mxu0 %vm624_vm2, %v5371_v12  ;;  %v602_v26 = vmax.f32 %v474_v4, %v570_v15  ;;  %v571_v27 = vmul.f32 0.1, %v477_v16  ;;  %4823 = vmatpush3.bf16.msra.mxu1 %v1578_v13 }
  0xfb   : > { %4760 = vmatprep.mubr.msk.bf16.mxu1 %vm624_vm2, %v5375_v18  ;;  %v600_v28 = vmax.f32 %v466_v9, %v568_v21  ;;  %v569_v29 = vmul.f32 0.1, %v469_v22  ;;  %4794 = vmatprep.mubr.msk.bf16.mxu0 %vm624_vm2, %v5384_v23  ;;  %v739_v46 = vld [vmem:[#allocation2 + $0x60] sm:$0xff] }
  0xfc   : > { %4857 = vmatpush3.bf16.msra.mxu0 %v1936_v20  ;;  %677 = vst.msk [vmem:[#allocation2 + $0x91] sm:$0xff] %vm624_vm2, %v602_v26  ;;  %v603_v30 = vmax.f32 %v477_v16, %v571_v27  ;;  %5065 = vmatprep.subr.msk.bf16.mxu1 %vm860_vm5, %v5389_v24  ;;  %v737_v34 = vld [vmem:[#allocation2 + $0x48] sm:$0xff] }
  0xfd   : > { %5066 = vmatprep.subr.msk.bf16.mxu0 %vm860_vm5, %v5394_v25  ;;  %675 = vst.msk [vmem:[#allocation2 + $0x79] sm:$0xff] %vm624_vm2, %v600_v28  ;;  %v601_v32 = vmax.f32 %v469_v22, %v569_v29  ;;  %v4736_v33 = vpop.f32.mrb[12].mxu0  ;;  %v740_v35 = vld [vmem:[#allocation2 + $0x68] sm:$0xff] }
  0xfe   : > { %v1098_v36 = vld [vmem:[#allocation2 + $0x69] sm:$0xff]  ;;  %678 = vst.msk [vmem:[#allocation2 + $0x99] sm:$0xff] %vm624_vm2, %v603_v30  ;;  %v490_v37 = vadd.f32 %v4736_v33, %v5349_v31  ;;  %v481_v38 = vpop.f32.mrb[13].mxu0  ;;  %v1096_v41 = vld [vmem:[#allocation2 + $0x51] sm:$0xff]  ;;  %v1097_v47 = vld [vmem:[#allocation2 + $0x61] sm:$0xff]  ;;  %v5415_v51 = vpack.c.bf16 %v740_v35, %v739_v46 }
  0xff   : > { %v738_v39 = vld [vmem:[#allocation2 + $0x50] sm:$0xff]  ;;  %676 = vst.msk [vmem:[#allocation2 + $0x81] sm:$0xff] %vm624_vm2, %v601_v32  ;;  %v482_v42 = vadd.f32 %v5349_v31, %v481_v38  ;;  %v4737_v43 = vpop.f32.mrb[14].mxu0  ;;  %v5417_v52 = vpack.c.bf16 %v1098_v36, %v1097_v47 }
 0x100   : > { %v1095_v40 = vld [vmem:[#allocation2 + $0x49] sm:$0xff]  ;;  %v5410_v44 = vpack.c.bf16 %v738_v39, %v737_v34  ;;  %v574_v48 = vmul.f32 0.1, %v490_v37  ;;  %v493_v49 = vadd.f32 %v4737_v43, %v5349_v31  ;;  %v484_v50 = vpop.f32.mrb[15].mxu0 }
 0x101   : > { %v5412_v45 = vpack.c.bf16 %v1096_v41, %v1095_v40  ;;  %v572_v53 = vmul.f32 0.1, %v482_v42  ;;  %v485_v54 = vadd.f32 %v5349_v31, %v484_v50 }
 0x102   : > { %4761 = vmatmul.mubr.msk.bf16.gmra.mrb[4].mxu1 %vm624_vm2, %v5410_v44  ;;  %v606_v55 = vmax.f32 %v490_v37, %v574_v48  ;;  %v575_v56 = vmul.f32 0.1, %v493_v49 }
 0x103   : > { %4795 = vmatmul.mubr.msk.bf16.gmra.mrb[36].mxu0 %vm624_vm2, %v5412_v45  ;;  %4764 = vmatprep.mubr.msk.bf16.mxu1 %vm624_vm2, %v5415_v51  ;;  %v604_v57 = vmax.f32 %v482_v42, %v572_v53  ;;  %v573_v58 = vmul.f32 0.1, %v485_v54  ;;  %v743_v10 = vld [vmem:[#allocation2 + $0x90] sm:$0xff] }
 0x104   : > { %4798 = vmatprep.mubr.msk.bf16.mxu0 %vm624_vm2, %v5417_v52  ;;  %681 = vst.msk [vmem:[#allocation2 + $0xc1] sm:$0xff] %vm624_vm2, %v606_v55  ;;  %v607_v59 = vmax.f32 %v493_v49, %v575_v56  ;;  %v741_v62 = vld [vmem:[#allocation2 + $0x78] sm:$0xff] }
 0x105   : > { %679 = vst.msk [vmem:[#allocation2 + $0xa9] sm:$0xff] %vm624_vm2, %v604_v57  ;;  %v605_v60 = vmax.f32 %v485_v54, %v573_v58  ;;  %v4740_v61 = vpop.f32.mrb[16].mxu0  ;;  %v744_v63 = vld [vmem:[#allocation2 + $0x98] sm:$0xff] }
 0x106   : > { %v1102_v0 = vld [vmem:[#allocation2 + $0x99] sm:$0xff]  ;;  %682 = vst.msk [vmem:[#allocation2 + $0xc9] sm:$0xff] %vm624_vm2, %v607_v59  ;;  %v506_v1 = vadd.f32 %v4740_v61, %v5349_v31  ;;  %v497_v2 = vpop.f32.mrb[17].mxu0  ;;  %v1100_v5 = vld [vmem:[#allocation2 + $0x81] sm:$0xff]  ;;  %v1101_v13 = vld [vmem:[#allocation2 + $0x91] sm:$0xff]  ;;  %v5439_v17 = vpack.c.bf16 %v744_v63, %v743_v10 }
 0x107   : > { %v742_v3 = vld [vmem:[#allocation2 + $0x80] sm:$0xff]  ;;  %680 = vst.msk [vmem:[#allocation2 + $0xb1] sm:$0xff] %vm624_vm2, %v605_v60  ;;  %v498_v6 = vadd.f32 %v5349_v31, %v497_v2  ;;  %v4741_v7 = vpop.f32.mrb[18].mxu0  ;;  %v5441_v19 = vpack.c.bf16 %v1102_v0, %v1101_v13 }
 0x108   : > { %v1099_v4 = vld [vmem:[#allocation2 + $0x79] sm:$0xff]  ;;  %v5434_v8 = vpack.c.bf16 %v742_v3, %v741_v62  ;;  %v578_v14 = vmul.f32 0.1, %v506_v1  ;;  %v509_v15 = vadd.f32 %v4741_v7, %v5349_v31  ;;  %v500_v16 = vpop.f32.mrb[19].mxu0 }
 0x109   : > { %v5436_v9 = vpack.c.bf16 %v1100_v5, %v1099_v4  ;;  %v576_v20 = vmul.f32 0.1, %v498_v6  ;;  %v501_v21 = vadd.f32 %v5349_v31, %v500_v16 }
 0x10a   : > { %4765 = vmatmul.mubr.msk.bf16.gmra.mrb[8].mxu1 %vm624_vm2, %v5434_v8  ;;  %v610_v22 = vmax.f32 %v506_v1, %v578_v14  ;;  %v579_v26 = vmul.f32 0.1, %v509_v15 }
 0x10b   : > { %4799 = vmatmul.mubr.msk.bf16.gmra.mrb[40].mxu0 %vm624_vm2, %v5436_v9  ;;  %4768 = vmatprep.mubr.msk.bf16.mxu1 %vm624_vm2, %v5439_v17  ;;  %v608_v27 = vmax.f32 %v498_v6, %v576_v20  ;;  %v577_v28 = vmul.f32 0.1, %v501_v21  ;;  %v747_v47 = vld [vmem:[#allocation2 + $0xc0] sm:$0xff] }
 0x10c   : > { %4802 = vmatprep.mubr.msk.bf16.mxu0 %vm624_vm2, %v5441_v19  ;;  %685 = vst.msk [vmem:[#allocation2 + $0xf1] sm:$0xff] %vm624_vm2, %v610_v22  ;;  %v611_v29 = vmax.f32 %v509_v15, %v579_v26  ;;  %v745_v33 = vld [vmem:[#allocation2 + $0xa8] sm:$0xff] }
 0x10d   : > { %683 = vst.msk [vmem:[#allocation2 + $0xd9] sm:$0xff] %vm624_vm2, %v608_v27  ;;  %v609_v30 = vmax.f32 %v501_v21, %v577_v28  ;;  %v4744_v32 = vpop.f32.mrb[20].mxu0  ;;  %v748_v34 = vld [vmem:[#allocation2 + $0xc8] sm:$0xff] }
 0x10e   : > { %v1106_v35 = vld [vmem:[#allocation2 + $0xc9] sm:$0xff]  ;;  %686 = vst.msk [vmem:[#allocation2 + $0xf9] sm:$0xff] %vm624_vm2, %v611_v29  ;;  %v522_v36 = vadd.f32 %v4744_v32, %v5349_v31  ;;  %v513_v37 = vpop.f32.mrb[21].mxu0  ;;  %v1104_v40 = vld [vmem:[#allocation2 + $0xb1] sm:$0xff]  ;;  %v1105_v48 = vld [vmem:[#allocation2 + $0xc1] sm:$0xff]  ;;  %v5463_v54 = vpack.c.bf16 %v748_v34, %v747_v47 }
 0x10f   : > { %v746_v38 = vld [vmem:[#allocation2 + $0xb0] sm:$0xff]  ;;  %684 = vst.msk [vmem:[#allocation2 + $0xe1] sm:$0xff] %vm624_vm2, %v609_v30  ;;  %v514_v41 = vadd.f32 %v5349_v31, %v513_v37  ;;  %v4745_v42 = vpop.f32.mrb[22].mxu0  ;;  %v5465_v55 = vpack.c.bf16 %v1106_v35, %v1105_v48 }
 0x110   : > { %v1103_v39 = vld [vmem:[#allocation2 + $0xa9] sm:$0xff]  ;;  %v5458_v43 = vpack.c.bf16 %v746_v38, %v745_v33  ;;  %v582_v49 = vmul.f32 0.1, %v522_v36  ;;  %v525_v50 = vadd.f32 %v4745_v42, %v5349_v31  ;;  %v516_v53 = vpop.f32.mrb[23].mxu0 }
 0x111   : > { %v5460_v46 = vpack.c.bf16 %v1104_v40, %v1103_v39  ;;  %v580_v56 = vmul.f32 0.1, %v514_v41  ;;  %v517_v57 = vadd.f32 %v5349_v31, %v516_v53 }
 0x112   : > { %4769 = vmatmul.mubr.msk.bf16.gmra.mrb[12].mxu1 %vm624_vm2, %v5458_v43  ;;  %v614_v58 = vmax.f32 %v522_v36, %v582_v49  ;;  %v583_v59 = vmul.f32 0.1, %v525_v50 }
 0x113   : > { %4803 = vmatmul.mubr.msk.bf16.gmra.mrb[44].mxu0 %vm624_vm2, %v5460_v46  ;;  %4772 = vmatprep.mubr.msk.bf16.mxu1 %vm624_vm2, %v5463_v54  ;;  %v612_v60 = vmax.f32 %v514_v41, %v580_v56  ;;  %v581_v61 = vmul.f32 0.1, %v517_v57  ;;  %v751_v20 = vld [vmem:[#allocation2 + $0xf0] sm:$0xff] }
 0x114   : > { %4806 = vmatprep.mubr.msk.bf16.mxu0 %vm624_vm2, %v5465_v55  ;;  %689 = vst.msk [vmem:[#allocation2 + $0x121] sm:$0xff] %vm624_vm2, %v614_v58  ;;  %v615_v62 = vmax.f32 %v525_v50, %v583_v59  ;;  %v749_v1 = vld [vmem:[#allocation2 + $0xd8] sm:$0xff] }
 0x115   : > { %687 = vst.msk [vmem:[#allocation2 + $0x109] sm:$0xff] %vm624_vm2, %v612_v60  ;;  %v613_v63 = vmax.f32 %v517_v57, %v581_v61  ;;  %v4748_v0 = vpop.f32.mrb[24].mxu0  ;;  %v752_v2 = vld [vmem:[#allocation2 + $0xf8] sm:$0xff] }
 0x116   : > { %v1110_v3 = vld [vmem:[#allocation2 + $0xf9] sm:$0xff]  ;;  %690 = vst.msk [vmem:[#allocation2 + $0x129] sm:$0xff] %vm624_vm2, %v615_v62  ;;  %v538_v4 = vadd.f32 %v4748_v0, %v5349_v31  ;;  %v529_v5 = vpop.f32.mrb[25].mxu0  ;;  %v1108_v10 = vld [vmem:[#allocation2 + $0xe1] sm:$0xff]  ;;  %v1109_v21 = vld [vmem:[#allocation2 + $0xf1] sm:$0xff]  ;;  %v5487_v28 = vpack.c.bf16 %v752_v2, %v751_v20 }
 0x117   : > { %v750_v6 = vld [vmem:[#allocation2 + $0xe0] sm:$0xff]  ;;  %688 = vst.msk [vmem:[#allocation2 + $0x111] sm:$0xff] %vm624_vm2, %v613_v63  ;;  %v530_v13 = vadd.f32 %v5349_v31, %v529_v5  ;;  %v4749_v14 = vpop.f32.mrb[26].mxu0  ;;  %v5489_v29 = vpack.c.bf16 %v1110_v3, %v1109_v21 }
 0x118   : > { %v1107_v7 = vld [vmem:[#allocation2 + $0xd9] sm:$0xff]  ;;  %v5482_v15 = vpack.c.bf16 %v750_v6, %v749_v1  ;;  %v586_v22 = vmul.f32 0.1, %v538_v4  ;;  %v541_v26 = vadd.f32 %v4749_v14, %v5349_v31  ;;  %v532_v27 = vpop.f32.mrb[27].mxu0 }
 0x119   : > { %v5484_v16 = vpack.c.bf16 %v1108_v10, %v1107_v7  ;;  %v584_v30 = vmul.f32 0.1, %v530_v13  ;;  %v533_v32 = vadd.f32 %v5349_v31, %v532_v27 }
 0x11a   : > { %4773 = vmatmul.mubr.msk.bf16.gmra.mrb[16].mxu1 %vm624_vm2, %v5482_v15  ;;  %v618_v33 = vmax.f32 %v538_v4, %v586_v22  ;;  %v587_v34 = vmul.f32 0.1, %v541_v26 }
 0x11b   : > { %4807 = vmatmul.mubr.msk.bf16.gmra.mrb[48].mxu0 %vm624_vm2, %v5484_v16  ;;  %4776 = vmatprep.mubr.msk.bf16.mxu1 %vm624_vm2, %v5487_v28  ;;  %v616_v35 = vmax.f32 %v530_v13, %v584_v30  ;;  %v585_v36 = vmul.f32 0.1, %v533_v32  ;;  %v755_v60 = vld [vmem:[#allocation2 + $0x120] sm:$0xff] }
 0x11c   : > { %4810 = vmatprep.mubr.msk.bf16.mxu0 %vm624_vm2, %v5489_v29  ;;  %693 = vst.msk [vmem:[#allocation2 + $0x151] sm:$0xff] %vm624_vm2, %v618_v33  ;;  %v619_v37 = vmax.f32 %v541_v26, %v587_v34  ;;  %v753_v40 = vld [vmem:[#allocation2 + $0x108] sm:$0xff] }
 0x11d   : > { %691 = vst.msk [vmem:[#allocation2 + $0x139] sm:$0xff] %vm624_vm2, %v616_v35  ;;  %v617_v38 = vmax.f32 %v533_v32, %v585_v36  ;;  %v4752_v39 = vpop.f32.mrb[28].mxu0  ;;  %v756_v41 = vld [vmem:[#allocation2 + $0x128] sm:$0xff] }
 0x11e   : > { %v1114_v42 = vld [vmem:[#allocation2 + $0x129] sm:$0xff]  ;;  %694 = vst.msk [vmem:[#allocation2 + $0x159] sm:$0xff] %vm624_vm2, %v619_v37  ;;  %v554_v47 = vadd.f32 %v4752_v39, %v5349_v31  ;;  %v545_v48 = vpop.f32.mrb[29].mxu0  ;;  %v1112_v53 = vld [vmem:[#allocation2 + $0x111] sm:$0xff]  ;;  %v1113_v61 = vld [vmem:[#allocation2 + $0x121] sm:$0xff]  ;;  %v5511_v1 = vpack.c.bf16 %v756_v41, %v755_v60 }
 0x11f   : > { %v754_v49 = vld [vmem:[#allocation2 + $0x110] sm:$0xff]  ;;  %692 = vst.msk [vmem:[#allocation2 + $0x141] sm:$0xff] %vm624_vm2, %v617_v38  ;;  %v546_v56 = vadd.f32 %v5349_v31, %v545_v48  ;;  %v4753_v57 = vpop.f32.mrb[30].mxu0  ;;  %v5513_v2 = vpack.c.bf16 %v1114_v42, %v1113_v61  ;;  %v1447_v37 = vld [vmem:[#allocation2 + $0x2] sm:$0xff]  ;;  %v2294_v61 = vsel %vm860_vm5, %v5389_v24, 0 }
 0x120   : > { %v1111_v50 = vld [vmem:[#allocation2 + $0x109] sm:$0xff]  ;;  %v5506_v58 = vpack.c.bf16 %v754_v49, %v753_v40  ;;  %v590_v62 = vmul.f32 0.1, %v554_v47  ;;  %v557_v63 = vadd.f32 %v4753_v57, %v5349_v31  ;;  %v548_v0 = vpop.f32.mrb[31].mxu0  ;;  %v1452_v57 = vld [vmem:[#allocation2 + $0x3a] sm:$0xff] }
 0x121   : > { %v5508_v59 = vpack.c.bf16 %v1112_v53, %v1111_v50  ;;  %v588_v3 = vmul.f32 0.1, %v546_v56  ;;  %v549_v4 = vadd.f32 %v5349_v31, %v548_v0  ;;  %v1448_v38 = vld [vmem:[#allocation2 + $0xa] sm:$0xff]  ;;  %v1449_v50 = vld [vmem:[#allocation2 + $0x1a] sm:$0xff]  ;;  %v1450_v53 = vld [vmem:[#allocation2 + $0x22] sm:$0xff] }
 0x122   : > { %4777 = vmatmul.mubr.msk.bf16.gmra.mrb[20].mxu1 %vm624_vm2, %v5506_v58  ;;  %v622_v5 = vmax.f32 %v554_v47, %v590_v62  ;;  %v591_v6 = vmul.f32 0.1, %v557_v63  ;;  %v1511_v47 = vpack.c.bf16 %v1448_v38, %v1447_v37  ;;  %v5555_v60 = vpack.c.bf16 %v1450_v53, %v1449_v50  ;;  %v5575_v24 = vld [vmem:[%s6204_s3 + $0x7] sm:$0x1]  ;;  %v1454_v0 = vld [vmem:[#allocation2 + $0x52] sm:$0xff]  ;;  %v1465_v37 = vld [vmem:[#allocation2 + $0xda] sm:$0xff] }
 0x123   : > { %4811 = vmatmul.mubr.msk.bf16.gmra.mrb[52].mxu0 %vm624_vm2, %v5508_v59  ;;  %4780 = vmatprep.mubr.msk.bf16.mxu1 %vm624_vm2, %v5511_v1  ;;  %v620_v7 = vmax.f32 %v546_v56, %v588_v3  ;;  %v589_v10 = vmul.f32 0.1, %v549_v4  ;;  %v759_v33 = vld [vmem:[#allocation2 + $0x150] sm:$0xff]  ;;  %v1455_v3 = vld [vmem:[#allocation2 + $0x62] sm:$0xff] }
 0x124   : > { %4814 = vmatprep.mubr.msk.bf16.mxu0 %vm624_vm2, %v5513_v2  ;;  %697 = vst.msk [vmem:[#allocation2 + $0x181] sm:$0xff] %vm624_vm2, %v622_v5  ;;  %v623_v13 = vmax.f32 %v557_v63, %v591_v6  ;;  %v757_v14 = vld [vmem:[#allocation2 + $0x138] sm:$0xff]  ;;  %v2652_v63 = vsel %vm860_vm5, %v5394_v25, 0  ;;  %v1453_v25 = vld [vmem:[#allocation2 + $0x4a] sm:$0xff]  ;;  %v1466_v38 = vld [vmem:[#allocation2 + $0xe2] sm:$0xff] }
 0x125   : > { %695 = vst.msk [vmem:[#allocation2 + $0x169] sm:$0xff] %vm624_vm2, %v620_v7  ;;  %v621_v31 = vmax.f32 %v549_v4, %v589_v10  ;;  %v760_v20 = vld [vmem:[#allocation2 + $0x158] sm:$0xff]  ;;  %v1456_v4 = vld [vmem:[#allocation2 + $0x6a] sm:$0xff]  ;;  %v5585_v5 = vpack.c.bf16 %v1454_v0, %v1453_v25  ;;  %v1458_v10 = vld [vmem:[#allocation2 + $0x82] sm:$0xff] }
 0x126   : > { %v1118_v21 = vld [vmem:[#allocation2 + $0x159] sm:$0xff]  ;;  %698 = vst.msk [vmem:[#allocation2 + $0x189] sm:$0xff] %vm624_vm2, %v623_v13  ;;  %v1116_v27 = vld [vmem:[#allocation2 + $0x141] sm:$0xff]  ;;  %v1117_v34 = vld [vmem:[#allocation2 + $0x151] sm:$0xff]  ;;  %v5532_v35 = vpack.c.bf16 %v760_v20, %v759_v33  ;;  %v5587_v6 = vpack.c.bf16 %v1456_v4, %v1455_v3 }
 0x127   : > { %v758_v22 = vld [vmem:[#allocation2 + $0x140] sm:$0xff]  ;;  %696 = vst.msk [vmem:[#allocation2 + $0x171] sm:$0xff] %vm624_vm2, %v621_v31  ;;  %v5534_v36 = vpack.c.bf16 %v1118_v21, %v1117_v34  ;;  %v1451_v56 = vld [vmem:[#allocation2 + $0x32] sm:$0xff]  ;;  %v1461_v21 = vld [vmem:[#allocation2 + $0xaa] sm:$0xff] }
 0x128   : > { %v1115_v26 = vld [vmem:[#allocation2 + $0x139] sm:$0xff]  ;;  %v5528_v30 = vpack.c.bf16 %v758_v22, %v757_v14  ;;  %v5559_v62 = vpack.c.bf16 %v1452_v57, %v1451_v56  ;;  %v1471_v53 = vld [vmem:[#allocation2 + $0x122] sm:$0xff]  ;;  %v1472_v56 = vld [vmem:[#allocation2 + $0x12a] sm:$0xff] }
 0x129   : > { %v5530_v32 = vpack.c.bf16 %v1116_v27, %v1115_v26  ;;  %v1457_v7 = vld [vmem:[#allocation2 + $0x7a] sm:$0xff]  ;;  %v1459_v13 = vld [vmem:[#allocation2 + $0x92] sm:$0xff]  ;;  %v1463_v26 = vld [vmem:[#allocation2 + $0xc2] sm:$0xff] }
 0x12a   : > { %4781 = vmatmul.mubr.msk.bf16.gmra.mrb[24].mxu1 %vm624_vm2, %v5528_v30  ;;  %v1460_v31 = vld [vmem:[#allocation2 + $0x9a] sm:$0xff]  ;;  %v5597_v14 = vpack.c.bf16 %v1458_v10, %v1457_v7  ;;  %v1462_v22 = vld [vmem:[#allocation2 + $0xb2] sm:$0xff]  ;;  %v1464_v27 = vld [vmem:[#allocation2 + $0xca] sm:$0xff] }
 0x12b   : > { %4815 = vmatmul.mubr.msk.bf16.gmra.mrb[56].mxu0 %vm624_vm2, %v5530_v32  ;;  %4784 = vmatprep.mubr.msk.bf16.mxu1 %vm624_vm2, %v5532_v35  ;;  %v5599_v20 = vpack.c.bf16 %v1460_v31, %v1459_v13  ;;  %v5609_v33 = vpack.c.bf16 %v1462_v22, %v1461_v21  ;;  %v5611_v34 = vpack.c.bf16 %v1464_v27, %v1463_v26  ;;  %v1470_v50 = vld [vmem:[#allocation2 + $0x112] sm:$0xff]  ;;  %v1474_v25 = vld [vmem:[#allocation2 + $0x142] sm:$0xff]  ;;  %v1476_v3 = vld [vmem:[#allocation2 + $0x15a] sm:$0xff]  ;;  %v3369_v27 = vsel %vm860_vm5, %v5575_v24, 0 }
 0x12c   : > { %4818 = vmatprep.mubr.msk.bf16.mxu0 %vm624_vm2, %v5534_v36  ;;  %v761_v39 = vld [vmem:[#allocation2 + $0x168] sm:$0xff]  ;;  %v1475_v0 = vld [vmem:[#allocation2 + $0x152] sm:$0xff]  ;;  %v1835_v21 = vld [vmem:[#allocation2 + $0x180] sm:$0xff] }
 0x12d   : > { %v1119_v41 = vld [vmem:[#allocation2 + $0x169] sm:$0xff]  ;;  %v1525_v7 = vpack.c.bf16 %v1476_v3, %v1475_v0 }
 0x12e   : > { %v762_v40 = vld [vmem:[#allocation2 + $0x170] sm:$0xff]  ;;  %v1836_v31 = vld [vmem:[#allocation2 + $0x188] sm:$0xff] }
 0x12f   : > { %v1120_v42 = vld [vmem:[#allocation2 + $0x171] sm:$0xff]  ;;  %v5544_v48 = vpack.c.bf16 %v762_v40, %v761_v39  ;;  %v1468_v40 = vld [vmem:[#allocation2 + $0xfa] sm:$0xff]  ;;  %v5639_v26 = vpack.c.bf16 %v1836_v31, %v1835_v21 }
 0x130   : > { %v5546_v49 = vpack.c.bf16 %v1120_v42, %v1119_v41  ;;  %v1467_v39 = vld [vmem:[#allocation2 + $0xf2] sm:$0xff]  ;;  %v1520_v41 = vpack.c.bf16 %v1466_v38, %v1465_v37  ;;  %v1477_v10 = vld [vmem:[#allocation2 + $0x16a] sm:$0xff]  ;;  %v4449_v37 = vld [vmem:[%s6204_s3 + $0x8] sm:$0x1] }
 0x131   : > { %v1521_v42 = vpack.c.bf16 %v1468_v40, %v1467_v39  ;;  %v1478_v13 = vld [vmem:[#allocation2 + $0x172] sm:$0xff]  ;;  %v770_v39 = vld [vmem:[#allocation3 + $0x38] sm:$0xff] }
 0x132   : > { %4785 = vmatmul.mubr.msk.bf16.gmra.mrb[28].mxu1 %vm624_vm2, %v5544_v48  ;;  %v1526_v22 = vpack.c.bf16 %v1478_v13, %v1477_v10  ;;  %v773_v10 = vld [vmem:[#allocation3 + $0x50] sm:$0xff]  ;;  %v771_v13 = vld [vmem:[#allocation3 + $0x40] sm:$0xff] }
 0x133   : > { %4819 = vmatmul.mubr.msk.bf16.gmra.mrb[60].mxu0 %vm624_vm2, %v5546_v49  ;;  %4824 = vmatprep.mubr.msk.bf16.mxu1 %vm624_vm2, %v1511_v47  ;;  %v1469_v47 = vld [vmem:[#allocation2 + $0x10a] sm:$0xff] }
 0x134   : > { %4858 = vmatprep.mubr.msk.bf16.mxu0 %vm624_vm2, %v5369_v11  ;;  %v5570_v11 = vld [vmem:[%s6204_s3 + $0x6] sm:$0x1]  ;;  %v1522_v57 = vpack.c.bf16 %v1470_v50, %v1469_v47 }
 0x13a   : > { %4825 = vmatmul.mubr.msk.bf16.vlgmr.msra.gmra.mrb[32].mxu1 %vm624_vm2, %v5555_v60 }
 0x13b   : > { %4859 = vmatmul.mubr.msk.bf16.vlgmr.msra.gmra.mrb[64].mxu0 %vm624_vm2, %v5375_v18  ;;  %4891 = vmatpush3.bf16.msra.mxu1 %v2294_v61  ;;  %v1523_v61 = vpack.c.bf16 %v1472_v56, %v1471_v53 }
 0x13c   : > { %4828 = vmatprep.mubr.msk.bf16.mxu1 %vm624_vm2, %v5559_v62  ;;  %4862 = vmatprep.mubr.msk.bf16.mxu0 %vm624_vm2, %v5410_v44 }
 0x13d   : > { %4925 = vmatpush3.bf16.msra.mxu0 %v2652_v63  ;;  %5067 = vmatprep.subr.msk.bf16.mxu1 %vm860_vm5, %v5570_v11  ;;  %v1473_v63 = vld [vmem:[#allocation2 + $0x13a] sm:$0xff] }
 0x13e   : > { %5068 = vmatprep.subr.msk.bf16.mxu0 %vm860_vm5, %v5575_v24  ;;  %v1524_v4 = vpack.c.bf16 %v1474_v25, %v1473_v63 }
 0x142   : > { %4829 = vmatmul.mubr.msk.bf16.gmra.mrb[36].mxu1 %vm624_vm2, %v5585_v5 }
 0x143   : > { %4863 = vmatmul.mubr.msk.bf16.gmra.mrb[68].mxu0 %vm624_vm2, %v5415_v51  ;;  %4832 = vmatprep.mubr.msk.bf16.mxu1 %vm624_vm2, %v5587_v6 }
 0x144   : > { %4866 = vmatprep.mubr.msk.bf16.mxu0 %vm624_vm2, %v5434_v8 }
 0x14a   : > { %4833 = vmatmul.mubr.msk.bf16.gmra.mrb[40].mxu1 %vm624_vm2, %v5597_v14 }
 0x14b   : > { %4867 = vmatmul.mubr.msk.bf16.gmra.mrb[72].mxu0 %vm624_vm2, %v5439_v17  ;;  %4836 = vmatprep.mubr.msk.bf16.mxu1 %vm624_vm2, %v5599_v20 }
 0x14c   : > { %4870 = vmatprep.mubr.msk.bf16.mxu0 %vm624_vm2, %v5458_v43 }
 0x152   : > { %4837 = vmatmul.mubr.msk.bf16.gmra.mrb[44].mxu1 %vm624_vm2, %v5609_v33 }
 0x153   : > { %4871 = vmatmul.mubr.msk.bf16.gmra.mrb[76].mxu0 %vm624_vm2, %v5463_v54  ;;  %4840 = vmatprep.mubr.msk.bf16.mxu1 %vm624_vm2, %v5611_v34 }
 0x154   : > { %4874 = vmatprep.mubr.msk.bf16.mxu0 %vm624_vm2, %v5482_v15 }
 0x15a   : > { %4841 = vmatmul.mubr.msk.bf16.gmra.mrb[48].mxu1 %vm624_vm2, %v1520_v41 }
 0x15b   : > { %4875 = vmatmul.mubr.msk.bf16.gmra.mrb[80].mxu0 %vm624_vm2, %v5487_v28  ;;  %4844 = vmatprep.mubr.msk.bf16.mxu1 %vm624_vm2, %v1521_v42 }
 0x15c   : > { %4878 = vmatprep.mubr.msk.bf16.mxu0 %vm624_vm2, %v5506_v58 }
 0x162   : > { %4845 = vmatmul.mubr.msk.bf16.gmra.mrb[52].mxu1 %vm624_vm2, %v1522_v57 }
 0x163   : > { %4879 = vmatmul.mubr.msk.bf16.gmra.mrb[84].mxu0 %vm624_vm2, %v5511_v1  ;;  %4848 = vmatprep.mubr.msk.bf16.mxu1 %vm624_vm2, %v1523_v61 }
 0x164   : > { %4882 = vmatprep.mubr.msk.bf16.mxu0 %vm624_vm2, %v5528_v30 }
 0x16a   : > { %4849 = vmatmul.mubr.msk.bf16.gmra.mrb[56].mxu1 %vm624_vm2, %v1524_v4 }
 0x16b   : > { %4883 = vmatmul.mubr.msk.bf16.gmra.mrb[88].mxu0 %vm624_vm2, %v5532_v35  ;;  %4852 = vmatprep.mubr.msk.bf16.mxu1 %vm624_vm2, %v1525_v7 }
 0x16c   : > { %4886 = vmatprep.mubr.msk.bf16.mxu0 %vm624_vm2, %v5544_v48  ;;  %v3011_v48 = vsel %vm860_vm5, %v5570_v11, 0  ;;  %v2193_v11 = vld [vmem:[#allocation2 + $0x181] sm:$0xff] }
 0x172   : > { %4853 = vmatmul.mubr.msk.bf16.gmra.mrb[60].mxu1 %vm624_vm2, %v1526_v22 }
 0x173   : > { %4887 = vmatmul.mubr.msk.bf16.gmra.mrb[92].mxu0 %vm624_vm2, %v5639_v26  ;;  %4892 = vmatprep.mubr.msk.bf16.mxu1 %vm624_vm2, %v5371_v12  ;;  %v2194_v12 = vld [vmem:[#allocation2 + $0x189] sm:$0xff] }
 0x174   : > { %4926 = vmatprep.mubr.msk.bf16.mxu0 %vm624_vm2, %v5555_v60  ;;  %v2551_v60 = vld [vmem:[#allocation2 + $0x182] sm:$0xff]  ;;  %v5705_v24 = vpack.c.bf16 %v2194_v12, %v2193_v11 }
 0x17a   : > { %4893 = vmatmul.mubr.msk.bf16.vlgmr.msra.gmra.mrb[64].mxu1 %vm624_vm2, %v5384_v23 }
 0x17b   : > { %4927 = vmatmul.mubr.msk.bf16.vlgmr.msra.gmra.mrb[96].mxu0 %vm624_vm2, %v5559_v62  ;;  %4959 = vmatpush3.bf16.msra.mxu1 %v3011_v48  ;;  %v2552_v62 = vld [vmem:[#allocation2 + $0x18a] sm:$0xff] }
 0x17c   : > { %4896 = vmatprep.mubr.msk.bf16.mxu1 %vm624_vm2, %v5412_v45  ;;  %4930 = vmatprep.mubr.msk.bf16.mxu0 %vm624_vm2, %v5585_v5  ;;  %v2600_v5 = vpack.c.bf16 %v2552_v62, %v2551_v60 }
 0x17d   : > { %4993 = vmatpush3.bf16.msra.mxu0 %v3369_v27  ;;  %5069 = vmatprep.subr.msk.bf16.mxu1 %vm860_vm5, %v4449_v37  ;;  %v772_v27 = vld [vmem:[#allocation3 + $0x48] sm:$0xff] }
 0x182   : > { %4897 = vmatmul.mubr.msk.bf16.gmra.mrb[68].mxu1 %vm624_vm2, %v5417_v52 }
 0x183   : > { %4931 = vmatmul.mubr.msk.bf16.gmra.mrb[100].mxu0 %vm624_vm2, %v5587_v6  ;;  %4900 = vmatprep.mubr.msk.bf16.mxu1 %vm624_vm2, %v5436_v9 }
 0x184   : > { %4934 = vmatprep.mubr.msk.bf16.mxu0 %vm624_vm2, %v5597_v14 }
 0x18a   : > { %4901 = vmatmul.mubr.msk.bf16.gmra.mrb[72].mxu1 %vm624_vm2, %v5441_v19 }
 0x18b   : > { %4935 = vmatmul.mubr.msk.bf16.gmra.mrb[104].mxu0 %vm624_vm2, %v5599_v20  ;;  %4904 = vmatprep.mubr.msk.bf16.mxu1 %vm624_vm2, %v5460_v46  ;;  %v769_v20 = vld [vmem:[#allocation3 + $0x30] sm:$0xff] }
 0x18c   : > { %4938 = vmatprep.mubr.msk.bf16.mxu0 %vm624_vm2, %v5609_v33  ;;  %v767_v33 = vld [vmem:[#allocation3 + $0x20] sm:$0xff] }
 0x192   : > { %4905 = vmatmul.mubr.msk.bf16.gmra.mrb[76].mxu1 %vm624_vm2, %v5465_v55 }
 0x193   : > { %4939 = vmatmul.mubr.msk.bf16.gmra.mrb[108].mxu0 %vm624_vm2, %v5611_v34  ;;  %4908 = vmatprep.mubr.msk.bf16.mxu1 %vm624_vm2, %v5484_v16 }
 0x194   : > { %4942 = vmatprep.mubr.msk.bf16.mxu0 %vm624_vm2, %v1520_v41 }
 0x19a   : > { %4909 = vmatmul.mubr.msk.bf16.gmra.mrb[80].mxu1 %vm624_vm2, %v5489_v29 }
 0x19b   : > { %4943 = vmatmul.mubr.msk.bf16.gmra.mrb[112].mxu0 %vm624_vm2, %v1521_v42  ;;  %4912 = vmatprep.mubr.msk.bf16.mxu1 %vm624_vm2, %v5508_v59 }
 0x19c   : > { %4946 = vmatprep.mubr.msk.bf16.mxu0 %vm624_vm2, %v1522_v57 }
 0x1a2   : > { %4913 = vmatmul.mubr.msk.bf16.gmra.mrb[84].mxu1 %vm624_vm2, %v5513_v2 }
 0x1a3   : > { %4947 = vmatmul.mubr.msk.bf16.gmra.mrb[116].mxu0 %vm624_vm2, %v1523_v61  ;;  %4916 = vmatprep.mubr.msk.bf16.mxu1 %vm624_vm2, %v5530_v32 }
 0x1a4   : > { %4950 = vmatprep.mubr.msk.bf16.mxu0 %vm624_vm2, %v1524_v4 }
 0x1aa   : > { %4917 = vmatmul.mubr.msk.bf16.gmra.mrb[88].mxu1 %vm624_vm2, %v5534_v36 }
 0x1ab   : > { %4951 = vmatmul.mubr.msk.bf16.gmra.mrb[120].mxu0 %vm624_vm2, %v1525_v7  ;;  %4920 = vmatprep.mubr.msk.bf16.mxu1 %vm624_vm2, %v5546_v49  ;;  %v3727_v49 = vsel %vm860_vm5, %v4449_v37, 0 }
 0x1ac   : > { %4954 = vmatprep.mubr.msk.bf16.mxu0 %vm624_vm2, %v1526_v22 }
 0x1b2   : > { %4921 = vmatmul.mubr.msk.bf16.gmra.mrb[92].mxu1 %vm624_vm2, %v5705_v24 }
 0x1b3   : > { %4955 = vmatmul.mubr.msk.bf16.gmra.mrb[124].mxu0 %vm624_vm2, %v2600_v5  ;;  %4960 = vmatprep.mubr.msk.bf16.mxu1 %vm624_vm2, %v5375_v18  ;;  %v765_v18 = vld [vmem:[#allocation3 + $0x10] sm:$0xff] }
 0x1b4   : > { %4994 = vmatprep.mubr.msk.bf16.mxu0 %vm624_vm2, %v5384_v23  ;;  %v763_v23 = vld [vmem:[#allocation3] sm:$0xff] }
 0x1ba   : > { %4961 = vmatmul.mubr.msk.bf16.vlgmr.msra.gmra.mrb[96].mxu1 %vm624_vm2, %v5410_v44 }
 0x1bb   : > { %4995 = vmatmul.mubr.msk.bf16.vlgmr.msra.gmra.mrb[128].mxu0 %vm624_vm2, %v5412_v45  ;;  %5027 = vmatpush3.bf16.msra.mxu1 %v3727_v49 }
 0x1bc   : > { %4964 = vmatprep.mubr.msk.bf16.mxu1 %vm624_vm2, %v5415_v51  ;;  %4998 = vmatprep.mubr.msk.bf16.mxu0 %vm624_vm2, %v5417_v52  ;;  %v766_v51 = vld [vmem:[#allocation3 + $0x18] sm:$0xff] }
 0x1c2   : > { %4965 = vmatmul.mubr.msk.bf16.gmra.mrb[100].mxu1 %vm624_vm2, %v5434_v8 }
 0x1c3   : > { %4999 = vmatmul.mubr.msk.bf16.gmra.mrb[132].mxu0 %vm624_vm2, %v5436_v9  ;;  %4968 = vmatprep.mubr.msk.bf16.mxu1 %vm624_vm2, %v5439_v17  ;;  %v764_v17 = vld [vmem:[#allocation3 + $0x8] sm:$0xff] }
 0x1c4   : > { %5002 = vmatprep.mubr.msk.bf16.mxu0 %vm624_vm2, %v5441_v19 }
 0x1ca   : > { %4969 = vmatmul.mubr.msk.bf16.gmra.mrb[104].mxu1 %vm624_vm2, %v5458_v43 }
 0x1cb   : > { %5003 = vmatmul.mubr.msk.bf16.gmra.mrb[136].mxu0 %vm624_vm2, %v5460_v46  ;;  %4972 = vmatprep.mubr.msk.bf16.mxu1 %vm624_vm2, %v5463_v54 }
 0x1cc   : > { %5006 = vmatprep.mubr.msk.bf16.mxu0 %vm624_vm2, %v5465_v55  ;;  %v4758_v44 = vpop.f32.mrb[0].mxu1 }
 0x1cd   : > { %v4792_v45 = vpop.f32.mrb[32].mxu0  ;;  %v1027_v52 = vadd.f32 %v4758_v44, %v765_v18  ;;  %v898_v8 = vpop.f32.mrb[1].mxu1 }
 0x1ce   : > { %v1256_v9 = vpop.f32.mrb[33].mxu0  ;;  %v1025_v19 = vadd.f32 %v898_v8, %v763_v23  ;;  %v4759_v43 = vpop.f32.mrb[2].mxu1  ;;  %v777_v8 = vld [vmem:[#allocation3 + $0x70] sm:$0xff] }
 0x1cf   : > { %v4793_v6 = vpop.f32.mrb[34].mxu0  ;;  %1059 = vst.msk [vmem:[#allocation3 + $0x10] sm:$0xff] %vm346_vm1, %v1027_v52  ;;  %v1028_v46 = vadd.f32 %v4759_v43, %v766_v51  ;;  %v901_v14 = vpop.f32.mrb[3].mxu1  ;;  %v3265_v43 = vld [vmem:[#allocation2 + $0x171] sm:$0xff] }
 0x1d0   : > { %v1259_v54 = vpop.f32.mrb[35].mxu0  ;;  %1057 = vst.msk [vmem:[#allocation3] sm:$0xff] %vm346_vm1, %v1025_v19  ;;  %v1026_v55 = vadd.f32 %v901_v14, %v764_v17  ;;  %v2907_v19 = vld [vmem:[#allocation2 + $0x170] sm:$0xff] }
 0x1d1   : > { %1060 = vst.msk [vmem:[#allocation3 + $0x18] sm:$0xff] %vm346_vm1, %v1028_v46 }
 0x1d2   : > { %4973 = vmatmul.mubr.msk.bf16.gmra.mrb[108].mxu1 %vm624_vm2, %v5482_v15  ;;  %1058 = vst.msk [vmem:[#allocation3 + $0x8] sm:$0xff] %vm346_vm1, %v1026_v55  ;;  %v768_v15 = vld [vmem:[#allocation3 + $0x28] sm:$0xff] }
 0x1d3   : > { %5007 = vmatmul.mubr.msk.bf16.gmra.mrb[140].mxu0 %vm624_vm2, %v5484_v16  ;;  %4976 = vmatprep.mubr.msk.bf16.mxu1 %vm624_vm2, %v5487_v28 }
 0x1d4   : > { %5010 = vmatprep.mubr.msk.bf16.mxu0 %vm624_vm2, %v5489_v29 }
 0x1d5   : > { %v4762_v34 = vpop.f32.mrb[4].mxu1 }
 0x1d6   : > { %v4796_v38 = vpop.f32.mrb[36].mxu0  ;;  %v1031_v40 = vadd.f32 %v4762_v34, %v769_v20  ;;  %v914_v41 = vpop.f32.mrb[5].mxu1  ;;  %v1123_v47 = vld [vmem:[#allocation3 + $0x10] sm:$0xff]  ;;  %v3264_v34 = vld [vmem:[#allocation2 + $0x169] sm:$0xff] }
 0x1d7   : > { %v1272_v42 = vpop.f32.mrb[37].mxu0  ;;  %v1029_v50 = vadd.f32 %v914_v41, %v767_v33  ;;  %v4763_v16 = vpop.f32.mrb[6].mxu1  ;;  %v1385_v56 = vadd.f32 %v4792_v45, %v1123_v47  ;;  %v1121_v57 = vld [vmem:[#allocation3] sm:$0xff]  ;;  %v3315_v47 = vpack.c.bf16 %v3265_v43, %v3264_v34 }
 0x1d8   : > { %v4797_v53 = vpop.f32.mrb[38].mxu0  ;;  %1063 = vst.msk [vmem:[#allocation3 + $0x30] sm:$0xff] %vm346_vm1, %v1031_v40  ;;  %v1032_v28 = vadd.f32 %v4763_v16, %v770_v39  ;;  %v917_v61 = vpop.f32.mrb[7].mxu1  ;;  %v1383_v63 = vadd.f32 %v1256_v9, %v1121_v57  ;;  %v1124_v25 = vld [vmem:[#allocation3 + $0x18] sm:$0xff]  ;;  %v775_v9 = vld [vmem:[#allocation3 + $0x60] sm:$0xff] }
 0x1d9   : > { %v1275_v29 = vpop.f32.mrb[39].mxu0  ;;  %1061 = vst.msk [vmem:[#allocation3 + $0x20] sm:$0xff] %vm346_vm1, %v1029_v50  ;;  %v1030_v0 = vadd.f32 %v917_v61, %v768_v15  ;;  %1417 = vst.msk [vmem:[#allocation3 + $0x10] sm:$0xff] %vm346_vm1, %v1385_v56  ;;  %v1386_v3 = vadd.f32 %v4793_v6, %v1124_v25  ;;  %v1122_v4 = vld [vmem:[#allocation3 + $0x8] sm:$0xff] }
 0x1da   : > { %1064 = vst.msk [vmem:[#allocation3 + $0x38] sm:$0xff] %vm346_vm1, %v1032_v28  ;;  %4977 = vmatmul.mubr.msk.bf16.gmra.mrb[112].mxu1 %vm624_vm2, %v5506_v58  ;;  %1415 = vst.msk [vmem:[#allocation3] sm:$0xff] %vm346_vm1, %v1383_v63  ;;  %v1384_v7 = vadd.f32 %v1259_v54, %v1122_v4  ;;  %v776_v54 = vld [vmem:[#allocation3 + $0x68] sm:$0xff]  ;;  %v781_v28 = vld [vmem:[#allocation3 + $0x90] sm:$0xff] }
 0x1db   : > { %5011 = vmatmul.mubr.msk.bf16.gmra.mrb[144].mxu0 %vm624_vm2, %v5508_v59  ;;  %1062 = vst.msk [vmem:[#allocation3 + $0x28] sm:$0xff] %vm346_vm1, %v1030_v0  ;;  %4980 = vmatprep.mubr.msk.bf16.mxu1 %vm624_vm2, %v5511_v1  ;;  %1418 = vst.msk [vmem:[#allocation3 + $0x18] sm:$0xff] %vm346_vm1, %v1386_v3  ;;  %v774_v59 = vld [vmem:[#allocation3 + $0x58] sm:$0xff]  ;;  %v2910_v61 = vld [vmem:[#allocation2 + $0x198] sm:$0xff] }
 0x1dc   : > { %5014 = vmatprep.mubr.msk.bf16.mxu0 %vm624_vm2, %v5513_v2  ;;  %1416 = vst.msk [vmem:[#allocation3 + $0x8] sm:$0xff] %vm346_vm1, %v1384_v7  ;;  %v2911_v63 = vld [vmem:[#allocation2 + $0x1a0] sm:$0xff]  ;;  %v779_v3 = vld [vmem:[#allocation3 + $0x80] sm:$0xff] }
 0x1dd   : > { %v4766_v58 = vpop.f32.mrb[8].mxu1  ;;  %v3268_v25 = vld [vmem:[#allocation2 + $0x199] sm:$0xff]  ;;  %v3269_v0 = vld [vmem:[#allocation2 + $0x1a1] sm:$0xff] }
 0x1de   : > { %v4800_v31 = vpop.f32.mrb[40].mxu0  ;;  %v1035_v21 = vadd.f32 %v4766_v58, %v773_v10  ;;  %v930_v22 = vpop.f32.mrb[9].mxu1  ;;  %v782_v10 = vld [vmem:[#allocation3 + $0x98] sm:$0xff] }
 0x1df   : > { %v1288_v48 = vpop.f32.mrb[41].mxu0  ;;  %v1127_v37 = vld [vmem:[#allocation3 + $0x30] sm:$0xff]  ;;  %v1033_v12 = vadd.f32 %v930_v22, %v771_v13  ;;  %v4767_v60 = vpop.f32.mrb[10].mxu1 }
 0x1e0   : > { %v4801_v1 = vpop.f32.mrb[42].mxu0  ;;  %v1389_v62 = vadd.f32 %v4796_v38, %v1127_v37  ;;  %v1125_v11 = vld [vmem:[#allocation3 + $0x20] sm:$0xff]  ;;  %1067 = vst.msk [vmem:[#allocation3 + $0x50] sm:$0xff] %vm346_vm1, %v1035_v21  ;;  %v1036_v2 = vadd.f32 %v4767_v60, %v774_v59  ;;  %v933_v5 = vpop.f32.mrb[11].mxu1  ;;  %v780_v59 = vld [vmem:[#allocation3 + $0x88] sm:$0xff]  ;;  %v2959_v21 = vpack.c.bf16 %v2911_v63, %v2910_v61 }
 0x1e1   : > { %v1291_v49 = vpop.f32.mrb[43].mxu0  ;;  %v1387_v18 = vadd.f32 %v1272_v42, %v1125_v11  ;;  %v1128_v23 = vld [vmem:[#allocation3 + $0x38] sm:$0xff]  ;;  %1065 = vst.msk [vmem:[#allocation3 + $0x40] sm:$0xff] %vm346_vm1, %v1033_v12  ;;  %v1034_v44 = vadd.f32 %v933_v5, %v772_v27  ;;  %v3597_v22 = vld [vmem:[#allocation2 + $0x3a] sm:$0xff]  ;;  %v787_v61 = vld [vmem:[#allocation3 + $0xc0] sm:$0xff] }
 0x1e2   : > { %1421 = vst.msk [vmem:[#allocation3 + $0x30] sm:$0xff] %vm346_vm1, %v1389_v62  ;;  %v1390_v45 = vadd.f32 %v4797_v53, %v1128_v23  ;;  %v1126_v51 = vld [vmem:[#allocation3 + $0x28] sm:$0xff]  ;;  %1068 = vst.msk [vmem:[#allocation3 + $0x58] sm:$0xff] %vm346_vm1, %v1036_v2  ;;  %4981 = vmatmul.mubr.msk.bf16.gmra.mrb[116].mxu1 %vm624_vm2, %v5528_v30 }
 0x1e3   : > { %5015 = vmatmul.mubr.msk.bf16.gmra.mrb[148].mxu0 %vm624_vm2, %v5530_v32  ;;  %1419 = vst.msk [vmem:[#allocation3 + $0x20] sm:$0xff] %vm346_vm1, %v1387_v18  ;;  %v1388_v52 = vadd.f32 %v1275_v29, %v1126_v51  ;;  %1066 = vst.msk [vmem:[#allocation3 + $0x48] sm:$0xff] %vm346_vm1, %v1034_v44  ;;  %4984 = vmatprep.mubr.msk.bf16.mxu1 %vm624_vm2, %v5532_v35  ;;  %v778_v32 = vld [vmem:[#allocation3 + $0x78] sm:$0xff] }
 0x1e4   : > { %5018 = vmatprep.mubr.msk.bf16.mxu0 %vm624_vm2, %v5534_v36  ;;  %1422 = vst.msk [vmem:[#allocation3 + $0x38] sm:$0xff] %vm346_vm1, %v1390_v45  ;;  %v2906_v36 = vld [vmem:[#allocation2 + $0x168] sm:$0xff] }
 0x1e5   : > { %1420 = vst.msk [vmem:[#allocation3 + $0x28] sm:$0xff] %vm346_vm1, %v1388_v52  ;;  %v4770_v30 = vpop.f32.mrb[12].mxu1  ;;  %v2957_v15 = vpack.c.bf16 %v2907_v19, %v2906_v36  ;;  %v785_v52 = vld [vmem:[#allocation3 + $0xb0] sm:$0xff]  ;;  %v3599_v19 = vld [vmem:[#allocation2 + $0x52] sm:$0xff] }
 0x1e6   : > { %v4804_v17 = vpop.f32.mrb[44].mxu0  ;;  %v1039_v6 = vadd.f32 %v4770_v30, %v777_v8  ;;  %v946_v46 = vpop.f32.mrb[13].mxu1  ;;  %v783_v8 = vld [vmem:[#allocation3 + $0xa0] sm:$0xff] }
 0x1e7   : > { %v1304_v14 = vpop.f32.mrb[45].mxu0  ;;  %v1131_v55 = vld [vmem:[#allocation3 + $0x50] sm:$0xff]  ;;  %v1037_v35 = vadd.f32 %v946_v46, %v775_v9  ;;  %v4771_v20 = vpop.f32.mrb[14].mxu1 }
 0x1e8   : > { %v4805_v33 = vpop.f32.mrb[46].mxu0  ;;  %v1393_v38 = vadd.f32 %v4800_v31, %v1131_v55  ;;  %v1129_v39 = vld [vmem:[#allocation3 + $0x40] sm:$0xff]  ;;  %1071 = vst.msk [vmem:[#allocation3 + $0x70] sm:$0xff] %vm346_vm1, %v1039_v6  ;;  %v1040_v40 = vadd.f32 %v4771_v20, %v778_v32  ;;  %v949_v41 = vpop.f32.mrb[15].mxu1 }
 0x1e9   : > { %v1307_v42 = vpop.f32.mrb[47].mxu0  ;;  %v1391_v50 = vadd.f32 %v1288_v48, %v1129_v39  ;;  %v1132_v16 = vld [vmem:[#allocation3 + $0x58] sm:$0xff]  ;;  %1069 = vst.msk [vmem:[#allocation3 + $0x60] sm:$0xff] %vm346_vm1, %v1037_v35  ;;  %v1038_v53 = vadd.f32 %v949_v41, %v776_v54  ;;  %v3317_v48 = vpack.c.bf16 %v3269_v0, %v3268_v25  ;;  %v3602_v0 = vld [vmem:[#allocation2 + $0x7a] sm:$0xff] }
 0x1ea   : > { %1425 = vst.msk [vmem:[#allocation3 + $0x50] sm:$0xff] %vm346_vm1, %v1393_v38  ;;  %v1394_v56 = vadd.f32 %v4801_v1, %v1132_v16  ;;  %v1130_v57 = vld [vmem:[#allocation3 + $0x48] sm:$0xff]  ;;  %1072 = vst.msk [vmem:[#allocation3 + $0x78] sm:$0xff] %vm346_vm1, %v1040_v40  ;;  %4985 = vmatmul.mubr.msk.bf16.gmra.mrb[120].mxu1 %vm624_vm2, %v2957_v15  ;;  %v3598_v32 = vld [vmem:[#allocation2 + $0x4a] sm:$0xff] }
 0x1eb   : > { %5019 = vmatmul.mubr.msk.bf16.gmra.mrb[152].mxu0 %vm624_vm2, %v3315_v47  ;;  %1423 = vst.msk [vmem:[#allocation3 + $0x40] sm:$0xff] %vm346_vm1, %v1391_v50  ;;  %v1392_v29 = vadd.f32 %v1291_v49, %v1130_v57  ;;  %1070 = vst.msk [vmem:[#allocation3 + $0x68] sm:$0xff] %vm346_vm1, %v1038_v53  ;;  %4988 = vmatprep.mubr.msk.bf16.mxu1 %vm624_vm2, %v5639_v26  ;;  %v3596_v26 = vld [vmem:[#allocation2 + $0x32] sm:$0xff]  ;;  %v3600_v54 = vld [vmem:[#allocation2 + $0x62] sm:$0xff] }
 0x1ec   : > { %5022 = vmatprep.mubr.msk.bf16.mxu0 %vm624_vm2, %v5705_v24  ;;  %1426 = vst.msk [vmem:[#allocation3 + $0x58] sm:$0xff] %vm346_vm1, %v1394_v56  ;;  %v3660_v23 = vpack.c.bf16 %v3597_v22, %v3596_v26  ;;  %v3601_v55 = vld [vmem:[#allocation2 + $0x6a] sm:$0xff] }
 0x1ed   : > { %1424 = vst.msk [vmem:[#allocation3 + $0x48] sm:$0xff] %vm346_vm1, %v1392_v29  ;;  %v4774_v4 = vpop.f32.mrb[16].mxu1  ;;  %v3662_v16 = vpack.c.bf16 %v3601_v55, %v3600_v54  ;;  %v790_v25 = vld [vmem:[#allocation3 + $0xd8] sm:$0xff] }
 0x1ee   : > { %v4808_v7 = vpop.f32.mrb[48].mxu0  ;;  %v1043_v13 = vadd.f32 %v4774_v4, %v781_v28  ;;  %v962_v58 = vpop.f32.mrb[17].mxu1  ;;  %v789_v28 = vld [vmem:[#allocation3 + $0xd0] sm:$0xff] }
 0x1ef   : > { %v1320_v31 = vpop.f32.mrb[49].mxu0  ;;  %v1135_v24 = vld [vmem:[#allocation3 + $0x70] sm:$0xff]  ;;  %v1041_v27 = vadd.f32 %v962_v58, %v779_v3  ;;  %v4775_v37 = vpop.f32.mrb[18].mxu1  ;;  %v3604_v58 = vld [vmem:[#allocation2 + $0x92] sm:$0xff] }
 0x1f0   : > { %v4809_v12 = vpop.f32.mrb[50].mxu0  ;;  %v1397_v60 = vadd.f32 %v4804_v17, %v1135_v24  ;;  %v1133_v1 = vld [vmem:[#allocation3 + $0x60] sm:$0xff]  ;;  %1075 = vst.msk [vmem:[#allocation3 + $0x90] sm:$0xff] %vm346_vm1, %v1043_v13  ;;  %v1044_v62 = vadd.f32 %v4775_v37, %v782_v10  ;;  %v965_v11 = vpop.f32.mrb[19].mxu1  ;;  %v786_v17 = vld [vmem:[#allocation3 + $0xb8] sm:$0xff]  ;;  %v788_v13 = vld [vmem:[#allocation3 + $0xc8] sm:$0xff] }
 0x1f1   : > { %v1323_v2 = vpop.f32.mrb[51].mxu0  ;;  %v1395_v5 = vadd.f32 %v1304_v14, %v1133_v1  ;;  %v1136_v49 = vld [vmem:[#allocation3 + $0x78] sm:$0xff]  ;;  %1073 = vst.msk [vmem:[#allocation3 + $0x80] sm:$0xff] %vm346_vm1, %v1041_v27  ;;  %v1042_v18 = vadd.f32 %v965_v11, %v780_v59  ;;  %v784_v14 = vld [vmem:[#allocation3 + $0xa8] sm:$0xff] }
 0x1f2   : > { %1429 = vst.msk [vmem:[#allocation3 + $0x70] sm:$0xff] %vm346_vm1, %v1397_v60  ;;  %v1398_v44 = vadd.f32 %v4805_v33, %v1136_v49  ;;  %v1134_v45 = vld [vmem:[#allocation3 + $0x68] sm:$0xff]  ;;  %1076 = vst.msk [vmem:[#allocation3 + $0x98] sm:$0xff] %vm346_vm1, %v1044_v62  ;;  %4989 = vmatmul.mubr.msk.bf16.gmra.mrb[124].mxu1 %vm624_vm2, %v2959_v21  ;;  %v3603_v3 = vld [vmem:[#allocation2 + $0x82] sm:$0xff] }
 0x1f3   : > { %5023 = vmatmul.mubr.msk.bf16.gmra.mrb[156].mxu0 %vm624_vm2, %v3317_v48  ;;  %1427 = vst.msk [vmem:[#allocation3 + $0x60] sm:$0xff] %vm346_vm1, %v1395_v5  ;;  %v1396_v51 = vadd.f32 %v1307_v42, %v1134_v45  ;;  %1074 = vst.msk [vmem:[#allocation3 + $0x88] sm:$0xff] %vm346_vm1, %v1042_v18  ;;  %5028 = vmatprep.mubr.msk.bf16.mxu1 %vm624_vm2, %v3660_v23  ;;  %v3661_v42 = vpack.c.bf16 %v3599_v19, %v3598_v32  ;;  %v793_v23 = vld [vmem:[#allocation3 + $0xf0] sm:$0xff]  ;;  %v792_v19 = vld [vmem:[#allocation3 + $0xe8] sm:$0xff] }
 0x1f4   : > { %1430 = vst.msk [vmem:[#allocation3 + $0x78] sm:$0xff] %vm346_vm1, %v1398_v44  ;;  %v3663_v60 = vpack.c.bf16 %v3603_v3, %v3602_v0  ;;  %v791_v44 = vld [vmem:[#allocation3 + $0xe0] sm:$0xff]  ;;  %v3613_v3 = vld [vmem:[#allocation2 + $0xfa] sm:$0xff] }
 0x1f5   : > { %1428 = vst.msk [vmem:[#allocation3 + $0x68] sm:$0xff] %vm346_vm1, %v1396_v51  ;;  %v4778_v9 = vpop.f32.mrb[20].mxu1  ;;  %v3612_v0 = vld [vmem:[#allocation2 + $0xf2] sm:$0xff] }
 0x1f6   : > { %v4812_v30 = vpop.f32.mrb[52].mxu0  ;;  %v1047_v43 = vadd.f32 %v4778_v9, %v785_v52  ;;  %v978_v6 = vpop.f32.mrb[21].mxu1  ;;  %v794_v52 = vld [vmem:[#allocation3 + $0xf8] sm:$0xff]  ;;  %v3607_v9 = vld [vmem:[#allocation2 + $0xb2] sm:$0xff] }
 0x1f7   : > { %v1336_v46 = vpop.f32.mrb[53].mxu0  ;;  %v1139_v35 = vld [vmem:[#allocation3 + $0x90] sm:$0xff]  ;;  %v1045_v20 = vadd.f32 %v978_v6, %v783_v8  ;;  %v4779_v33 = vpop.f32.mrb[22].mxu1  ;;  %v3606_v8 = vld [vmem:[#allocation2 + $0xaa] sm:$0xff] }
 0x1f8   : > { %v4813_v36 = vpop.f32.mrb[54].mxu0  ;;  %v1401_v34 = vadd.f32 %v4808_v7, %v1139_v35  ;;  %v1137_v38 = vld [vmem:[#allocation3 + $0x80] sm:$0xff]  ;;  %1079 = vst.msk [vmem:[#allocation3 + $0xb0] sm:$0xff] %vm346_vm1, %v1047_v43  ;;  %v1048_v39 = vadd.f32 %v4779_v33, %v786_v17  ;;  %v981_v40 = vpop.f32.mrb[23].mxu1  ;;  %v3608_v43 = vld [vmem:[#allocation2 + $0xc2] sm:$0xff] }
 0x1f9   : > { %v1339_v41 = vpop.f32.mrb[55].mxu0  ;;  %v1399_v15 = vadd.f32 %v1320_v31, %v1137_v38  ;;  %v1140_v47 = vld [vmem:[#allocation3 + $0x98] sm:$0xff]  ;;  %1077 = vst.msk [vmem:[#allocation3 + $0xa0] sm:$0xff] %vm346_vm1, %v1045_v20  ;;  %v1046_v50 = vadd.f32 %v981_v40, %v784_v14  ;;  %v3605_v31 = vld [vmem:[#allocation2 + $0x9a] sm:$0xff]  ;;  %v3665_v38 = vpack.c.bf16 %v3607_v9, %v3606_v8 }
 0x1fa   : > { %1433 = vst.msk [vmem:[#allocation3 + $0x90] sm:$0xff] %vm346_vm1, %v1401_v34  ;;  %v1402_v53 = vadd.f32 %v4809_v12, %v1140_v47  ;;  %v1138_v56 = vld [vmem:[#allocation3 + $0x88] sm:$0xff]  ;;  %1080 = vst.msk [vmem:[#allocation3 + $0xb8] sm:$0xff] %vm346_vm1, %v1048_v39  ;;  %5029 = vmatmul.mubr.msk.bf16.vlgmr.msra.gmra.mrb[128].mxu1 %vm624_vm2, %v3661_v42  ;;  %v3609_v6 = vld [vmem:[#allocation2 + $0xca] sm:$0xff] }
 0x1fb   : > { %1431 = vst.msk [vmem:[#allocation3 + $0x80] sm:$0xff] %vm346_vm1, %v1399_v15  ;;  %v1400_v57 = vadd.f32 %v1323_v2, %v1138_v56  ;;  %1078 = vst.msk [vmem:[#allocation3 + $0xa8] sm:$0xff] %vm346_vm1, %v1046_v50  ;;  %5032 = vmatprep.mubr.msk.bf16.mxu1 %vm624_vm2, %v3662_v16  ;;  %v3664_v2 = vpack.c.bf16 %v3605_v31, %v3604_v58  ;;  %v3666_v42 = vpack.c.bf16 %v3609_v6, %v3608_v43  ;;  %v1481_v16 = vld [vmem:[#allocation3 + $0x10] sm:$0xff]  ;;  %v3617_v9 = vld [vmem:[#allocation2 + $0x12a] sm:$0xff] }
 0x1fc   : > { %1434 = vst.msk [vmem:[#allocation3 + $0x98] sm:$0xff] %vm346_vm1, %v1402_v53  ;;  %v3616_v8 = vld [vmem:[#allocation2 + $0x122] sm:$0xff] }
 0x1fd   : > { %1432 = vst.msk [vmem:[#allocation3 + $0x88] sm:$0xff] %vm346_vm1, %v1400_v57  ;;  %v4782_v29 = vpop.f32.mrb[24].mxu1  ;;  %v3610_v57 = vld [vmem:[#allocation2 + $0xda] sm:$0xff] }
 0x1fe   : > { %v4816_v63 = vpop.f32.mrb[56].mxu0  ;;  %v1051_v4 = vadd.f32 %v4782_v29, %v789_v28  ;;  %v994_v7 = vpop.f32.mrb[25].mxu1  ;;  %v3611_v28 = vld [vmem:[#allocation2 + $0xe2] sm:$0xff]  ;;  %v1479_v29 = vld [vmem:[#allocation3] sm:$0xff] }
 0x1ff   : > { %v1352_v10 = vpop.f32.mrb[57].mxu0  ;;  %v1143_v59 = vld [vmem:[#allocation3 + $0xb0] sm:$0xff]  ;;  %v1049_v21 = vadd.f32 %v994_v7, %v787_v61  ;;  %v4783_v26 = vpop.f32.mrb[26].mxu1 }
 0x200   : > { %v4817_v22 = vpop.f32.mrb[58].mxu0  ;;  %v1405_v48 = vadd.f32 %v4812_v30, %v1143_v59  ;;  %v1141_v24 = vld [vmem:[#allocation3 + $0xa0] sm:$0xff]  ;;  %1083 = vst.msk [vmem:[#allocation3 + $0xd0] sm:$0xff] %vm346_vm1, %v1051_v4  ;;  %v1052_v27 = vadd.f32 %v4783_v26, %v790_v25  ;;  %v997_v37 = vpop.f32.mrb[27].mxu1  ;;  %v1480_v26 = vld [vmem:[#allocation3 + $0x8] sm:$0xff] }
 0x201   : > { %v1355_v12 = vpop.f32.mrb[59].mxu0  ;;  %v1403_v1 = vadd.f32 %v1336_v46, %v1141_v24  ;;  %v1144_v62 = vld [vmem:[#allocation3 + $0xb8] sm:$0xff]  ;;  %1081 = vst.msk [vmem:[#allocation3 + $0xc0] sm:$0xff] %vm346_vm1, %v1049_v21  ;;  %v1050_v11 = vadd.f32 %v997_v37, %v788_v13  ;;  %v3667_v24 = vpack.c.bf16 %v3611_v28, %v3610_v57 }
 0x202   : > { %1437 = vst.msk [vmem:[#allocation3 + $0xb0] sm:$0xff] %vm346_vm1, %v1405_v48  ;;  %v1406_v5 = vadd.f32 %v4813_v36, %v1144_v62  ;;  %v1142_v49 = vld [vmem:[#allocation3 + $0xa8] sm:$0xff]  ;;  %1084 = vst.msk [vmem:[#allocation3 + $0xd8] sm:$0xff] %vm346_vm1, %v1052_v27  ;;  %5033 = vmatmul.mubr.msk.bf16.gmra.mrb[132].mxu1 %vm624_vm2, %v3663_v60  ;;  %v3668_v60 = vpack.c.bf16 %v3613_v3, %v3612_v0  ;;  %v1490_v0 = vld [vmem:[#allocation3 + $0x58] sm:$0xff] }
 0x203   : > { %1435 = vst.msk [vmem:[#allocation3 + $0xa0] sm:$0xff] %vm346_vm1, %v1403_v1  ;;  %v1404_v18 = vadd.f32 %v1339_v41, %v1142_v49  ;;  %1082 = vst.msk [vmem:[#allocation3 + $0xc8] sm:$0xff] %vm346_vm1, %v1050_v11  ;;  %5036 = vmatprep.mubr.msk.bf16.mxu1 %vm624_vm2, %v3664_v2  ;;  %v1485_v2 = vld [vmem:[#allocation3 + $0x30] sm:$0xff] }
 0x204   : > { %1438 = vst.msk [vmem:[#allocation3 + $0xb8] sm:$0xff] %vm346_vm1, %v1406_v5 }
 0x205   : > { %1436 = vst.msk [vmem:[#allocation3 + $0xa8] sm:$0xff] %vm346_vm1, %v1404_v18  ;;  %v4786_v45 = vpop.f32.mrb[28].mxu1  ;;  %v3614_v18 = vld [vmem:[#allocation2 + $0x10a] sm:$0xff] }
 0x206   : > { %v4820_v51 = vpop.f32.mrb[60].mxu0  ;;  %v1055_v30 = vadd.f32 %v4786_v45, %v793_v23  ;;  %v1010_v17 = vpop.f32.mrb[29].mxu1  ;;  %v3615_v23 = vld [vmem:[#allocation2 + $0x112] sm:$0xff] }
 0x207   : > { %v1368_v32 = vpop.f32.mrb[61].mxu0  ;;  %v1147_v46 = vld [vmem:[#allocation3 + $0xd0] sm:$0xff]  ;;  %v1053_v14 = vadd.f32 %v1010_v17, %v791_v44  ;;  %v4787_v54 = vpop.f32.mrb[30].mxu1  ;;  %v1483_v45 = vld [vmem:[#allocation3 + $0x20] sm:$0xff] }
 0x208   : > { %v4821_v55 = vpop.f32.mrb[62].mxu0  ;;  %v1409_v35 = vadd.f32 %v4816_v63, %v1147_v46  ;;  %v1145_v20 = vld [vmem:[#allocation3 + $0xc0] sm:$0xff]  ;;  %1087 = vst.msk [vmem:[#allocation3 + $0xf0] sm:$0xff] %vm346_vm1, %v1055_v30  ;;  %v1056_v33 = vadd.f32 %v4787_v54, %v794_v52  ;;  %v1013_v36 = vpop.f32.mrb[31].mxu1  ;;  %v1484_v54 = vld [vmem:[#allocation3 + $0x28] sm:$0xff] }
 0x209   : > { %v1371_v34 = vpop.f32.mrb[63].mxu0  ;;  %v1407_v39 = vadd.f32 %v1352_v10, %v1145_v20  ;;  %v1148_v40 = vld [vmem:[#allocation3 + $0xd8] sm:$0xff]  ;;  %1085 = vst.msk [vmem:[#allocation3 + $0xe0] sm:$0xff] %vm346_vm1, %v1053_v14  ;;  %v1054_v41 = vadd.f32 %v1013_v36, %v792_v19  ;;  %v3669_v20 = vpack.c.bf16 %v3615_v23, %v3614_v18 }
 0x20a   : > { %1441 = vst.msk [vmem:[#allocation3 + $0xd0] sm:$0xff] %vm346_vm1, %v1409_v35  ;;  %v1410_v15 = vadd.f32 %v4817_v22, %v1148_v40  ;;  %v1146_v47 = vld [vmem:[#allocation3 + $0xc8] sm:$0xff]  ;;  %1088 = vst.msk [vmem:[#allocation3 + $0xf8] sm:$0xff] %vm346_vm1, %v1056_v33  ;;  %5037 = vmatmul.mubr.msk.bf16.gmra.mrb[136].mxu1 %vm624_vm2, %v3665_v38  ;;  %v1482_v10 = vld [vmem:[#allocation3 + $0x18] sm:$0xff]  ;;  %v3670_v38 = vpack.c.bf16 %v3617_v9, %v3616_v8 }
 0x20b   : > { %1439 = vst.msk [vmem:[#allocation3 + $0xc0] sm:$0xff] %vm346_vm1, %v1407_v39  ;;  %v1408_v50 = vadd.f32 %v1355_v12, %v1146_v47  ;;  %1086 = vst.msk [vmem:[#allocation3 + $0xe8] sm:$0xff] %vm346_vm1, %v1054_v41  ;;  %5040 = vmatprep.mubr.msk.bf16.mxu1 %vm624_vm2, %v3666_v42  ;;  %v1489_v42 = vld [vmem:[#allocation3 + $0x50] sm:$0xff]  ;;  %v1494_v8 = vld [vmem:[#allocation3 + $0x78] sm:$0xff] }
 0x20c   : > { %1442 = vst.msk [vmem:[#allocation3 + $0xd8] sm:$0xff] %vm346_vm1, %v1410_v15 }
 0x20d   : > { %1440 = vst.msk [vmem:[#allocation3 + $0xc8] sm:$0xff] %vm346_vm1, %v1408_v50  ;;  %v4826_v53 = vpop.f32.mrb[32].mxu1  ;;  %v3618_v50 = vld [vmem:[#allocation2 + $0x13a] sm:$0xff] }
 0x20e   : > { %v4860_v56 = vpop.f32.mrb[64].mxu0  ;;  %v1743_v61 = vadd.f32 %v4826_v53, %v1481_v16  ;;  %v1614_v63 = vpop.f32.mrb[33].mxu1  ;;  %v3619_v16 = vld [vmem:[#allocation2 + $0x142] sm:$0xff] }
 0x20f   : > { %v1972_v25 = vpop.f32.mrb[65].mxu0  ;;  %v1151_v4 = vld [vmem:[#allocation3 + $0xf0] sm:$0xff]  ;;  %v1741_v7 = vadd.f32 %v1614_v63, %v1479_v29  ;;  %v4827_v13 = vpop.f32.mrb[34].mxu1 }
 0x210   : > { %v4861_v58 = vpop.f32.mrb[66].mxu0  ;;  %v1413_v31 = vadd.f32 %v4820_v51, %v1151_v4  ;;  %v1149_v59 = vld [vmem:[#allocation3 + $0xe0] sm:$0xff]  ;;  %1775 = vst.msk [vmem:[#allocation3 + $0x10] sm:$0xff] %vm346_vm1, %v1743_v61  ;;  %v1744_v21 = vadd.f32 %v4827_v13, %v1482_v10  ;;  %v1617_v22 = vpop.f32.mrb[35].mxu1  ;;  %v3621_v29 = vld [vmem:[#allocation2 + $0x15a] sm:$0xff] }
 0x211   : > { %v1975_v48 = vpop.f32.mrb[67].mxu0  ;;  %v1411_v27 = vadd.f32 %v1368_v32, %v1149_v59  ;;  %v1152_v37 = vld [vmem:[#allocation3 + $0xf8] sm:$0xff]  ;;  %1773 = vst.msk [vmem:[#allocation3] sm:$0xff] %vm346_vm1, %v1741_v7  ;;  %v1742_v12 = vadd.f32 %v1617_v22, %v1480_v26  ;;  %v3620_v61 = vld [vmem:[#allocation2 + $0x152] sm:$0xff] }
 0x212   : > { %1445 = vst.msk [vmem:[#allocation3 + $0xf0] sm:$0xff] %vm346_vm1, %v1413_v31  ;;  %v1414_v1 = vadd.f32 %v4821_v55, %v1152_v37  ;;  %v1150_v62 = vld [vmem:[#allocation3 + $0xe8] sm:$0xff]  ;;  %1776 = vst.msk [vmem:[#allocation3 + $0x18] sm:$0xff] %vm346_vm1, %v1744_v21  ;;  %5041 = vmatmul.mubr.msk.bf16.gmra.mrb[140].mxu1 %vm624_vm2, %v3667_v24  ;;  %v1486_v32 = vld [vmem:[#allocation3 + $0x38] sm:$0xff]  ;;  %v3671_v21 = vpack.c.bf16 %v3619_v16, %v3618_v50  ;;  %v3672_v24 = vpack.c.bf16 %v3621_v29, %v3620_v61 }
 0x213   : > { %1443 = vst.msk [vmem:[#allocation3 + $0xe0] sm:$0xff] %vm346_vm1, %v1411_v27  ;;  %v1412_v11 = vadd.f32 %v1371_v34, %v1150_v62  ;;  %1774 = vst.msk [vmem:[#allocation3 + $0x8] sm:$0xff] %vm346_vm1, %v1742_v12  ;;  %5044 = vmatprep.mubr.msk.bf16.mxu1 %vm624_vm2, %v3668_v60  ;;  %v1493_v60 = vld [vmem:[#allocation3 + $0x70] sm:$0xff] }
 0x214   : > { %1446 = vst.msk [vmem:[#allocation3 + $0xf8] sm:$0xff] %vm346_vm1, %v1414_v1 }
 0x215   : > { %1444 = vst.msk [vmem:[#allocation3 + $0xe8] sm:$0xff] %vm346_vm1, %v1412_v11  ;;  %v4830_v5 = vpop.f32.mrb[36].mxu1  ;;  %v3622_v11 = vld [vmem:[#allocation2 + $0x16a] sm:$0xff] }
 0x216   : > { %v4864_v49 = vpop.f32.mrb[68].mxu0  ;;  %v1747_v44 = vadd.f32 %v4830_v5, %v1485_v2  ;;  %v1630_v51 = vpop.f32.mrb[37].mxu1  ;;  %v3623_v2 = vld [vmem:[#allocation2 + $0x172] sm:$0xff] }
 0x217   : > { %v1988_v52 = vpop.f32.mrb[69].mxu0  ;;  %v1839_v30 = vld [vmem:[#allocation3 + $0x10] sm:$0xff]  ;;  %v1745_v17 = vadd.f32 %v1630_v51, %v1483_v45  ;;  %v4831_v19 = vpop.f32.mrb[38].mxu1  ;;  %v3625_v45 = vld [vmem:[#allocation2 + $0x18a] sm:$0xff] }
 0x218   : > { %v4865_v43 = vpop.f32.mrb[70].mxu0  ;;  %v2101_v6 = vadd.f32 %v4860_v56, %v1839_v30  ;;  %v1837_v46 = vld [vmem:[#allocation3] sm:$0xff]  ;;  %1779 = vst.msk [vmem:[#allocation3 + $0x30] sm:$0xff] %vm346_vm1, %v1747_v44  ;;  %v1748_v14 = vadd.f32 %v4831_v19, %v1486_v32  ;;  %v1633_v55 = vpop.f32.mrb[39].mxu1  ;;  %v3624_v44 = vld [vmem:[#allocation2 + $0x182] sm:$0xff] }
 0x219   : > { %v1991_v35 = vpop.f32.mrb[71].mxu0  ;;  %v2099_v33 = vadd.f32 %v1972_v25, %v1837_v46  ;;  %v1840_v36 = vld [vmem:[#allocation3 + $0x18] sm:$0xff]  ;;  %1777 = vst.msk [vmem:[#allocation3 + $0x20] sm:$0xff] %vm346_vm1, %v1745_v17  ;;  %v1746_v34 = vadd.f32 %v1633_v55, %v1484_v54  ;;  %v1487_v56 = vld [vmem:[#allocation3 + $0x40] sm:$0xff] }
 0x21a   : > { %2133 = vst.msk [vmem:[#allocation3 + $0x10] sm:$0xff] %vm346_vm1, %v2101_v6  ;;  %v2102_v39 = vadd.f32 %v4861_v58, %v1840_v36  ;;  %v1838_v40 = vld [vmem:[#allocation3 + $0x8] sm:$0xff]  ;;  %1780 = vst.msk [vmem:[#allocation3 + $0x38] sm:$0xff] %vm346_vm1, %v1748_v14  ;;  %5045 = vmatmul.mubr.msk.bf16.gmra.mrb[144].mxu1 %vm624_vm2, %v3669_v20  ;;  %v3673_v14 = vpack.c.bf16 %v3623_v2, %v3622_v11  ;;  %v3674_v20 = vpack.c.bf16 %v3625_v45, %v3624_v44 }
 0x21b   : > { %2131 = vst.msk [vmem:[#allocation3] sm:$0xff] %vm346_vm1, %v2099_v33  ;;  %v2100_v41 = vadd.f32 %v1975_v48, %v1838_v40  ;;  %1778 = vst.msk [vmem:[#allocation3 + $0x28] sm:$0xff] %vm346_vm1, %v1746_v34  ;;  %5048 = vmatprep.mubr.msk.bf16.mxu1 %vm624_vm2, %v3670_v38  ;;  %v1488_v58 = vld [vmem:[#allocation3 + $0x48] sm:$0xff]  ;;  %v1497_v40 = vld [vmem:[#allocation3 + $0x90] sm:$0xff] }
 0x21c   : > { %2134 = vst.msk [vmem:[#allocation3 + $0x18] sm:$0xff] %vm346_vm1, %v2102_v39  ;;  %v3626_v38 = vld [vmem:[#allocation2 + $0x19a] sm:$0xff]  ;;  %v3627_v39 = vld [vmem:[#allocation2 + $0x1a2] sm:$0xff] }
 0x21d   : > { %2132 = vst.msk [vmem:[#allocation3 + $0x8] sm:$0xff] %vm346_vm1, %v2100_v41  ;;  %v4834_v15 = vpop.f32.mrb[40].mxu1 }
 0x21e   : > { %v4868_v47 = vpop.f32.mrb[72].mxu0  ;;  %v1751_v53 = vadd.f32 %v4834_v15, %v1489_v42  ;;  %v1646_v57 = vpop.f32.mrb[41].mxu1 }
 0x21f   : > { %v2004_v28 = vpop.f32.mrb[73].mxu0  ;;  %v1843_v63 = vld [vmem:[#allocation3 + $0x30] sm:$0xff]  ;;  %v1749_v25 = vadd.f32 %v1646_v57, %v1487_v56  ;;  %v4835_v3 = vpop.f32.mrb[42].mxu1 }
 0x220   : > { %v4869_v4 = vpop.f32.mrb[74].mxu0  ;;  %v2105_v7 = vadd.f32 %v4864_v49, %v1843_v63  ;;  %v1841_v10 = vld [vmem:[#allocation3 + $0x20] sm:$0xff]  ;;  %1783 = vst.msk [vmem:[#allocation3 + $0x50] sm:$0xff] %vm346_vm1, %v1751_v53  ;;  %v1752_v13 = vadd.f32 %v4835_v3, %v1490_v0  ;;  %v1649_v31 = vpop.f32.mrb[43].mxu1  ;;  %v3675_v53 = vpack.c.bf16 %v3627_v39, %v3626_v38  ;;  %v1496_v3 = vld [vmem:[#allocation3 + $0x88] sm:$0xff] }
 0x221   : > { %v2007_v59 = vpop.f32.mrb[75].mxu0  ;;  %v2103_v26 = vadd.f32 %v1988_v52, %v1841_v10  ;;  %v1844_v22 = vld [vmem:[#allocation3 + $0x38] sm:$0xff]  ;;  %1781 = vst.msk [vmem:[#allocation3 + $0x40] sm:$0xff] %vm346_vm1, %v1749_v25  ;;  %v1750_v48 = vadd.f32 %v1649_v31, %v1488_v58  ;;  %v1491_v49 = vld [vmem:[#allocation3 + $0x60] sm:$0xff] }
 0x222   : > { %2137 = vst.msk [vmem:[#allocation3 + $0x30] sm:$0xff] %vm346_vm1, %v2105_v7  ;;  %v2106_v27 = vadd.f32 %v4865_v43, %v1844_v22  ;;  %v1842_v37 = vld [vmem:[#allocation3 + $0x28] sm:$0xff]  ;;  %1784 = vst.msk [vmem:[#allocation3 + $0x58] sm:$0xff] %vm346_vm1, %v1752_v13  ;;  %5049 = vmatmul.mubr.msk.bf16.gmra.mrb[148].mxu1 %vm624_vm2, %v3671_v21 }
 0x223   : > { %2135 = vst.msk [vmem:[#allocation3 + $0x20] sm:$0xff] %vm346_vm1, %v2103_v26  ;;  %v2104_v12 = vadd.f32 %v1991_v35, %v1842_v37  ;;  %1782 = vst.msk [vmem:[#allocation3 + $0x48] sm:$0xff] %vm346_vm1, %v1750_v48  ;;  %5052 = vmatprep.mubr.msk.bf16.mxu1 %vm624_vm2, %v3672_v24  ;;  %v1492_v43 = vld [vmem:[#allocation3 + $0x68] sm:$0xff]  ;;  %v1501_v26 = vld [vmem:[#allocation3 + $0xb0] sm:$0xff] }
 0x224   : > { %2138 = vst.msk [vmem:[#allocation3 + $0x38] sm:$0xff] %vm346_vm1, %v2106_v27  ;;  %v1499_v27 = vld [vmem:[#allocation3 + $0xa0] sm:$0xff] }
 0x225   : > { %2136 = vst.msk [vmem:[#allocation3 + $0x28] sm:$0xff] %vm346_vm1, %v2104_v12  ;;  %v4838_v1 = vpop.f32.mrb[44].mxu1 }
 0x226   : > { %v4872_v62 = vpop.f32.mrb[76].mxu0  ;;  %v1755_v5 = vadd.f32 %v4838_v1, %v1493_v60  ;;  %v1662_v18 = vpop.f32.mrb[45].mxu1 }
 0x227   : > { %v2020_v23 = vpop.f32.mrb[77].mxu0  ;;  %v1847_v51 = vld [vmem:[#allocation3 + $0x50] sm:$0xff]  ;;  %v1753_v52 = vadd.f32 %v1662_v18, %v1491_v49  ;;  %v4839_v9 = vpop.f32.mrb[46].mxu1 }
 0x228   : > { %v4873_v30 = vpop.f32.mrb[78].mxu0  ;;  %v2109_v17 = vadd.f32 %v4868_v47, %v1847_v51  ;;  %v1845_v32 = vld [vmem:[#allocation3 + $0x40] sm:$0xff]  ;;  %1787 = vst.msk [vmem:[#allocation3 + $0x70] sm:$0xff] %vm346_vm1, %v1755_v5  ;;  %v1756_v19 = vadd.f32 %v4839_v9, %v1494_v8  ;;  %v1665_v6 = vpop.f32.mrb[47].mxu1 }
 0x229   : > { %v2023_v46 = vpop.f32.mrb[79].mxu0  ;;  %v2107_v54 = vadd.f32 %v2004_v28, %v1845_v32  ;;  %v1848_v55 = vld [vmem:[#allocation3 + $0x58] sm:$0xff]  ;;  %1785 = vst.msk [vmem:[#allocation3 + $0x60] sm:$0xff] %vm346_vm1, %v1753_v52  ;;  %v1754_v35 = vadd.f32 %v1665_v6, %v1492_v43  ;;  %v1495_v47 = vld [vmem:[#allocation3 + $0x80] sm:$0xff]  ;;  %v1505_v32 = vld [vmem:[#allocation3 + $0xd0] sm:$0xff] }
 0x22a   : > { %2141 = vst.msk [vmem:[#allocation3 + $0x50] sm:$0xff] %vm346_vm1, %v2109_v17  ;;  %v2110_v33 = vadd.f32 %v4869_v4, %v1848_v55  ;;  %v1846_v36 = vld [vmem:[#allocation3 + $0x48] sm:$0xff]  ;;  %1788 = vst.msk [vmem:[#allocation3 + $0x78] sm:$0xff] %vm346_vm1, %v1756_v19  ;;  %5053 = vmatmul.mubr.msk.bf16.gmra.mrb[152].mxu1 %vm624_vm2, %v3673_v14  ;;  %v1498_v28 = vld [vmem:[#allocation3 + $0x98] sm:$0xff] }
 0x22b   : > { %2139 = vst.msk [vmem:[#allocation3 + $0x40] sm:$0xff] %vm346_vm1, %v2107_v54  ;;  %v2108_v34 = vadd.f32 %v2007_v59, %v1846_v36  ;;  %1786 = vst.msk [vmem:[#allocation3 + $0x68] sm:$0xff] %vm346_vm1, %v1754_v35  ;;  %5056 = vmatprep.mubr.msk.bf16.mxu1 %vm624_vm2, %v3674_v20  ;;  %v1506_v20 = vld [vmem:[#allocation3 + $0xd8] sm:$0xff] }
 0x22c   : > { %2142 = vst.msk [vmem:[#allocation3 + $0x58] sm:$0xff] %vm346_vm1, %v2110_v33 }
 0x22d   : > { %2140 = vst.msk [vmem:[#allocation3 + $0x48] sm:$0xff] %vm346_vm1, %v2108_v34  ;;  %v4842_v41 = vpop.f32.mrb[48].mxu1 }
 0x22e   : > { %v4876_v42 = vpop.f32.mrb[80].mxu0  ;;  %v1759_v15 = vadd.f32 %v4842_v41, %v1497_v40  ;;  %v1678_v50 = vpop.f32.mrb[49].mxu1  ;;  %v1504_v40 = vld [vmem:[#allocation3 + $0xc8] sm:$0xff] }
 0x22f   : > { %v2036_v16 = vpop.f32.mrb[81].mxu0  ;;  %v1851_v56 = vld [vmem:[#allocation3 + $0x70] sm:$0xff]  ;;  %v1757_v57 = vadd.f32 %v1678_v50, %v1495_v47  ;;  %v4843_v61 = vpop.f32.mrb[50].mxu1 }
 0x230   : > { %v4877_v29 = vpop.f32.mrb[82].mxu0  ;;  %v2113_v63 = vadd.f32 %v4872_v62, %v1851_v56  ;;  %v1849_v25 = vld [vmem:[#allocation3 + $0x60] sm:$0xff]  ;;  %1791 = vst.msk [vmem:[#allocation3 + $0x90] sm:$0xff] %vm346_vm1, %v1759_v15  ;;  %v1760_v0 = vadd.f32 %v4843_v61, %v1498_v28  ;;  %v1681_v4 = vpop.f32.mrb[51].mxu1  ;;  %v1502_v62 = vld [vmem:[#allocation3 + $0xb8] sm:$0xff] }
 0x231   : > { %v2039_v7 = vpop.f32.mrb[83].mxu0  ;;  %v2111_v10 = vadd.f32 %v2020_v23, %v1849_v25  ;;  %v1852_v13 = vld [vmem:[#allocation3 + $0x78] sm:$0xff]  ;;  %1789 = vst.msk [vmem:[#allocation3 + $0x80] sm:$0xff] %vm346_vm1, %v1757_v57  ;;  %v1758_v58 = vadd.f32 %v1681_v4, %v1496_v3  ;;  %v1500_v23 = vld [vmem:[#allocation3 + $0xa8] sm:$0xff]  ;;  %v1509_v57 = vld [vmem:[#allocation3 + $0xf0] sm:$0xff] }
 0x232   : > { %2145 = vst.msk [vmem:[#allocation3 + $0x70] sm:$0xff] %vm346_vm1, %v2113_v63  ;;  %v2114_v31 = vadd.f32 %v4873_v30, %v1852_v13  ;;  %v1850_v59 = vld [vmem:[#allocation3 + $0x68] sm:$0xff]  ;;  %1792 = vst.msk [vmem:[#allocation3 + $0x98] sm:$0xff] %vm346_vm1, %v1760_v0  ;;  %5057 = vmatmul.mubr.msk.bf16.gmra.mrb[156].mxu1 %vm624_vm2, %v3675_v53  ;;  %v1507_v63 = vld [vmem:[#allocation3 + $0xe0] sm:$0xff] }
 0x233   : > { %2143 = vst.msk [vmem:[#allocation3 + $0x60] sm:$0xff] %vm346_vm1, %v2111_v10  ;;  %v2112_v21 = vadd.f32 %v2023_v46, %v1850_v59  ;;  %1790 = vst.msk [vmem:[#allocation3 + $0x88] sm:$0xff] %vm346_vm1, %v1758_v58  ;;  %v1503_v46 = vld [vmem:[#allocation3 + $0xc0] sm:$0xff] }
 0x234   : > { %2146 = vst.msk [vmem:[#allocation3 + $0x78] sm:$0xff] %vm346_vm1, %v2114_v31 }
 0x235   : > { %2144 = vst.msk [vmem:[#allocation3 + $0x68] sm:$0xff] %vm346_vm1, %v2112_v21  ;;  %v4846_v22 = vpop.f32.mrb[52].mxu1  ;;  %v1508_v21 = vld [vmem:[#allocation3 + $0xe8] sm:$0xff] }
 0x236   : > { %v4880_v48 = vpop.f32.mrb[84].mxu0  ;;  %v1763_v24 = vadd.f32 %v4846_v22, %v1501_v26  ;;  %v1694_v37 = vpop.f32.mrb[53].mxu1 }
 0x237   : > { %v2052_v12 = vpop.f32.mrb[85].mxu0  ;;  %v1855_v60 = vld [vmem:[#allocation3 + $0x90] sm:$0xff]  ;;  %v1761_v1 = vadd.f32 %v1694_v37, %v1499_v27  ;;  %v4847_v11 = vpop.f32.mrb[54].mxu1 }
 0x238   : > { %v4881_v2 = vpop.f32.mrb[86].mxu0  ;;  %v2117_v5 = vadd.f32 %v4876_v42, %v1855_v60  ;;  %v1853_v49 = vld [vmem:[#allocation3 + $0x80] sm:$0xff]  ;;  %1795 = vst.msk [vmem:[#allocation3 + $0xb0] sm:$0xff] %vm346_vm1, %v1763_v24  ;;  %v1764_v18 = vadd.f32 %v4847_v11, %v1502_v62  ;;  %v1697_v44 = vpop.f32.mrb[55].mxu1 }
 0x239   : > { %v2055_v45 = vpop.f32.mrb[87].mxu0  ;;  %v2115_v51 = vadd.f32 %v2036_v16, %v1853_v49  ;;  %v1856_v52 = vld [vmem:[#allocation3 + $0x98] sm:$0xff]  ;;  %1793 = vst.msk [vmem:[#allocation3 + $0xa0] sm:$0xff] %vm346_vm1, %v1761_v1  ;;  %v1762_v8 = vadd.f32 %v1697_v44, %v1500_v23  ;;  %v2197_v1 = vld [vmem:[#allocation3 + $0x10] sm:$0xff] }
 0x23a   : > { %2149 = vst.msk [vmem:[#allocation3 + $0x90] sm:$0xff] %vm346_vm1, %v2117_v5  ;;  %v2118_v9 = vadd.f32 %v4877_v29, %v1856_v52  ;;  %v1854_v30 = vld [vmem:[#allocation3 + $0x88] sm:$0xff]  ;;  %1796 = vst.msk [vmem:[#allocation3 + $0xb8] sm:$0xff] %vm346_vm1, %v1764_v18  ;;  %v2195_v5 = vld [vmem:[#allocation3] sm:$0xff] }
 0x23b   : > { %2147 = vst.msk [vmem:[#allocation3 + $0x80] sm:$0xff] %vm346_vm1, %v2115_v51  ;;  %v2116_v17 = vadd.f32 %v2039_v7, %v1854_v30  ;;  %1794 = vst.msk [vmem:[#allocation3 + $0xa8] sm:$0xff] %vm346_vm1, %v1762_v8  ;;  %v1510_v7 = vld [vmem:[#allocation3 + $0xf8] sm:$0xff] }
 0x23c   : > { %2150 = vst.msk [vmem:[#allocation3 + $0x98] sm:$0xff] %vm346_vm1, %v2118_v9 }
 0x23d   : > { %2148 = vst.msk [vmem:[#allocation3 + $0x88] sm:$0xff] %vm346_vm1, %v2116_v17  ;;  %v4850_v19 = vpop.f32.mrb[56].mxu1  ;;  %v2196_v17 = vld [vmem:[#allocation3 + $0x8] sm:$0xff] }
 0x23e   : > { %v4884_v43 = vpop.f32.mrb[88].mxu0  ;;  %v1767_v6 = vadd.f32 %v4850_v19, %v1505_v32  ;;  %v1710_v14 = vpop.f32.mrb[57].mxu1 }
 0x23f   : > { %v2068_v54 = vpop.f32.mrb[89].mxu0  ;;  %v1859_v55 = vld [vmem:[#allocation3 + $0xb0] sm:$0xff]  ;;  %v1765_v35 = vadd.f32 %v1710_v14, %v1503_v46  ;;  %v4851_v33 = vpop.f32.mrb[58].mxu1 }
 0x240   : > { %v4885_v36 = vpop.f32.mrb[90].mxu0  ;;  %v2121_v34 = vadd.f32 %v4880_v48, %v1859_v55  ;;  %v1857_v38 = vld [vmem:[#allocation3 + $0xa0] sm:$0xff]  ;;  %1799 = vst.msk [vmem:[#allocation3 + $0xd0] sm:$0xff] %vm346_vm1, %v1767_v6  ;;  %v1768_v39 = vadd.f32 %v4851_v33, %v1506_v20  ;;  %v1713_v41 = vpop.f32.mrb[59].mxu1 }
 0x241   : > { %v2071_v42 = vpop.f32.mrb[91].mxu0  ;;  %v2119_v15 = vadd.f32 %v2052_v12, %v1857_v38  ;;  %v1860_v47 = vld [vmem:[#allocation3 + $0xb8] sm:$0xff]  ;;  %1797 = vst.msk [vmem:[#allocation3 + $0xc0] sm:$0xff] %vm346_vm1, %v1765_v35  ;;  %v1766_v50 = vadd.f32 %v1713_v41, %v1504_v40  ;;  %v2201_v35 = vld [vmem:[#allocation3 + $0x30] sm:$0xff] }
 0x242   : > { %2153 = vst.msk [vmem:[#allocation3 + $0xb0] sm:$0xff] %vm346_vm1, %v2121_v34  ;;  %v2122_v16 = vadd.f32 %v4881_v2, %v1860_v47  ;;  %v1858_v53 = vld [vmem:[#allocation3 + $0xa8] sm:$0xff]  ;;  %1800 = vst.msk [vmem:[#allocation3 + $0xd8] sm:$0xff] %vm346_vm1, %v1768_v39  ;;  %v2199_v34 = vld [vmem:[#allocation3 + $0x20] sm:$0xff] }
 0x243   : > { %2151 = vst.msk [vmem:[#allocation3 + $0xa0] sm:$0xff] %vm346_vm1, %v2119_v15  ;;  %v2120_v56 = vadd.f32 %v2055_v45, %v1858_v53  ;;  %1798 = vst.msk [vmem:[#allocation3 + $0xc8] sm:$0xff] %vm346_vm1, %v1766_v50  ;;  %v2198_v45 = vld [vmem:[#allocation3 + $0x18] sm:$0xff] }
 0x244   : > { %2154 = vst.msk [vmem:[#allocation3 + $0xb8] sm:$0xff] %vm346_vm1, %v2122_v16 }
 0x245   : > { %2152 = vst.msk [vmem:[#allocation3 + $0xa8] sm:$0xff] %vm346_vm1, %v2120_v56  ;;  %v4854_v28 = vpop.f32.mrb[60].mxu1  ;;  %v2200_v56 = vld [vmem:[#allocation3 + $0x28] sm:$0xff] }
 0x246   : > { %v4888_v61 = vpop.f32.mrb[92].mxu0  ;;  %v1771_v29 = vadd.f32 %v4854_v28, %v1509_v57  ;;  %v1726_v25 = vpop.f32.mrb[61].mxu1 }
 0x247   : > { %v2084_v0 = vpop.f32.mrb[93].mxu0  ;;  %v1863_v3 = vld [vmem:[#allocation3 + $0xd0] sm:$0xff]  ;;  %v1769_v4 = vadd.f32 %v1726_v25, %v1507_v63  ;;  %v4855_v10 = vpop.f32.mrb[62].mxu1 }
 0x248   : > { %v4889_v13 = vpop.f32.mrb[94].mxu0  ;;  %v2125_v58 = vadd.f32 %v4884_v43, %v1863_v3  ;;  %v1861_v31 = vld [vmem:[#allocation3 + $0xc0] sm:$0xff]  ;;  %1803 = vst.msk [vmem:[#allocation3 + $0xf0] sm:$0xff] %vm346_vm1, %v1771_v29  ;;  %v1772_v59 = vadd.f32 %v4855_v10, %v1510_v7  ;;  %v1729_v26 = vpop.f32.mrb[63].mxu1 }
 0x249   : > { %v2087_v22 = vpop.f32.mrb[95].mxu0  ;;  %v2123_v48 = vadd.f32 %v2068_v54, %v1861_v31  ;;  %v1864_v24 = vld [vmem:[#allocation3 + $0xd8] sm:$0xff]  ;;  %1801 = vst.msk [vmem:[#allocation3 + $0xe0] sm:$0xff] %vm346_vm1, %v1769_v4  ;;  %v1770_v27 = vadd.f32 %v1729_v26, %v1508_v21  ;;  %v2205_v4 = vld [vmem:[#allocation3 + $0x50] sm:$0xff] }
 0x24a   : > { %2157 = vst.msk [vmem:[#allocation3 + $0xd0] sm:$0xff] %vm346_vm1, %v2125_v58  ;;  %v2126_v37 = vadd.f32 %v4885_v36, %v1864_v24  ;;  %v1862_v12 = vld [vmem:[#allocation3 + $0xc8] sm:$0xff]  ;;  %1804 = vst.msk [vmem:[#allocation3 + $0xf8] sm:$0xff] %vm346_vm1, %v1772_v59  ;;  %v2203_v58 = vld [vmem:[#allocation3 + $0x40] sm:$0xff] }
 0x24b   : > { %2155 = vst.msk [vmem:[#allocation3 + $0xc0] sm:$0xff] %vm346_vm1, %v2123_v48  ;;  %v2124_v60 = vadd.f32 %v2071_v42, %v1862_v12  ;;  %1802 = vst.msk [vmem:[#allocation3 + $0xe8] sm:$0xff] %vm346_vm1, %v1770_v27  ;;  %v2202_v42 = vld [vmem:[#allocation3 + $0x38] sm:$0xff] }
 0x24c   : > { %2158 = vst.msk [vmem:[#allocation3 + $0xd8] sm:$0xff] %vm346_vm1, %v2126_v37 }
 0x24d   : > { %2156 = vst.msk [vmem:[#allocation3 + $0xc8] sm:$0xff] %vm346_vm1, %v2124_v60  ;;  %v4894_v62 = vpop.f32.mrb[64].mxu1  ;;  %v2204_v60 = vld [vmem:[#allocation3 + $0x48] sm:$0xff] }
 0x24e   : > { %v4928_v11 = vpop.f32.mrb[96].mxu0  ;;  %v2459_v2 = vadd.f32 %v4894_v62, %v2197_v1  ;;  %v2330_v49 = vpop.f32.mrb[65].mxu1 }
 0x24f   : > { %v2688_v18 = vpop.f32.mrb[97].mxu0  ;;  %v1867_v23 = vld [vmem:[#allocation3 + $0xf0] sm:$0xff]  ;;  %v2457_v44 = vadd.f32 %v2330_v49, %v2195_v5  ;;  %v4895_v51 = vpop.f32.mrb[66].mxu1 }
 0x250   : > { %v4929_v52 = vpop.f32.mrb[98].mxu0  ;;  %v2129_v8 = vadd.f32 %v4888_v61, %v1867_v23  ;;  %v1865_v9 = vld [vmem:[#allocation3 + $0xe0] sm:$0xff]  ;;  %2491 = vst.msk [vmem:[#allocation3 + $0x10] sm:$0xff] %vm346_vm1, %v2459_v2  ;;  %v2460_v30 = vadd.f32 %v4895_v51, %v2198_v45  ;;  %v2333_v32 = vpop.f32.mrb[67].mxu1 }
 0x251   : > { %v2691_v19 = vpop.f32.mrb[99].mxu0  ;;  %v2127_v43 = vadd.f32 %v2084_v0, %v1865_v9  ;;  %v1868_v6 = vld [vmem:[#allocation3 + $0xf8] sm:$0xff]  ;;  %2489 = vst.msk [vmem:[#allocation3] sm:$0xff] %vm346_vm1, %v2457_v44  ;;  %v2458_v46 = vadd.f32 %v2333_v32, %v2196_v17  ;;  %v2209_v44 = vld [vmem:[#allocation3 + $0x70] sm:$0xff] }
 0x252   : > { %2161 = vst.msk [vmem:[#allocation3 + $0xf0] sm:$0xff] %vm346_vm1, %v2129_v8  ;;  %v2130_v14 = vadd.f32 %v4889_v13, %v1868_v6  ;;  %v1866_v54 = vld [vmem:[#allocation3 + $0xe8] sm:$0xff]  ;;  %2492 = vst.msk [vmem:[#allocation3 + $0x18] sm:$0xff] %vm346_vm1, %v2460_v30  ;;  %v2207_v8 = vld [vmem:[#allocation3 + $0x60] sm:$0xff] }
 0x253   : > { %2159 = vst.msk [vmem:[#allocation3 + $0xe0] sm:$0xff] %vm346_vm1, %v2127_v43  ;;  %v2128_v55 = vadd.f32 %v2087_v22, %v1866_v54  ;;  %2490 = vst.msk [vmem:[#allocation3 + $0x8] sm:$0xff] %vm346_vm1, %v2458_v46  ;;  %v2206_v22 = vld [vmem:[#allocation3 + $0x58] sm:$0xff] }
 0x254   : > { %2162 = vst.msk [vmem:[#allocation3 + $0xf8] sm:$0xff] %vm346_vm1, %v2130_v14 }
 0x255   : > { %2160 = vst.msk [vmem:[#allocation3 + $0xe8] sm:$0xff] %vm346_vm1, %v2128_v55  ;;  %v4898_v20 = vpop.f32.mrb[68].mxu1  ;;  %v2208_v55 = vld [vmem:[#allocation3 + $0x68] sm:$0xff] }
 0x256   : > { %v4932_v33 = vpop.f32.mrb[100].mxu0  ;;  %v2463_v36 = vadd.f32 %v4898_v20, %v2201_v35  ;;  %v2346_v38 = vpop.f32.mrb[69].mxu1 }
 0x257   : > { %v2704_v39 = vpop.f32.mrb[101].mxu0  ;;  %v2555_v40 = vld [vmem:[#allocation3 + $0x10] sm:$0xff]  ;;  %v2461_v41 = vadd.f32 %v2346_v38, %v2199_v34  ;;  %v4899_v15 = vpop.f32.mrb[70].mxu1 }
 0x258   : > { %v4933_v47 = vpop.f32.mrb[102].mxu0  ;;  %v2817_v50 = vadd.f32 %v4928_v11, %v2555_v40  ;;  %v2553_v16 = vld [vmem:[#allocation3] sm:$0xff]  ;;  %2495 = vst.msk [vmem:[#allocation3 + $0x30] sm:$0xff] %vm346_vm1, %v2463_v36  ;;  %v2464_v53 = vadd.f32 %v4899_v15, %v2202_v42  ;;  %v2349_v57 = vpop.f32.mrb[71].mxu1 }
 0x259   : > { %v2707_v28 = vpop.f32.mrb[103].mxu0  ;;  %v2815_v61 = vadd.f32 %v2688_v18, %v2553_v16  ;;  %v2556_v29 = vld [vmem:[#allocation3 + $0x18] sm:$0xff]  ;;  %2493 = vst.msk [vmem:[#allocation3 + $0x20] sm:$0xff] %vm346_vm1, %v2461_v41  ;;  %v2462_v63 = vadd.f32 %v2349_v57, %v2200_v56  ;;  %v2213_v41 = vld [vmem:[#allocation3 + $0x90] sm:$0xff] }
 0x25a   : > { %2849 = vst.msk [vmem:[#allocation3 + $0x10] sm:$0xff] %vm346_vm1, %v2817_v50  ;;  %v2818_v25 = vadd.f32 %v4929_v52, %v2556_v29  ;;  %v2554_v0 = vld [vmem:[#allocation3 + $0x8] sm:$0xff]  ;;  %2496 = vst.msk [vmem:[#allocation3 + $0x38] sm:$0xff] %vm346_vm1, %v2464_v53  ;;  %v2211_v50 = vld [vmem:[#allocation3 + $0x80] sm:$0xff] }
 0x25b   : > { %2847 = vst.msk [vmem:[#allocation3] sm:$0xff] %vm346_vm1, %v2815_v61  ;;  %v2816_v3 = vadd.f32 %v2691_v19, %v2554_v0  ;;  %2494 = vst.msk [vmem:[#allocation3 + $0x28] sm:$0xff] %vm346_vm1, %v2462_v63  ;;  %v2210_v19 = vld [vmem:[#allocation3 + $0x78] sm:$0xff] }
 0x25c   : > { %2850 = vst.msk [vmem:[#allocation3 + $0x18] sm:$0xff] %vm346_vm1, %v2818_v25 }
 0x25d   : > { %2848 = vst.msk [vmem:[#allocation3 + $0x8] sm:$0xff] %vm346_vm1, %v2816_v3  ;;  %v4902_v7 = vpop.f32.mrb[72].mxu1  ;;  %v2212_v3 = vld [vmem:[#allocation3 + $0x88] sm:$0xff] }
 0x25e   : > { %v4936_v10 = vpop.f32.mrb[104].mxu0  ;;  %v2467_v13 = vadd.f32 %v4902_v7, %v2205_v4  ;;  %v2362_v31 = vpop.f32.mrb[73].mxu1 }
 0x25f   : > { %v2720_v59 = vpop.f32.mrb[105].mxu0  ;;  %v2559_v21 = vld [vmem:[#allocation3 + $0x30] sm:$0xff]  ;;  %v2465_v26 = vadd.f32 %v2362_v31, %v2203_v58  ;;  %v4903_v48 = vpop.f32.mrb[74].mxu1 }
 0x260   : > { %v4937_v24 = vpop.f32.mrb[106].mxu0  ;;  %v2821_v27 = vadd.f32 %v4932_v33, %v2559_v21  ;;  %v2557_v37 = vld [vmem:[#allocation3 + $0x20] sm:$0xff]  ;;  %2499 = vst.msk [vmem:[#allocation3 + $0x50] sm:$0xff] %vm346_vm1, %v2467_v13  ;;  %v2468_v12 = vadd.f32 %v4903_v48, %v2206_v22  ;;  %v2365_v1 = vpop.f32.mrb[75].mxu1 }
 0x261   : > { %v2723_v62 = vpop.f32.mrb[107].mxu0  ;;  %v2819_v11 = vadd.f32 %v2704_v39, %v2557_v37  ;;  %v2560_v2 = vld [vmem:[#allocation3 + $0x38] sm:$0xff]  ;;  %2497 = vst.msk [vmem:[#allocation3 + $0x40] sm:$0xff] %vm346_vm1, %v2465_v26  ;;  %v2466_v5 = vadd.f32 %v2365_v1, %v2204_v60  ;;  %v2217_v26 = vld [vmem:[#allocation3 + $0xb0] sm:$0xff] }
 0x262   : > { %2853 = vst.msk [vmem:[#allocation3 + $0x30] sm:$0xff] %vm346_vm1, %v2821_v27  ;;  %v2822_v49 = vadd.f32 %v4933_v47, %v2560_v2  ;;  %v2558_v18 = vld [vmem:[#allocation3 + $0x28] sm:$0xff]  ;;  %2500 = vst.msk [vmem:[#allocation3 + $0x58] sm:$0xff] %vm346_vm1, %v2468_v12  ;;  %v2215_v27 = vld [vmem:[#allocation3 + $0xa0] sm:$0xff] }
 0x263   : > { %2851 = vst.msk [vmem:[#allocation3 + $0x20] sm:$0xff] %vm346_vm1, %v2819_v11  ;;  %v2820_v23 = vadd.f32 %v2707_v28, %v2558_v18  ;;  %2498 = vst.msk [vmem:[#allocation3 + $0x48] sm:$0xff] %vm346_vm1, %v2466_v5  ;;  %v2214_v28 = vld [vmem:[#allocation3 + $0x98] sm:$0xff] }
 0x264   : > { %2854 = vst.msk [vmem:[#allocation3 + $0x38] sm:$0xff] %vm346_vm1, %v2822_v49 }
 0x265   : > { %2852 = vst.msk [vmem:[#allocation3 + $0x28] sm:$0xff] %vm346_vm1, %v2820_v23  ;;  %v4906_v45 = vpop.f32.mrb[76].mxu1  ;;  %v2216_v23 = vld [vmem:[#allocation3 + $0xa8] sm:$0xff] }
 0x266   : > { %v4940_v51 = vpop.f32.mrb[108].mxu0  ;;  %v2471_v52 = vadd.f32 %v4906_v45, %v2209_v44  ;;  %v2378_v9 = vpop.f32.mrb[77].mxu1 }
 0x267   : > { %v2736_v30 = vpop.f32.mrb[109].mxu0  ;;  %v2563_v17 = vld [vmem:[#allocation3 + $0x50] sm:$0xff]  ;;  %v2469_v32 = vadd.f32 %v2378_v9, %v2207_v8  ;;  %v4907_v43 = vpop.f32.mrb[78].mxu1 }
 0x268   : > { %v4941_v6 = vpop.f32.mrb[110].mxu0  ;;  %v2825_v46 = vadd.f32 %v4936_v10, %v2563_v17  ;;  %v2561_v14 = vld [vmem:[#allocation3 + $0x40] sm:$0xff]  ;;  %2503 = vst.msk [vmem:[#allocation3 + $0x70] sm:$0xff] %vm346_vm1, %v2471_v52  ;;  %v2472_v54 = vadd.f32 %v4907_v43, %v2210_v19  ;;  %v2381_v35 = vpop.f32.mrb[79].mxu1 }
 0x269   : > { %v2739_v20 = vpop.f32.mrb[111].mxu0  ;;  %v2823_v33 = vadd.f32 %v2720_v59, %v2561_v14  ;;  %v2564_v36 = vld [vmem:[#allocation3 + $0x58] sm:$0xff]  ;;  %2501 = vst.msk [vmem:[#allocation3 + $0x60] sm:$0xff] %vm346_vm1, %v2469_v32  ;;  %v2470_v34 = vadd.f32 %v2381_v35, %v2208_v55  ;;  %v2221_v32 = vld [vmem:[#allocation3 + $0xd0] sm:$0xff] }
 0x26a   : > { %2857 = vst.msk [vmem:[#allocation3 + $0x50] sm:$0xff] %vm346_vm1, %v2825_v46  ;;  %v2826_v38 = vadd.f32 %v4937_v24, %v2564_v36  ;;  %v2562_v39 = vld [vmem:[#allocation3 + $0x48] sm:$0xff]  ;;  %2504 = vst.msk [vmem:[#allocation3 + $0x78] sm:$0xff] %vm346_vm1, %v2472_v54  ;;  %v2219_v46 = vld [vmem:[#allocation3 + $0xc0] sm:$0xff] }
 0x26b   : > { %2855 = vst.msk [vmem:[#allocation3 + $0x40] sm:$0xff] %vm346_vm1, %v2823_v33  ;;  %v2824_v40 = vadd.f32 %v2723_v62, %v2562_v39  ;;  %2502 = vst.msk [vmem:[#allocation3 + $0x68] sm:$0xff] %vm346_vm1, %v2470_v34  ;;  %v2218_v62 = vld [vmem:[#allocation3 + $0xb8] sm:$0xff] }
 0x26c   : > { %2858 = vst.msk [vmem:[#allocation3 + $0x58] sm:$0xff] %vm346_vm1, %v2826_v38 }
 0x26d   : > { %2856 = vst.msk [vmem:[#allocation3 + $0x48] sm:$0xff] %vm346_vm1, %v2824_v40  ;;  %v4910_v42 = vpop.f32.mrb[80].mxu1  ;;  %v2220_v40 = vld [vmem:[#allocation3 + $0xc8] sm:$0xff] }
 0x26e   : > { %v4944_v15 = vpop.f32.mrb[112].mxu0  ;;  %v2475_v47 = vadd.f32 %v4910_v42, %v2213_v41  ;;  %v2394_v16 = vpop.f32.mrb[81].mxu1 }
 0x26f   : > { %v2752_v53 = vpop.f32.mrb[113].mxu0  ;;  %v2567_v56 = vld [vmem:[#allocation3 + $0x70] sm:$0xff]  ;;  %v2473_v57 = vadd.f32 %v2394_v16, %v2211_v50  ;;  %v4911_v61 = vpop.f32.mrb[82].mxu1 }
 0x270   : > { %v4945_v29 = vpop.f32.mrb[114].mxu0  ;;  %v2829_v63 = vadd.f32 %v4940_v51, %v2567_v56  ;;  %v2565_v25 = vld [vmem:[#allocation3 + $0x60] sm:$0xff]  ;;  %2507 = vst.msk [vmem:[#allocation3 + $0x90] sm:$0xff] %vm346_vm1, %v2475_v47  ;;  %v2476_v0 = vadd.f32 %v4911_v61, %v2214_v28  ;;  %v2397_v4 = vpop.f32.mrb[83].mxu1 }
 0x271   : > { %v2755_v7 = vpop.f32.mrb[115].mxu0  ;;  %v2827_v10 = vadd.f32 %v2736_v30, %v2565_v25  ;;  %v2568_v13 = vld [vmem:[#allocation3 + $0x78] sm:$0xff]  ;;  %2505 = vst.msk [vmem:[#allocation3 + $0x80] sm:$0xff] %vm346_vm1, %v2473_v57  ;;  %v2474_v58 = vadd.f32 %v2397_v4, %v2212_v3  ;;  %v2225_v57 = vld [vmem:[#allocation3 + $0xf0] sm:$0xff] }
 0x272   : > { %2861 = vst.msk [vmem:[#allocation3 + $0x70] sm:$0xff] %vm346_vm1, %v2829_v63  ;;  %v2830_v31 = vadd.f32 %v4941_v6, %v2568_v13  ;;  %v2566_v59 = vld [vmem:[#allocation3 + $0x68] sm:$0xff]  ;;  %2508 = vst.msk [vmem:[#allocation3 + $0x98] sm:$0xff] %vm346_vm1, %v2476_v0  ;;  %v2223_v63 = vld [vmem:[#allocation3 + $0xe0] sm:$0xff] }
 0x273   : > { %2859 = vst.msk [vmem:[#allocation3 + $0x60] sm:$0xff] %vm346_vm1, %v2827_v10  ;;  %v2828_v21 = vadd.f32 %v2739_v20, %v2566_v59  ;;  %2506 = vst.msk [vmem:[#allocation3 + $0x88] sm:$0xff] %vm346_vm1, %v2474_v58  ;;  %v2222_v20 = vld [vmem:[#allocation3 + $0xd8] sm:$0xff] }
 0x274   : > { %2862 = vst.msk [vmem:[#allocation3 + $0x78] sm:$0xff] %vm346_vm1, %v2830_v31 }
 0x275   : > { %2860 = vst.msk [vmem:[#allocation3 + $0x68] sm:$0xff] %vm346_vm1, %v2828_v21  ;;  %v4914_v22 = vpop.f32.mrb[84].mxu1  ;;  %v2224_v21 = vld [vmem:[#allocation3 + $0xe8] sm:$0xff] }
 0x276   : > { %v4948_v48 = vpop.f32.mrb[116].mxu0  ;;  %v2479_v24 = vadd.f32 %v4914_v22, %v2217_v26  ;;  %v2410_v37 = vpop.f32.mrb[85].mxu1 }
 0x277   : > { %v2768_v12 = vpop.f32.mrb[117].mxu0  ;;  %v2571_v60 = vld [vmem:[#allocation3 + $0x90] sm:$0xff]  ;;  %v2477_v1 = vadd.f32 %v2410_v37, %v2215_v27  ;;  %v4915_v11 = vpop.f32.mrb[86].mxu1 }
 0x278   : > { %v4949_v2 = vpop.f32.mrb[118].mxu0  ;;  %v2833_v5 = vadd.f32 %v4944_v15, %v2571_v60  ;;  %v2569_v49 = vld [vmem:[#allocation3 + $0x80] sm:$0xff]  ;;  %2511 = vst.msk [vmem:[#allocation3 + $0xb0] sm:$0xff] %vm346_vm1, %v2479_v24  ;;  %v2480_v18 = vadd.f32 %v4915_v11, %v2218_v62  ;;  %v2413_v44 = vpop.f32.mrb[87].mxu1 }
 0x279   : > { %v2771_v45 = vpop.f32.mrb[119].mxu0  ;;  %v2831_v51 = vadd.f32 %v2752_v53, %v2569_v49  ;;  %v2572_v52 = vld [vmem:[#allocation3 + $0x98] sm:$0xff]  ;;  %2509 = vst.msk [vmem:[#allocation3 + $0xa0] sm:$0xff] %vm346_vm1, %v2477_v1  ;;  %v2478_v8 = vadd.f32 %v2413_v44, %v2216_v23  ;;  %v2914_v1 = vld [vmem:[#allocation3 + $0x10] sm:$0xff] }
 0x27a   : > { %2865 = vst.msk [vmem:[#allocation3 + $0x90] sm:$0xff] %vm346_vm1, %v2833_v5  ;;  %v2834_v9 = vadd.f32 %v4945_v29, %v2572_v52  ;;  %v2570_v30 = vld [vmem:[#allocation3 + $0x88] sm:$0xff]  ;;  %2512 = vst.msk [vmem:[#allocation3 + $0xb8] sm:$0xff] %vm346_vm1, %v2480_v18  ;;  %v2912_v5 = vld [vmem:[#allocation3] sm:$0xff] }
 0x27b   : > { %2863 = vst.msk [vmem:[#allocation3 + $0x80] sm:$0xff] %vm346_vm1, %v2831_v51  ;;  %v2832_v17 = vadd.f32 %v2755_v7, %v2570_v30  ;;  %2510 = vst.msk [vmem:[#allocation3 + $0xa8] sm:$0xff] %vm346_vm1, %v2478_v8  ;;  %v2226_v7 = vld [vmem:[#allocation3 + $0xf8] sm:$0xff] }
 0x27c   : > { %2866 = vst.msk [vmem:[#allocation3 + $0x98] sm:$0xff] %vm346_vm1, %v2834_v9 }
 0x27d   : > { %2864 = vst.msk [vmem:[#allocation3 + $0x88] sm:$0xff] %vm346_vm1, %v2832_v17  ;;  %v4918_v19 = vpop.f32.mrb[88].mxu1  ;;  %v2913_v17 = vld [vmem:[#allocation3 + $0x8] sm:$0xff] }
 0x27e   : > { %v4952_v43 = vpop.f32.mrb[120].mxu0  ;;  %v2483_v6 = vadd.f32 %v4918_v19, %v2221_v32  ;;  %v2426_v14 = vpop.f32.mrb[89].mxu1 }
 0x27f   : > { %v2784_v54 = vpop.f32.mrb[121].mxu0  ;;  %v2575_v55 = vld [vmem:[#allocation3 + $0xb0] sm:$0xff]  ;;  %v2481_v35 = vadd.f32 %v2426_v14, %v2219_v46  ;;  %v4919_v33 = vpop.f32.mrb[90].mxu1 }
 0x280   : > { %v4953_v36 = vpop.f32.mrb[122].mxu0  ;;  %v2837_v34 = vadd.f32 %v4948_v48, %v2575_v55  ;;  %v2573_v38 = vld [vmem:[#allocation3 + $0xa0] sm:$0xff]  ;;  %2515 = vst.msk [vmem:[#allocation3 + $0xd0] sm:$0xff] %vm346_vm1, %v2483_v6  ;;  %v2484_v39 = vadd.f32 %v4919_v33, %v2222_v20  ;;  %v2429_v41 = vpop.f32.mrb[91].mxu1 }
 0x281   : > { %v2787_v42 = vpop.f32.mrb[123].mxu0  ;;  %v2835_v15 = vadd.f32 %v2768_v12, %v2573_v38  ;;  %v2576_v47 = vld [vmem:[#allocation3 + $0xb8] sm:$0xff]  ;;  %2513 = vst.msk [vmem:[#allocation3 + $0xc0] sm:$0xff] %vm346_vm1, %v2481_v35  ;;  %v2482_v50 = vadd.f32 %v2429_v41, %v2220_v40  ;;  %v2918_v35 = vld [vmem:[#allocation3 + $0x30] sm:$0xff] }
 0x282   : > { %2869 = vst.msk [vmem:[#allocation3 + $0xb0] sm:$0xff] %vm346_vm1, %v2837_v34  ;;  %v2838_v16 = vadd.f32 %v4949_v2, %v2576_v47  ;;  %v2574_v53 = vld [vmem:[#allocation3 + $0xa8] sm:$0xff]  ;;  %2516 = vst.msk [vmem:[#allocation3 + $0xd8] sm:$0xff] %vm346_vm1, %v2484_v39  ;;  %v2916_v34 = vld [vmem:[#allocation3 + $0x20] sm:$0xff] }
 0x283   : > { %2867 = vst.msk [vmem:[#allocation3 + $0xa0] sm:$0xff] %vm346_vm1, %v2835_v15  ;;  %v2836_v56 = vadd.f32 %v2771_v45, %v2574_v53  ;;  %2514 = vst.msk [vmem:[#allocation3 + $0xc8] sm:$0xff] %vm346_vm1, %v2482_v50  ;;  %v2915_v45 = vld [vmem:[#allocation3 + $0x18] sm:$0xff] }
 0x284   : > { %2870 = vst.msk [vmem:[#allocation3 + $0xb8] sm:$0xff] %vm346_vm1, %v2838_v16 }
 0x285   : > { %2868 = vst.msk [vmem:[#allocation3 + $0xa8] sm:$0xff] %vm346_vm1, %v2836_v56  ;;  %v4922_v28 = vpop.f32.mrb[92].mxu1  ;;  %v2917_v56 = vld [vmem:[#allocation3 + $0x28] sm:$0xff] }
 0x286   : > { %v4956_v61 = vpop.f32.mrb[124].mxu0  ;;  %v2487_v29 = vadd.f32 %v4922_v28, %v2225_v57  ;;  %v2442_v25 = vpop.f32.mrb[93].mxu1 }
 0x287   : > { %v2800_v0 = vpop.f32.mrb[125].mxu0  ;;  %v2579_v3 = vld [vmem:[#allocation3 + $0xd0] sm:$0xff]  ;;  %v2485_v4 = vadd.f32 %v2442_v25, %v2223_v63  ;;  %v4923_v10 = vpop.f32.mrb[94].mxu1 }
 0x288   : > { %v4957_v13 = vpop.f32.mrb[126].mxu0  ;;  %v2841_v58 = vadd.f32 %v4952_v43, %v2579_v3  ;;  %v2577_v31 = vld [vmem:[#allocation3 + $0xc0] sm:$0xff]  ;;  %2519 = vst.msk [vmem:[#allocation3 + $0xf0] sm:$0xff] %vm346_vm1, %v2487_v29  ;;  %v2488_v59 = vadd.f32 %v4923_v10, %v2226_v7  ;;  %v2445_v26 = vpop.f32.mrb[95].mxu1 }
 0x289   : > { %v2803_v22 = vpop.f32.mrb[127].mxu0  ;;  %v2839_v48 = vadd.f32 %v2784_v54, %v2577_v31  ;;  %v2580_v24 = vld [vmem:[#allocation3 + $0xd8] sm:$0xff]  ;;  %2517 = vst.msk [vmem:[#allocation3 + $0xe0] sm:$0xff] %vm346_vm1, %v2485_v4  ;;  %v2486_v27 = vadd.f32 %v2445_v26, %v2224_v21  ;;  %v2922_v4 = vld [vmem:[#allocation3 + $0x50] sm:$0xff] }
 0x28a   : > { %2873 = vst.msk [vmem:[#allocation3 + $0xd0] sm:$0xff] %vm346_vm1, %v2841_v58  ;;  %v2842_v37 = vadd.f32 %v4953_v36, %v2580_v24  ;;  %v2578_v12 = vld [vmem:[#allocation3 + $0xc8] sm:$0xff]  ;;  %2520 = vst.msk [vmem:[#allocation3 + $0xf8] sm:$0xff] %vm346_vm1, %v2488_v59  ;;  %v2920_v58 = vld [vmem:[#allocation3 + $0x40] sm:$0xff] }
 0x28b   : > { %2871 = vst.msk [vmem:[#allocation3 + $0xc0] sm:$0xff] %vm346_vm1, %v2839_v48  ;;  %v2840_v60 = vadd.f32 %v2787_v42, %v2578_v12  ;;  %2518 = vst.msk [vmem:[#allocation3 + $0xe8] sm:$0xff] %vm346_vm1, %v2486_v27  ;;  %v2919_v42 = vld [vmem:[#allocation3 + $0x38] sm:$0xff] }
 0x28c   : > { %2874 = vst.msk [vmem:[#allocation3 + $0xd8] sm:$0xff] %vm346_vm1, %v2842_v37 }
 0x28d   : > { %2872 = vst.msk [vmem:[#allocation3 + $0xc8] sm:$0xff] %vm346_vm1, %v2840_v60  ;;  %v4962_v62 = vpop.f32.mrb[96].mxu1  ;;  %v2921_v60 = vld [vmem:[#allocation3 + $0x48] sm:$0xff] }
 0x28e   : > { %v4996_v11 = vpop.f32.mrb[128].mxu0  ;;  %v3176_v2 = vadd.f32 %v4962_v62, %v2914_v1  ;;  %v3047_v49 = vpop.f32.mrb[97].mxu1 }
 0x28f   : > { %v3405_v18 = vpop.f32.mrb[129].mxu0  ;;  %v2583_v23 = vld [vmem:[#allocation3 + $0xf0] sm:$0xff]  ;;  %v3174_v44 = vadd.f32 %v3047_v49, %v2912_v5  ;;  %v4963_v51 = vpop.f32.mrb[98].mxu1 }
 0x290   : > { %v4997_v52 = vpop.f32.mrb[130].mxu0  ;;  %v2845_v8 = vadd.f32 %v4956_v61, %v2583_v23  ;;  %v2581_v9 = vld [vmem:[#allocation3 + $0xe0] sm:$0xff]  ;;  %3208 = vst.msk [vmem:[#allocation3 + $0x10] sm:$0xff] %vm346_vm1, %v3176_v2  ;;  %v3177_v30 = vadd.f32 %v4963_v51, %v2915_v45  ;;  %v3050_v32 = vpop.f32.mrb[99].mxu1 }
 0x291   : > { %v3408_v19 = vpop.f32.mrb[131].mxu0  ;;  %v2843_v43 = vadd.f32 %v2800_v0, %v2581_v9  ;;  %v2584_v6 = vld [vmem:[#allocation3 + $0xf8] sm:$0xff]  ;;  %3206 = vst.msk [vmem:[#allocation3] sm:$0xff] %vm346_vm1, %v3174_v44  ;;  %v3175_v46 = vadd.f32 %v3050_v32, %v2913_v17  ;;  %v2926_v44 = vld [vmem:[#allocation3 + $0x70] sm:$0xff] }
 0x292   : > { %2877 = vst.msk [vmem:[#allocation3 + $0xf0] sm:$0xff] %vm346_vm1, %v2845_v8  ;;  %v2846_v14 = vadd.f32 %v4957_v13, %v2584_v6  ;;  %v2582_v54 = vld [vmem:[#allocation3 + $0xe8] sm:$0xff]  ;;  %3209 = vst.msk [vmem:[#allocation3 + $0x18] sm:$0xff] %vm346_vm1, %v3177_v30  ;;  %v2924_v8 = vld [vmem:[#allocation3 + $0x60] sm:$0xff] }
 0x293   : > { %2875 = vst.msk [vmem:[#allocation3 + $0xe0] sm:$0xff] %vm346_vm1, %v2843_v43  ;;  %v2844_v55 = vadd.f32 %v2803_v22, %v2582_v54  ;;  %3207 = vst.msk [vmem:[#allocation3 + $0x8] sm:$0xff] %vm346_vm1, %v3175_v46  ;;  %v2923_v22 = vld [vmem:[#allocation3 + $0x58] sm:$0xff] }
 0x294   : > { %2878 = vst.msk [vmem:[#allocation3 + $0xf8] sm:$0xff] %vm346_vm1, %v2846_v14 }
 0x295   : > { %2876 = vst.msk [vmem:[#allocation3 + $0xe8] sm:$0xff] %vm346_vm1, %v2844_v55  ;;  %v4966_v20 = vpop.f32.mrb[100].mxu1  ;;  %v2925_v55 = vld [vmem:[#allocation3 + $0x68] sm:$0xff] }
 0x296   : > { %v5000_v33 = vpop.f32.mrb[132].mxu0  ;;  %v3180_v36 = vadd.f32 %v4966_v20, %v2918_v35  ;;  %v3063_v38 = vpop.f32.mrb[101].mxu1 }
 0x297   : > { %v3421_v39 = vpop.f32.mrb[133].mxu0  ;;  %v3272_v40 = vld [vmem:[#allocation3 + $0x10] sm:$0xff]  ;;  %v3178_v41 = vadd.f32 %v3063_v38, %v2916_v34  ;;  %v4967_v15 = vpop.f32.mrb[102].mxu1 }
 0x298   : > { %v5001_v47 = vpop.f32.mrb[134].mxu0  ;;  %v3534_v50 = vadd.f32 %v4996_v11, %v3272_v40  ;;  %v3270_v16 = vld [vmem:[#allocation3] sm:$0xff]  ;;  %3212 = vst.msk [vmem:[#allocation3 + $0x30] sm:$0xff] %vm346_vm1, %v3180_v36  ;;  %v3181_v53 = vadd.f32 %v4967_v15, %v2919_v42  ;;  %v3066_v57 = vpop.f32.mrb[103].mxu1 }
 0x299   : > { %v3424_v28 = vpop.f32.mrb[135].mxu0  ;;  %v3532_v61 = vadd.f32 %v3405_v18, %v3270_v16  ;;  %v3273_v29 = vld [vmem:[#allocation3 + $0x18] sm:$0xff]  ;;  %3210 = vst.msk [vmem:[#allocation3 + $0x20] sm:$0xff] %vm346_vm1, %v3178_v41  ;;  %v3179_v63 = vadd.f32 %v3066_v57, %v2917_v56  ;;  %v2930_v41 = vld [vmem:[#allocation3 + $0x90] sm:$0xff] }
 0x29a   : > { %3566 = vst.msk [vmem:[#allocation3 + $0x10] sm:$0xff] %vm346_vm1, %v3534_v50  ;;  %v3535_v25 = vadd.f32 %v4997_v52, %v3273_v29  ;;  %v3271_v0 = vld [vmem:[#allocation3 + $0x8] sm:$0xff]  ;;  %3213 = vst.msk [vmem:[#allocation3 + $0x38] sm:$0xff] %vm346_vm1, %v3181_v53  ;;  %v2928_v50 = vld [vmem:[#allocation3 + $0x80] sm:$0xff] }
 0x29b   : > { %3564 = vst.msk [vmem:[#allocation3] sm:$0xff] %vm346_vm1, %v3532_v61  ;;  %v3533_v3 = vadd.f32 %v3408_v19, %v3271_v0  ;;  %3211 = vst.msk [vmem:[#allocation3 + $0x28] sm:$0xff] %vm346_vm1, %v3179_v63  ;;  %v2927_v19 = vld [vmem:[#allocation3 + $0x78] sm:$0xff] }
 0x29c   : > { %3567 = vst.msk [vmem:[#allocation3 + $0x18] sm:$0xff] %vm346_vm1, %v3535_v25 }
 0x29d   : > { %3565 = vst.msk [vmem:[#allocation3 + $0x8] sm:$0xff] %vm346_vm1, %v3533_v3  ;;  %v4970_v7 = vpop.f32.mrb[104].mxu1  ;;  %v2929_v3 = vld [vmem:[#allocation3 + $0x88] sm:$0xff] }
 0x29e   : > { %v5004_v10 = vpop.f32.mrb[136].mxu0  ;;  %v3184_v13 = vadd.f32 %v4970_v7, %v2922_v4  ;;  %v3079_v31 = vpop.f32.mrb[105].mxu1 }
 0x29f   : > { %v3437_v59 = vpop.f32.mrb[137].mxu0  ;;  %v3276_v21 = vld [vmem:[#allocation3 + $0x30] sm:$0xff]  ;;  %v3182_v26 = vadd.f32 %v3079_v31, %v2920_v58  ;;  %v4971_v48 = vpop.f32.mrb[106].mxu1 }
 0x2a0   : > { %v5005_v24 = vpop.f32.mrb[138].mxu0  ;;  %v3538_v27 = vadd.f32 %v5000_v33, %v3276_v21  ;;  %v3274_v37 = vld [vmem:[#allocation3 + $0x20] sm:$0xff]  ;;  %3216 = vst.msk [vmem:[#allocation3 + $0x50] sm:$0xff] %vm346_vm1, %v3184_v13  ;;  %v3185_v12 = vadd.f32 %v4971_v48, %v2923_v22  ;;  %v3082_v1 = vpop.f32.mrb[107].mxu1 }
 0x2a1   : > { %v3440_v62 = vpop.f32.mrb[139].mxu0  ;;  %v3536_v11 = vadd.f32 %v3421_v39, %v3274_v37  ;;  %v3277_v2 = vld [vmem:[#allocation3 + $0x38] sm:$0xff]  ;;  %3214 = vst.msk [vmem:[#allocation3 + $0x40] sm:$0xff] %vm346_vm1, %v3182_v26  ;;  %v3183_v5 = vadd.f32 %v3082_v1, %v2921_v60  ;;  %v2934_v26 = vld [vmem:[#allocation3 + $0xb0] sm:$0xff] }
 0x2a2   : > { %3570 = vst.msk [vmem:[#allocation3 + $0x30] sm:$0xff] %vm346_vm1, %v3538_v27  ;;  %v3539_v49 = vadd.f32 %v5001_v47, %v3277_v2  ;;  %v3275_v18 = vld [vmem:[#allocation3 + $0x28] sm:$0xff]  ;;  %3217 = vst.msk [vmem:[#allocation3 + $0x58] sm:$0xff] %vm346_vm1, %v3185_v12  ;;  %v2932_v27 = vld [vmem:[#allocation3 + $0xa0] sm:$0xff] }
 0x2a3   : > { %3568 = vst.msk [vmem:[#allocation3 + $0x20] sm:$0xff] %vm346_vm1, %v3536_v11  ;;  %v3537_v23 = vadd.f32 %v3424_v28, %v3275_v18  ;;  %3215 = vst.msk [vmem:[#allocation3 + $0x48] sm:$0xff] %vm346_vm1, %v3183_v5  ;;  %v2931_v28 = vld [vmem:[#allocation3 + $0x98] sm:$0xff] }
 0x2a4   : > { %3571 = vst.msk [vmem:[#allocation3 + $0x38] sm:$0xff] %vm346_vm1, %v3539_v49 }
 0x2a5   : > { %3569 = vst.msk [vmem:[#allocation3 + $0x28] sm:$0xff] %vm346_vm1, %v3537_v23  ;;  %v4974_v45 = vpop.f32.mrb[108].mxu1  ;;  %v2933_v23 = vld [vmem:[#allocation3 + $0xa8] sm:$0xff] }
 0x2a6   : > { %v5008_v51 = vpop.f32.mrb[140].mxu0  ;;  %v3188_v52 = vadd.f32 %v4974_v45, %v2926_v44  ;;  %v3095_v9 = vpop.f32.mrb[109].mxu1 }
 0x2a7   : > { %v3453_v30 = vpop.f32.mrb[141].mxu0  ;;  %v3280_v17 = vld [vmem:[#allocation3 + $0x50] sm:$0xff]  ;;  %v3186_v32 = vadd.f32 %v3095_v9, %v2924_v8  ;;  %v4975_v43 = vpop.f32.mrb[110].mxu1 }
 0x2a8   : > { %v5009_v6 = vpop.f32.mrb[142].mxu0  ;;  %v3542_v46 = vadd.f32 %v5004_v10, %v3280_v17  ;;  %v3278_v14 = vld [vmem:[#allocation3 + $0x40] sm:$0xff]  ;;  %3220 = vst.msk [vmem:[#allocation3 + $0x70] sm:$0xff] %vm346_vm1, %v3188_v52  ;;  %v3189_v54 = vadd.f32 %v4975_v43, %v2927_v19  ;;  %v3098_v35 = vpop.f32.mrb[111].mxu1 }
 0x2a9   : > { %v3456_v20 = vpop.f32.mrb[143].mxu0  ;;  %v3540_v33 = vadd.f32 %v3437_v59, %v3278_v14  ;;  %v3281_v36 = vld [vmem:[#allocation3 + $0x58] sm:$0xff]  ;;  %3218 = vst.msk [vmem:[#allocation3 + $0x60] sm:$0xff] %vm346_vm1, %v3186_v32  ;;  %v3187_v34 = vadd.f32 %v3098_v35, %v2925_v55  ;;  %v2938_v32 = vld [vmem:[#allocation3 + $0xd0] sm:$0xff] }
 0x2aa   : > { %3574 = vst.msk [vmem:[#allocation3 + $0x50] sm:$0xff] %vm346_vm1, %v3542_v46  ;;  %v3543_v38 = vadd.f32 %v5005_v24, %v3281_v36  ;;  %v3279_v39 = vld [vmem:[#allocation3 + $0x48] sm:$0xff]  ;;  %3221 = vst.msk [vmem:[#allocation3 + $0x78] sm:$0xff] %vm346_vm1, %v3189_v54  ;;  %v2936_v46 = vld [vmem:[#allocation3 + $0xc0] sm:$0xff] }
 0x2ab   : > { %3572 = vst.msk [vmem:[#allocation3 + $0x40] sm:$0xff] %vm346_vm1, %v3540_v33  ;;  %v3541_v40 = vadd.f32 %v3440_v62, %v3279_v39  ;;  %3219 = vst.msk [vmem:[#allocation3 + $0x68] sm:$0xff] %vm346_vm1, %v3187_v34  ;;  %v2935_v62 = vld [vmem:[#allocation3 + $0xb8] sm:$0xff] }
 0x2ac   : > { %3575 = vst.msk [vmem:[#allocation3 + $0x58] sm:$0xff] %vm346_vm1, %v3543_v38 }
 0x2ad   : > { %3573 = vst.msk [vmem:[#allocation3 + $0x48] sm:$0xff] %vm346_vm1, %v3541_v40  ;;  %v4978_v42 = vpop.f32.mrb[112].mxu1  ;;  %v2937_v40 = vld [vmem:[#allocation3 + $0xc8] sm:$0xff] }
 0x2ae   : > { %v5012_v15 = vpop.f32.mrb[144].mxu0  ;;  %v3192_v47 = vadd.f32 %v4978_v42, %v2930_v41  ;;  %v3111_v16 = vpop.f32.mrb[113].mxu1 }
 0x2af   : > { %v3469_v53 = vpop.f32.mrb[145].mxu0  ;;  %v3284_v56 = vld [vmem:[#allocation3 + $0x70] sm:$0xff]  ;;  %v3190_v57 = vadd.f32 %v3111_v16, %v2928_v50  ;;  %v4979_v61 = vpop.f32.mrb[114].mxu1 }
 0x2b0   : > { %v5013_v29 = vpop.f32.mrb[146].mxu0  ;;  %v3546_v63 = vadd.f32 %v5008_v51, %v3284_v56  ;;  %v3282_v25 = vld [vmem:[#allocation3 + $0x60] sm:$0xff]  ;;  %3224 = vst.msk [vmem:[#allocation3 + $0x90] sm:$0xff] %vm346_vm1, %v3192_v47  ;;  %v3193_v0 = vadd.f32 %v4979_v61, %v2931_v28  ;;  %v3114_v4 = vpop.f32.mrb[115].mxu1 }
 0x2b1   : > { %v3472_v7 = vpop.f32.mrb[147].mxu0  ;;  %v3544_v10 = vadd.f32 %v3453_v30, %v3282_v25  ;;  %v3285_v13 = vld [vmem:[#allocation3 + $0x78] sm:$0xff]  ;;  %3222 = vst.msk [vmem:[#allocation3 + $0x80] sm:$0xff] %vm346_vm1, %v3190_v57  ;;  %v3191_v58 = vadd.f32 %v3114_v4, %v2929_v3  ;;  %v2942_v57 = vld [vmem:[#allocation3 + $0xf0] sm:$0xff] }
 0x2b2   : > { %3578 = vst.msk [vmem:[#allocation3 + $0x70] sm:$0xff] %vm346_vm1, %v3546_v63  ;;  %v3547_v31 = vadd.f32 %v5009_v6, %v3285_v13  ;;  %v3283_v59 = vld [vmem:[#allocation3 + $0x68] sm:$0xff]  ;;  %3225 = vst.msk [vmem:[#allocation3 + $0x98] sm:$0xff] %vm346_vm1, %v3193_v0  ;;  %v2940_v63 = vld [vmem:[#allocation3 + $0xe0] sm:$0xff] }
 0x2b3   : > { %3576 = vst.msk [vmem:[#allocation3 + $0x60] sm:$0xff] %vm346_vm1, %v3544_v10  ;;  %v3545_v21 = vadd.f32 %v3456_v20, %v3283_v59  ;;  %3223 = vst.msk [vmem:[#allocation3 + $0x88] sm:$0xff] %vm346_vm1, %v3191_v58  ;;  %v2939_v20 = vld [vmem:[#allocation3 + $0xd8] sm:$0xff] }
 0x2b4   : > { %3579 = vst.msk [vmem:[#allocation3 + $0x78] sm:$0xff] %vm346_vm1, %v3547_v31 }
 0x2b5   : > { %3577 = vst.msk [vmem:[#allocation3 + $0x68] sm:$0xff] %vm346_vm1, %v3545_v21  ;;  %v4982_v22 = vpop.f32.mrb[116].mxu1  ;;  %v2941_v21 = vld [vmem:[#allocation3 + $0xe8] sm:$0xff] }
 0x2b6   : > { %v5016_v48 = vpop.f32.mrb[148].mxu0  ;;  %v3196_v24 = vadd.f32 %v4982_v22, %v2934_v26  ;;  %v3127_v37 = vpop.f32.mrb[117].mxu1 }
 0x2b7   : > { %v3485_v12 = vpop.f32.mrb[149].mxu0  ;;  %v3288_v60 = vld [vmem:[#allocation3 + $0x90] sm:$0xff]  ;;  %v3194_v1 = vadd.f32 %v3127_v37, %v2932_v27  ;;  %v4983_v11 = vpop.f32.mrb[118].mxu1 }
 0x2b8   : > { %v5017_v2 = vpop.f32.mrb[150].mxu0  ;;  %v3550_v5 = vadd.f32 %v5012_v15, %v3288_v60  ;;  %v3286_v49 = vld [vmem:[#allocation3 + $0x80] sm:$0xff]  ;;  %3228 = vst.msk [vmem:[#allocation3 + $0xb0] sm:$0xff] %vm346_vm1, %v3196_v24  ;;  %v3197_v18 = vadd.f32 %v4983_v11, %v2935_v62  ;;  %v3130_v44 = vpop.f32.mrb[119].mxu1 }
 0x2b9   : > { %v3488_v45 = vpop.f32.mrb[151].mxu0  ;;  %v3548_v51 = vadd.f32 %v3469_v53, %v3286_v49  ;;  %v3289_v52 = vld [vmem:[#allocation3 + $0x98] sm:$0xff]  ;;  %3226 = vst.msk [vmem:[#allocation3 + $0xa0] sm:$0xff] %vm346_vm1, %v3194_v1  ;;  %v3195_v8 = vadd.f32 %v3130_v44, %v2933_v23  ;;  %v3630_v1 = vld [vmem:[#allocation3 + $0x10] sm:$0xff] }
 0x2ba   : > { %3582 = vst.msk [vmem:[#allocation3 + $0x90] sm:$0xff] %vm346_vm1, %v3550_v5  ;;  %v3551_v9 = vadd.f32 %v5013_v29, %v3289_v52  ;;  %v3287_v30 = vld [vmem:[#allocation3 + $0x88] sm:$0xff]  ;;  %3229 = vst.msk [vmem:[#allocation3 + $0xb8] sm:$0xff] %vm346_vm1, %v3197_v18  ;;  %v3631_v23 = vld [vmem:[#allocation3 + $0x18] sm:$0xff] }
 0x2bb   : > { %3580 = vst.msk [vmem:[#allocation3 + $0x80] sm:$0xff] %vm346_vm1, %v3548_v51  ;;  %v3549_v17 = vadd.f32 %v3472_v7, %v3287_v30  ;;  %3227 = vst.msk [vmem:[#allocation3 + $0xa8] sm:$0xff] %vm346_vm1, %v3195_v8  ;;  %v2943_v7 = vld [vmem:[#allocation3 + $0xf8] sm:$0xff]  ;;  %v3629_v8 = vld [vmem:[#allocation3 + $0x8] sm:$0xff] }
 0x2bc   : > { %3583 = vst.msk [vmem:[#allocation3 + $0x98] sm:$0xff] %vm346_vm1, %v3551_v9 }
 0x2bd   : > { %3581 = vst.msk [vmem:[#allocation3 + $0x88] sm:$0xff] %vm346_vm1, %v3549_v17  ;;  %v4986_v19 = vpop.f32.mrb[120].mxu1 }
 0x2be   : > { %v5020_v43 = vpop.f32.mrb[152].mxu0  ;;  %v3200_v6 = vadd.f32 %v4986_v19, %v2938_v32  ;;  %v3143_v14 = vpop.f32.mrb[121].mxu1 }
 0x2bf   : > { %v3501_v54 = vpop.f32.mrb[153].mxu0  ;;  %v3292_v55 = vld [vmem:[#allocation3 + $0xb0] sm:$0xff]  ;;  %v3198_v35 = vadd.f32 %v3143_v14, %v2936_v46  ;;  %v4987_v33 = vpop.f32.mrb[122].mxu1 }
 0x2c0   : > { %v5021_v36 = vpop.f32.mrb[154].mxu0  ;;  %v3554_v34 = vadd.f32 %v5016_v48, %v3292_v55  ;;  %v3290_v38 = vld [vmem:[#allocation3 + $0xa0] sm:$0xff]  ;;  %3232 = vst.msk [vmem:[#allocation3 + $0xd0] sm:$0xff] %vm346_vm1, %v3200_v6  ;;  %v3201_v39 = vadd.f32 %v4987_v33, %v2939_v20  ;;  %v3146_v41 = vpop.f32.mrb[123].mxu1  ;;  %v6049_v46 = vld [vmem:[%s6205_s4] ss:$0 sm:$0xff] }
 0x2c1   : > { %v3504_v42 = vpop.f32.mrb[155].mxu0  ;;  %v3552_v15 = vadd.f32 %v3485_v12, %v3290_v38  ;;  %v3293_v47 = vld [vmem:[#allocation3 + $0xb8] sm:$0xff]  ;;  %3230 = vst.msk [vmem:[#allocation3 + $0xc0] sm:$0xff] %vm346_vm1, %v3198_v35  ;;  %v3199_v50 = vadd.f32 %v3146_v41, %v2937_v40  ;;  %v3634_v14 = vld [vmem:[#allocation3 + $0x30] sm:$0xff]  ;;  %v3632_v35 = vld [vmem:[#allocation3 + $0x20] sm:$0xff] }
 0x2c2   : > { %3586 = vst.msk [vmem:[#allocation3 + $0xb0] sm:$0xff] %vm346_vm1, %v3554_v34  ;;  %v3555_v16 = vadd.f32 %v5017_v2, %v3293_v47  ;;  %v3291_v53 = vld [vmem:[#allocation3 + $0xa8] sm:$0xff]  ;;  %3233 = vst.msk [vmem:[#allocation3 + $0xd8] sm:$0xff] %vm346_vm1, %v3201_v39  ;;  %v3628_v2 = vld [vmem:[#allocation3] sm:$0xff] }
 0x2c3   : > { %3584 = vst.msk [vmem:[#allocation3 + $0xa0] sm:$0xff] %vm346_vm1, %v3552_v15  ;;  %v3553_v56 = vadd.f32 %v3488_v45, %v3291_v53  ;;  %3231 = vst.msk [vmem:[#allocation3 + $0xc8] sm:$0xff] %vm346_vm1, %v3199_v50  ;;  %v3635_v38 = vld [vmem:[#allocation3 + $0x38] sm:$0xff]  ;;  %v3633_v47 = vld [vmem:[#allocation3 + $0x28] sm:$0xff] }
 0x2c4   : > { %3587 = vst.msk [vmem:[#allocation3 + $0xb8] sm:$0xff] %vm346_vm1, %v3555_v16 }
 0x2c5   : > { %3585 = vst.msk [vmem:[#allocation3 + $0xa8] sm:$0xff] %vm346_vm1, %v3553_v56  ;;  %v4990_v28 = vpop.f32.mrb[124].mxu1 }
 0x2c6   : > { %v5024_v61 = vpop.f32.mrb[156].mxu0  ;;  %v3204_v29 = vadd.f32 %v4990_v28, %v2942_v57  ;;  %v3159_v25 = vpop.f32.mrb[125].mxu1 }
 0x2c7   : > { %v3517_v0 = vpop.f32.mrb[157].mxu0  ;;  %v3296_v3 = vld [vmem:[#allocation3 + $0xd0] sm:$0xff]  ;;  %v3202_v4 = vadd.f32 %v3159_v25, %v2940_v63  ;;  %v4991_v10 = vpop.f32.mrb[126].mxu1 }
 0x2c8   : > { %v5025_v13 = vpop.f32.mrb[158].mxu0  ;;  %v3558_v58 = vadd.f32 %v5020_v43, %v3296_v3  ;;  %v3294_v31 = vld [vmem:[#allocation3 + $0xc0] sm:$0xff]  ;;  %3236 = vst.msk [vmem:[#allocation3 + $0xf0] sm:$0xff] %vm346_vm1, %v3204_v29  ;;  %v3205_v59 = vadd.f32 %v4991_v10, %v2943_v7  ;;  %v3162_v26 = vpop.f32.mrb[127].mxu1 }
 0x2c9   : > { %v3520_v22 = vpop.f32.mrb[159].mxu0  ;;  %v3556_v48 = vadd.f32 %v3501_v54, %v3294_v31  ;;  %v3297_v24 = vld [vmem:[#allocation3 + $0xd8] sm:$0xff]  ;;  %3234 = vst.msk [vmem:[#allocation3 + $0xe0] sm:$0xff] %vm346_vm1, %v3202_v4  ;;  %v3203_v27 = vadd.f32 %v3162_v26, %v2941_v21  ;;  %v3638_v31 = vld [vmem:[#allocation3 + $0x50] sm:$0xff] }
 0x2ca   : > { %3590 = vst.msk [vmem:[#allocation3 + $0xd0] sm:$0xff] %vm346_vm1, %v3558_v58  ;;  %v3559_v37 = vadd.f32 %v5021_v36, %v3297_v24  ;;  %v3295_v12 = vld [vmem:[#allocation3 + $0xc8] sm:$0xff]  ;;  %3237 = vst.msk [vmem:[#allocation3 + $0xf8] sm:$0xff] %vm346_vm1, %v3205_v59  ;;  %v4535_v36 = vld [vmem:[%s5151_s25 + $0x8] sm:$0xff]  }
 0x2cb   : > { %3588 = vst.msk [vmem:[#allocation3 + $0xc0] sm:$0xff] %vm346_vm1, %v3556_v48  ;;  %v3557_v60 = vadd.f32 %v3504_v42, %v3295_v12  ;;  %3235 = vst.msk [vmem:[#allocation3 + $0xe8] sm:$0xff] %vm346_vm1, %v3203_v27  ;;  %v4472_v42 = vld [vmem:[%s5151_s25] sm:$0xff]   ;;  %v4477_v28 = vunpack.c.l.bf16 %v4535_v36  ;;  %v4478_v7 = vunpack.c.h.bf16 %v4535_v36  ;;  %v3636_v48 = vld [vmem:[#allocation3 + $0x40] sm:$0xff] }
 0x2cc   : > { %3591 = vst.msk [vmem:[#allocation3 + $0xd8] sm:$0xff] %vm346_vm1, %v3559_v37  ;;  %v4473_v25 = vunpack.c.l.bf16 %v4472_v42  ;;  %v4474_v58 = vunpack.c.h.bf16 %v4472_v42  ;;  %v3640_v42 = vld [vmem:[#allocation3 + $0x60] sm:$0xff] }
 0x2cd   : > { %3589 = vst.msk [vmem:[#allocation3 + $0xc8] sm:$0xff] %vm346_vm1, %v3557_v60  ;;  %v5030_v62 = vpop.f32.mrb[128].mxu1  ;;  %v4537_v60 = vld [vmem:[%s5151_s25 + $0x18] sm:$0xff]  }
 0x2ce   : > { %v3892_v11 = vadd.f32 %v5030_v62, %v3630_v1  ;;  %v3763_v5 = vpop.f32.mrb[129].mxu1  ;;  %v3639_v62 = vld [vmem:[#allocation3 + $0x58] sm:$0xff] }
 0x2cf   : > { %v3890_v49 = vadd.f32 %v3763_v5, %v3628_v2  ;;  %v3300_v18 = vld [vmem:[#allocation3 + $0xf0] sm:$0xff]  ;;  %v5031_v44 = vpop.f32.mrb[130].mxu1 }
 0x2d0   : > { %3924 = vst.msk [vmem:[#allocation3 + $0x10] sm:$0xff] %vm346_vm1, %v3892_v11  ;;  %v3562_v45 = vadd.f32 %v5024_v61, %v3300_v18  ;;  %v3893_v51 = vadd.f32 %v5031_v44, %v3631_v23  ;;  %v3298_v52 = vld [vmem:[#allocation3 + $0xe0] sm:$0xff]  ;;  %v3766_v9 = vpop.f32.mrb[131].mxu1  ;;  %v3637_v44 = vld [vmem:[#allocation3 + $0x48] sm:$0xff] }
 0x2d1   : > { %3922 = vst.msk [vmem:[#allocation3] sm:$0xff] %vm346_vm1, %v3890_v49  ;;  %v3560_v30 = vadd.f32 %v3517_v0, %v3298_v52  ;;  %v3891_v17 = vadd.f32 %v3766_v9, %v3629_v8  ;;  %v3301_v32 = vld [vmem:[#allocation3 + $0xf8] sm:$0xff]  ;;  %v4536_v18 = vld [vmem:[%s5151_s25 + $0x10] sm:$0xff]  }
 0x2d2   : > { %3594 = vst.msk [vmem:[#allocation3 + $0xf0] sm:$0xff] %vm346_vm1, %v3562_v45  ;;  %3925 = vst.msk [vmem:[#allocation3 + $0x18] sm:$0xff] %vm346_vm1, %v3893_v51  ;;  %v3563_v19 = vadd.f32 %v5025_v13, %v3301_v32  ;;  %v3299_v43 = vld [vmem:[#allocation3 + $0xe8] sm:$0xff]  ;;  %v4482_v36 = vunpack.c.h.bf16 %v4536_v18 }
 0x2d3   : > { %3592 = vst.msk [vmem:[#allocation3 + $0xe0] sm:$0xff] %vm346_vm1, %v3560_v30  ;;  %3923 = vst.msk [vmem:[#allocation3 + $0x8] sm:$0xff] %vm346_vm1, %v3891_v17  ;;  %v3561_v6 = vadd.f32 %v3520_v22, %v3299_v43  ;;  %v4485_v17 = vunpack.c.l.bf16 %v4537_v60 }
 0x2d4   : > { %3595 = vst.msk [vmem:[#allocation3 + $0xf8] sm:$0xff] %vm346_vm1, %v3563_v19 }
 0x2d5   : > { %3593 = vst.msk [vmem:[#allocation3 + $0xe8] sm:$0xff] %vm346_vm1, %v3561_v6  ;;  %v5034_v54 = vpop.f32.mrb[132].mxu1  ;;  %v4481_v6 = vunpack.c.l.bf16 %v4536_v18 }
 0x2d6   : > { %v3896_v55 = vadd.f32 %v5034_v54, %v3634_v14  ;;  %v3779_v20 = vpop.f32.mrb[133].mxu1 }
 0x2d7   : > { %v3956_v33 = vld [vmem:[#allocation3 + $0x10] sm:$0xff]  ;;  %v3894_v34 = vadd.f32 %v3779_v20, %v3632_v35  ;;  %v5035_v39 = vpop.f32.mrb[134].mxu1  ;;  %v4486_v35 = vunpack.c.h.bf16 %v4537_v60 }
 0x2d8   : > { %v3995_v40 = vadd.f32 %v6049_v46, %v3956_v33  ;;  %v3954_v41 = vld [vmem:[#allocation3] sm:$0xff]  ;;  %3928 = vst.msk [vmem:[#allocation3 + $0x30] sm:$0xff] %vm346_vm1, %v3896_v55  ;;  %v3897_v15 = vadd.f32 %v5035_v39, %v3635_v38  ;;  %v3782_v50 = vpop.f32.mrb[135].mxu1 }
 0x2d9   : > { %v3993_v16 = vadd.f32 %v6049_v46, %v3954_v41  ;;  %v3957_v53 = vld [vmem:[#allocation3 + $0x18] sm:$0xff]  ;;  %3926 = vst.msk [vmem:[#allocation3 + $0x20] sm:$0xff] %vm346_vm1, %v3894_v34  ;;  %v3895_v56 = vadd.f32 %v3782_v50, %v3633_v47  ;;  %v3642_v34 = vld [vmem:[#allocation3 + $0x70] sm:$0xff] }
 0x2da   : > { %v4027_v57 = vmul.f32 0.1, %v3995_v40  ;;  %v3996_v61 = vadd.f32 %v6049_v46, %v3957_v53  ;;  %v3955_v29 = vld [vmem:[#allocation3 + $0x8] sm:$0xff]  ;;  %3929 = vst.msk [vmem:[#allocation3 + $0x38] sm:$0xff] %vm346_vm1, %v3897_v15  ;;  %v4539_v53 = vld [vmem:[%s5151_s25 + $0x28] sm:$0xff]  }
 0x2db   : > { %v4025_v63 = vmul.f32 0.1, %v3993_v16  ;;  %v3994_v0 = vadd.f32 %v6049_v46, %v3955_v29  ;;  %3927 = vst.msk [vmem:[#allocation3 + $0x28] sm:$0xff] %vm346_vm1, %v3895_v56 }
 0x2dc   : > { %v4059_v3 = vmax.f32 %v3995_v40, %v4027_v57  ;;  %v4028_v4 = vmul.f32 0.1, %v3996_v61  ;;  %v3643_v57 = vld [vmem:[#allocation3 + $0x78] sm:$0xff] }
 0x2dd   : > { %v4057_v10 = vmax.f32 %v3993_v16, %v4025_v63  ;;  %v4026_v13 = vmul.f32 0.1, %v3994_v0  ;;  %v5038_v59 = vpop.f32.mrb[136].mxu1 }
 0x2de   : > { %v4155_v21 = vadd.f32 %v4477_v28, %v4059_v3  ;;  %v4060_v26 = vmax.f32 %v3996_v61, %v4028_v4  ;;  %v3900_v22 = vadd.f32 %v5038_v59, %v3638_v31  ;;  %v3795_v24 = vpop.f32.mrb[137].mxu1  ;;  %v3641_v3 = vld [vmem:[#allocation3 + $0x68] sm:$0xff]  ;;  %v4493_v59 = vunpack.c.l.bf16 %v4539_v53 }
 0x2df   : > { %v4153_v27 = vadd.f32 %v4473_v25, %v4057_v10  ;;  %v4058_v37 = vmax.f32 %v3994_v0, %v4026_v13  ;;  %v3960_v12 = vld [vmem:[#allocation3 + $0x30] sm:$0xff]  ;;  %v3898_v1 = vadd.f32 %v3795_v24, %v3636_v48  ;;  %v5039_v11 = vpop.f32.mrb[138].mxu1 }
 0x2e0   : > { %4187 = vst.msk [vmem:[%s6066_s19 + $0x10] sm:$0xff] %vm346_vm1, %v4155_v21  ;;  %v4156_v2 = vadd.f32 %v4478_v7, %v4060_v26  ;;  %v3999_v5 = vadd.f32 %v6049_v46, %v3960_v12  ;;  %v3958_v49 = vld [vmem:[#allocation3 + $0x20] sm:$0xff]  ;;  %3932 = vst.msk [vmem:[#allocation3 + $0x50] sm:$0xff] %vm346_vm1, %v3900_v22  ;;  %v3901_v23 = vadd.f32 %v5039_v11, %v3639_v62  ;;  %v3798_v45 = vpop.f32.mrb[139].mxu1  ;;  %v4538_v25 = vld [vmem:[%s5151_s25 + $0x20] sm:$0xff]   ;;  %v4494_v12 = vunpack.c.h.bf16 %v4539_v53 }
 0x2e1   : > { %4185 = vst.msk [vmem:[%s6066_s19] sm:$0xff] %vm346_vm1, %v4153_v27  ;;  %v4154_v51 = vadd.f32 %v4474_v58, %v4058_v37  ;;  %v3997_v52 = vadd.f32 %v6049_v46, %v3958_v49  ;;  %v3961_v8 = vld [vmem:[#allocation3 + $0x38] sm:$0xff]  ;;  %3930 = vst.msk [vmem:[#allocation3 + $0x40] sm:$0xff] %vm346_vm1, %v3898_v1  ;;  %v3899_v9 = vadd.f32 %v3798_v45, %v3637_v44  ;;  %v4489_v48 = vunpack.c.l.bf16 %v4538_v25  ;;  %v3646_v11 = vld [vmem:[#allocation3 + $0x90] sm:$0xff] }
 0x2e2   : > { %4188 = vst.msk [vmem:[%s6066_s19 + $0x18] sm:$0xff] %vm346_vm1, %v4156_v2  ;;  %v4031_v30 = vmul.f32 0.1, %v3999_v5  ;;  %v4000_v32 = vadd.f32 %v6049_v46, %v3961_v8  ;;  %v3959_v19 = vld [vmem:[#allocation3 + $0x28] sm:$0xff]  ;;  %3933 = vst.msk [vmem:[#allocation3 + $0x58] sm:$0xff] %vm346_vm1, %v3901_v23  ;;  %v4490_v62 = vunpack.c.h.bf16 %v4538_v25  ;;  %v3644_v23 = vld [vmem:[#allocation3 + $0x80] sm:$0xff] }
 0x2e3   : > { %4186 = vst.msk [vmem:[%s6066_s19 + $0x8] sm:$0xff] %vm346_vm1, %v4154_v51  ;;  %v4029_v43 = vmul.f32 0.1, %v3997_v52  ;;  %v3998_v14 = vadd.f32 %v6049_v46, %v3959_v19  ;;  %3931 = vst.msk [vmem:[#allocation3 + $0x48] sm:$0xff] %vm346_vm1, %v3899_v9  ;;  %v4541_v8 = vld [vmem:[%s5151_s25 + $0x38] sm:$0xff]  }
 0x2e4   : > { %v4063_v54 = vmax.f32 %v3999_v5, %v4031_v30  ;;  %v4032_v55 = vmul.f32 0.1, %v4000_v32  ;;  %v3647_v30 = vld [vmem:[#allocation3 + $0x98] sm:$0xff] }
 0x2e5   : > { %v4061_v20 = vmax.f32 %v3997_v52, %v4029_v43  ;;  %v4030_v33 = vmul.f32 0.1, %v3998_v14  ;;  %v5042_v38 = vpop.f32.mrb[140].mxu1 }
 0x2e6   : > { %v4159_v39 = vadd.f32 %v4485_v17, %v4063_v54  ;;  %v4064_v40 = vmax.f32 %v4000_v32, %v4032_v55  ;;  %v3904_v41 = vadd.f32 %v5042_v38, %v3642_v34  ;;  %v3811_v15 = vpop.f32.mrb[141].mxu1  ;;  %v3645_v54 = vld [vmem:[#allocation3 + $0x88] sm:$0xff]  ;;  %v4501_v38 = vunpack.c.l.bf16 %v4541_v8 }
 0x2e7   : > { %v4157_v47 = vadd.f32 %v4481_v6, %v4061_v20  ;;  %v4062_v50 = vmax.f32 %v3998_v14, %v4030_v33  ;;  %v3964_v16 = vld [vmem:[#allocation3 + $0x50] sm:$0xff]  ;;  %v3902_v56 = vadd.f32 %v3811_v15, %v3640_v42  ;;  %v5043_v28 = vpop.f32.mrb[142].mxu1  ;;  %v4540_v6 = vld [vmem:[%s5151_s25 + $0x30] sm:$0xff]  }
 0x2e8   : > { %4191 = vst.msk [vmem:[%s6066_s19 + $0x30] sm:$0xff] %vm346_vm1, %v4159_v39  ;;  %v4160_v61 = vadd.f32 %v4486_v35, %v4064_v40  ;;  %v4003_v29 = vadd.f32 %v6049_v46, %v3964_v16  ;;  %v3962_v63 = vld [vmem:[#allocation3 + $0x40] sm:$0xff]  ;;  %3936 = vst.msk [vmem:[#allocation3 + $0x70] sm:$0xff] %vm346_vm1, %v3904_v41  ;;  %v3905_v0 = vadd.f32 %v5043_v28, %v3643_v57  ;;  %v3814_v4 = vpop.f32.mrb[143].mxu1  ;;  %v4497_v42 = vunpack.c.l.bf16 %v4540_v6  ;;  %v3650_v28 = vld [vmem:[#allocation3 + $0xb0] sm:$0xff] }
 0x2e9   : > { %4189 = vst.msk [vmem:[%s6066_s19 + $0x20] sm:$0xff] %vm346_vm1, %v4157_v47  ;;  %v4158_v7 = vadd.f32 %v4482_v36, %v4062_v50  ;;  %v4001_v10 = vadd.f32 %v6049_v46, %v3962_v63  ;;  %v3965_v13 = vld [vmem:[#allocation3 + $0x58] sm:$0xff]  ;;  %3934 = vst.msk [vmem:[#allocation3 + $0x60] sm:$0xff] %vm346_vm1, %v3902_v56  ;;  %v3903_v58 = vadd.f32 %v3814_v4, %v3641_v3  ;;  %v4502_v16 = vunpack.c.h.bf16 %v4541_v8 }
 0x2ea   : > { %4192 = vst.msk [vmem:[%s6066_s19 + $0x38] sm:$0xff] %vm346_vm1, %v4160_v61  ;;  %v4035_v31 = vmul.f32 0.1, %v4003_v29  ;;  %v4004_v21 = vadd.f32 %v6049_v46, %v3965_v13  ;;  %v3963_v26 = vld [vmem:[#allocation3 + $0x48] sm:$0xff]  ;;  %3937 = vst.msk [vmem:[#allocation3 + $0x78] sm:$0xff] %vm346_vm1, %v3905_v0  ;;  %v4498_v57 = vunpack.c.h.bf16 %v4540_v6  ;;  %v3648_v0 = vld [vmem:[#allocation3 + $0xa0] sm:$0xff] }
 0x2eb   : > { %4190 = vst.msk [vmem:[%s6066_s19 + $0x28] sm:$0xff] %vm346_vm1, %v4158_v7  ;;  %v4033_v22 = vmul.f32 0.1, %v4001_v10  ;;  %v4002_v24 = vadd.f32 %v6049_v46, %v3963_v26  ;;  %3935 = vst.msk [vmem:[#allocation3 + $0x68] sm:$0xff] %vm346_vm1, %v3903_v58  ;;  %v4543_v13 = vld [vmem:[%s5151_s25 + $0x48] sm:$0xff]  }
 0x2ec   : > { %v4067_v27 = vmax.f32 %v4003_v29, %v4035_v31  ;;  %v4036_v37 = vmul.f32 0.1, %v4004_v21  ;;  %v3651_v31 = vld [vmem:[#allocation3 + $0xb8] sm:$0xff] }
 0x2ed   : > { %v4065_v60 = vmax.f32 %v4001_v10, %v4033_v22  ;;  %v4034_v1 = vmul.f32 0.1, %v4002_v24  ;;  %v5046_v2 = vpop.f32.mrb[144].mxu1 }
 0x2ee   : > { %v4163_v5 = vadd.f32 %v4493_v59, %v4067_v27  ;;  %v4068_v49 = vmax.f32 %v4004_v21, %v4036_v37  ;;  %v3908_v18 = vadd.f32 %v5046_v2, %v3646_v11  ;;  %v3827_v44 = vpop.f32.mrb[145].mxu1  ;;  %v3649_v27 = vld [vmem:[#allocation3 + $0xa8] sm:$0xff]  ;;  %v4509_v2 = vunpack.c.l.bf16 %v4543_v13 }
 0x2ef   : > { %v4161_v45 = vadd.f32 %v4489_v48, %v4065_v60  ;;  %v4066_v51 = vmax.f32 %v4002_v24, %v4034_v1  ;;  %v3968_v52 = vld [vmem:[#allocation3 + $0x70] sm:$0xff]  ;;  %v3906_v9 = vadd.f32 %v3827_v44, %v3644_v23  ;;  %v5047_v17 = vpop.f32.mrb[146].mxu1 }
 0x2f0   : > { %4195 = vst.msk [vmem:[%s6066_s19 + $0x50] sm:$0xff] %vm346_vm1, %v4163_v5  ;;  %v4164_v32 = vadd.f32 %v4494_v12, %v4068_v49  ;;  %v4007_v19 = vadd.f32 %v6049_v46, %v3968_v52  ;;  %v3966_v43 = vld [vmem:[#allocation3 + $0x60] sm:$0xff]  ;;  %3940 = vst.msk [vmem:[#allocation3 + $0x90] sm:$0xff] %vm346_vm1, %v3908_v18  ;;  %v3909_v14 = vadd.f32 %v5047_v17, %v3647_v30  ;;  %v3830_v55 = vpop.f32.mrb[147].mxu1  ;;  %v4542_v48 = vld [vmem:[%s5151_s25 + $0x40] sm:$0xff]   ;;  %v4510_v52 = vunpack.c.h.bf16 %v4543_v13 }
 0x2f1   : > { %4193 = vst.msk [vmem:[%s6066_s19 + $0x40] sm:$0xff] %vm346_vm1, %v4161_v45  ;;  %v4162_v35 = vadd.f32 %v4490_v62, %v4066_v51  ;;  %v4005_v20 = vadd.f32 %v6049_v46, %v3966_v43  ;;  %v3969_v33 = vld [vmem:[#allocation3 + $0x78] sm:$0xff]  ;;  %3938 = vst.msk [vmem:[#allocation3 + $0x80] sm:$0xff] %vm346_vm1, %v3906_v9  ;;  %v3907_v36 = vadd.f32 %v3830_v55, %v3645_v54  ;;  %v4505_v23 = vunpack.c.l.bf16 %v4542_v48  ;;  %v3654_v17 = vld [vmem:[#allocation3 + $0xd0] sm:$0xff] }
 0x2f2   : > { %4196 = vst.msk [vmem:[%s6066_s19 + $0x58] sm:$0xff] %vm346_vm1, %v4164_v32  ;;  %v4039_v34 = vmul.f32 0.1, %v4007_v19  ;;  %v4008_v39 = vadd.f32 %v6049_v46, %v3969_v33  ;;  %v3967_v40 = vld [vmem:[#allocation3 + $0x68] sm:$0xff]  ;;  %3941 = vst.msk [vmem:[#allocation3 + $0x98] sm:$0xff] %vm346_vm1, %v3909_v14  ;;  %v4506_v30 = vunpack.c.h.bf16 %v4542_v48  ;;  %v3652_v14 = vld [vmem:[#allocation3 + $0xc0] sm:$0xff] }
 0x2f3   : > { %4194 = vst.msk [vmem:[%s6066_s19 + $0x48] sm:$0xff] %vm346_vm1, %v4162_v35  ;;  %v4037_v41 = vmul.f32 0.1, %v4005_v20  ;;  %v4006_v15 = vadd.f32 %v6049_v46, %v3967_v40  ;;  %3939 = vst.msk [vmem:[#allocation3 + $0x88] sm:$0xff] %vm346_vm1, %v3907_v36  ;;  %v4545_v33 = vld [vmem:[%s5151_s25 + $0x58] sm:$0xff]  }
 0x2f4   : > { %v4071_v47 = vmax.f32 %v4007_v19, %v4039_v34  ;;  %v4040_v50 = vmul.f32 0.1, %v4008_v39  ;;  %v3655_v34 = vld [vmem:[#allocation3 + $0xd8] sm:$0xff] }
 0x2f5   : > { %v4069_v53 = vmax.f32 %v4005_v20, %v4037_v41  ;;  %v4038_v56 = vmul.f32 0.1, %v4006_v15  ;;  %v5050_v61 = vpop.f32.mrb[148].mxu1 }
 0x2f6   : > { %v4167_v29 = vadd.f32 %v4501_v38, %v4071_v47  ;;  %v4072_v63 = vmax.f32 %v4008_v39, %v4040_v50  ;;  %v3912_v25 = vadd.f32 %v5050_v61, %v3650_v28  ;;  %v3843_v3 = vpop.f32.mrb[149].mxu1  ;;  %v3653_v47 = vld [vmem:[#allocation3 + $0xc8] sm:$0xff]  ;;  %v4517_v61 = vunpack.c.l.bf16 %v4545_v33 }
 0x2f7   : > { %v4165_v4 = vadd.f32 %v4497_v42, %v4069_v53  ;;  %v4070_v7 = vmax.f32 %v4006_v15, %v4038_v56  ;;  %v3972_v10 = vld [vmem:[#allocation3 + $0x90] sm:$0xff]  ;;  %v3910_v58 = vadd.f32 %v3843_v3, %v3648_v0  ;;  %v5051_v59 = vpop.f32.mrb[150].mxu1  ;;  %v4544_v42 = vld [vmem:[%s5151_s25 + $0x50] sm:$0xff]  }
 0x2f8   : > { %4199 = vst.msk [vmem:[%s6066_s19 + $0x70] sm:$0xff] %vm346_vm1, %v4167_v29  ;;  %v4168_v21 = vadd.f32 %v4502_v16, %v4072_v63  ;;  %v4011_v26 = vadd.f32 %v6049_v46, %v3972_v10  ;;  %v3970_v22 = vld [vmem:[#allocation3 + $0x80] sm:$0xff]  ;;  %3944 = vst.msk [vmem:[#allocation3 + $0xb0] sm:$0xff] %vm346_vm1, %v3912_v25  ;;  %v3913_v24 = vadd.f32 %v5051_v59, %v3651_v31  ;;  %v3846_v37 = vpop.f32.mrb[151].mxu1  ;;  %v4513_v0 = vunpack.c.l.bf16 %v4544_v42  ;;  %v3658_v59 = vld [vmem:[#allocation3 + $0xf0] sm:$0xff] }
 0x2f9   : > { %4197 = vst.msk [vmem:[%s6066_s19 + $0x60] sm:$0xff] %vm346_vm1, %v4165_v4  ;;  %v4166_v12 = vadd.f32 %v4498_v57, %v4070_v7  ;;  %v4009_v60 = vadd.f32 %v6049_v46, %v3970_v22  ;;  %v3973_v1 = vld [vmem:[#allocation3 + $0x98] sm:$0xff]  ;;  %3942 = vst.msk [vmem:[#allocation3 + $0xa0] sm:$0xff] %vm346_vm1, %v3910_v58  ;;  %v3911_v62 = vadd.f32 %v3846_v37, %v3649_v27  ;;  %v4518_v10 = vunpack.c.h.bf16 %v4545_v33 }
 0x2fa   : > { %4200 = vst.msk [vmem:[%s6066_s19 + $0x78] sm:$0xff] %vm346_vm1, %v4168_v21  ;;  %v4043_v11 = vmul.f32 0.1, %v4011_v26  ;;  %v4012_v5 = vadd.f32 %v6049_v46, %v3973_v1  ;;  %v3971_v49 = vld [vmem:[#allocation3 + $0x88] sm:$0xff]  ;;  %3945 = vst.msk [vmem:[#allocation3 + $0xb8] sm:$0xff] %vm346_vm1, %v3913_v24  ;;  %v4514_v31 = vunpack.c.h.bf16 %v4544_v42  ;;  %v3656_v24 = vld [vmem:[#allocation3 + $0xe0] sm:$0xff] }
 0x2fb   : > { %4198 = vst.msk [vmem:[%s6066_s19 + $0x68] sm:$0xff] %vm346_vm1, %v4166_v12  ;;  %v4041_v18 = vmul.f32 0.1, %v4009_v60  ;;  %v4010_v44 = vadd.f32 %v6049_v46, %v3971_v49  ;;  %3943 = vst.msk [vmem:[#allocation3 + $0xa8] sm:$0xff] %vm346_vm1, %v3911_v62  ;;  %v4547_v1 = vld [vmem:[%s5151_s25 + $0x68] sm:$0xff]  }
 0x2fc   : > { %v4075_v45 = vmax.f32 %v4011_v26, %v4043_v11  ;;  %v4044_v51 = vmul.f32 0.1, %v4012_v5  ;;  %v3659_v11 = vld [vmem:[#allocation3 + $0xf8] sm:$0xff] }
 0x2fd   : > { %v4073_v8 = vmax.f32 %v4009_v60, %v4041_v18  ;;  %v4042_v9 = vmul.f32 0.1, %v4010_v44  ;;  %v5054_v32 = vpop.f32.mrb[152].mxu1 }
 0x2fe   : > { %v4171_v19 = vadd.f32 %v4509_v2, %v4075_v45  ;;  %v4076_v43 = vmax.f32 %v4012_v5, %v4044_v51  ;;  %v3916_v6 = vadd.f32 %v5054_v32, %v3654_v17  ;;  %v3859_v54 = vpop.f32.mrb[153].mxu1  ;;  %v3657_v45 = vld [vmem:[#allocation3 + $0xe8] sm:$0xff]  ;;  %v4525_v32 = vunpack.c.l.bf16 %v4547_v1 }
 0x2ff   : > { %v4169_v55 = vadd.f32 %v4505_v23, %v4073_v8  ;;  %v4074_v35 = vmax.f32 %v4010_v44, %v4042_v9  ;;  %v3976_v20 = vld [vmem:[#allocation3 + $0xb0] sm:$0xff]  ;;  %v3914_v36 = vadd.f32 %v3859_v54, %v3652_v14  ;;  %v5055_v38 = vpop.f32.mrb[154].mxu1 }
 0x300   : > { %4203 = vst.msk [vmem:[%s6066_s19 + $0x90] sm:$0xff] %vm346_vm1, %v4171_v19  ;;  %v4172_v39 = vadd.f32 %v4510_v52, %v4076_v43  ;;  %v4015_v40 = vadd.f32 %v6049_v46, %v3976_v20  ;;  %v3974_v41 = vld [vmem:[#allocation3 + $0xa0] sm:$0xff]  ;;  %3948 = vst.msk [vmem:[#allocation3 + $0xd0] sm:$0xff] %vm346_vm1, %v3916_v6  ;;  %v3917_v15 = vadd.f32 %v5055_v38, %v3655_v34  ;;  %v3862_v50 = vpop.f32.mrb[155].mxu1  ;;  %v4546_v23 = vld [vmem:[%s5151_s25 + $0x60] sm:$0xff]   ;;  %v4526_v20 = vunpack.c.h.bf16 %v4547_v1 }
 0x301   : > { %4201 = vst.msk [vmem:[%s6066_s19 + $0x80] sm:$0xff] %vm346_vm1, %v4169_v55  ;;  %v4170_v16 = vadd.f32 %v4506_v30, %v4074_v35  ;;  %v4013_v53 = vadd.f32 %v6049_v46, %v3974_v41  ;;  %v3977_v56 = vld [vmem:[#allocation3 + $0xb8] sm:$0xff]  ;;  %3946 = vst.msk [vmem:[#allocation3 + $0xc0] sm:$0xff] %vm346_vm1, %v3914_v36  ;;  %v3915_v57 = vadd.f32 %v3862_v50, %v3653_v47  ;;  %v4521_v14 = vunpack.c.l.bf16 %v4546_v23 }
 0x302   : > { %4204 = vst.msk [vmem:[%s6066_s19 + $0x98] sm:$0xff] %vm346_vm1, %v4172_v39  ;;  %v4047_v28 = vmul.f32 0.1, %v4015_v40  ;;  %v4016_v29 = vadd.f32 %v6049_v46, %v3977_v56  ;;  %v3975_v63 = vld [vmem:[#allocation3 + $0xa8] sm:$0xff]  ;;  %3949 = vst.msk [vmem:[#allocation3 + $0xd8] sm:$0xff] %vm346_vm1, %v3917_v15  ;;  %v4522_v34 = vunpack.c.h.bf16 %v4546_v23 }
 0x303   : > { %4202 = vst.msk [vmem:[%s6066_s19 + $0x88] sm:$0xff] %vm346_vm1, %v4170_v16  ;;  %v4045_v25 = vmul.f32 0.1, %v4013_v53  ;;  %v4014_v3 = vadd.f32 %v6049_v46, %v3975_v63  ;;  %3947 = vst.msk [vmem:[#allocation3 + $0xc8] sm:$0xff] %vm346_vm1, %v3915_v57  ;;  %v4549_v15 = vld [vmem:[%s5151_s25 + $0x78] sm:$0xff]  }
 0x304   : > { %v4079_v4 = vmax.f32 %v4015_v40, %v4047_v28  ;;  %v4048_v7 = vmul.f32 0.1, %v4016_v29 }
 0x305   : > { %v4077_v13 = vmax.f32 %v4013_v53, %v4045_v25  ;;  %v4046_v58 = vmul.f32 0.1, %v4014_v3  ;;  %v5058_v21 = vpop.f32.mrb[156].mxu1  ;;  %v4548_v53 = vld [vmem:[%s5151_s25 + $0x70] sm:$0xff]  }
 0x306   : > { %v4175_v26 = vadd.f32 %v4517_v61, %v4079_v4  ;;  %v4080_v22 = vmax.f32 %v4016_v29, %v4048_v7  ;;  %v3920_v48 = vadd.f32 %v5058_v21, %v3658_v59  ;;  %v3875_v27 = vpop.f32.mrb[157].mxu1  ;;  %v4533_v29 = vunpack.c.l.bf16 %v4549_v15 }
 0x307   : > { %v4173_v37 = vadd.f32 %v4513_v0, %v4077_v13  ;;  %v4078_v12 = vmax.f32 %v4014_v3, %v4046_v58  ;;  %v3980_v60 = vld [vmem:[#allocation3 + $0xd0] sm:$0xff]  ;;  %v3918_v62 = vadd.f32 %v3875_v27, %v3656_v24  ;;  %v5059_v2 = vpop.f32.mrb[158].mxu1  ;;  %v4529_v3 = vunpack.c.l.bf16 %v4548_v53 }
 0x308   : > { %4207 = vst.msk [vmem:[%s6066_s19 + $0xb0] sm:$0xff] %vm346_vm1, %v4175_v26  ;;  %v4176_v5 = vadd.f32 %v4518_v10, %v4080_v22  ;;  %v4019_v49 = vadd.f32 %v6049_v46, %v3980_v60  ;;  %v3978_v18 = vld [vmem:[#allocation3 + $0xc0] sm:$0xff]  ;;  %3952 = vst.msk [vmem:[#allocation3 + $0xf0] sm:$0xff] %vm346_vm1, %v3920_v48  ;;  %v3921_v44 = vadd.f32 %v5059_v2, %v3659_v11  ;;  %v3878_v51 = vpop.f32.mrb[159].mxu1  ;;  %v4534_v13 = vunpack.c.h.bf16 %v4549_v15 }
 0x309   : > { %4205 = vst.msk [vmem:[%s6066_s19 + $0xa0] sm:$0xff] %vm346_vm1, %v4173_v37  ;;  %v4174_v52 = vadd.f32 %v4514_v31, %v4078_v12  ;;  %v4017_v8 = vadd.f32 %v6049_v46, %v3978_v18  ;;  %v3981_v9 = vld [vmem:[#allocation3 + $0xd8] sm:$0xff]  ;;  %3950 = vst.msk [vmem:[#allocation3 + $0xe0] sm:$0xff] %vm346_vm1, %v3918_v62  ;;  %v3919_v30 = vadd.f32 %v3878_v51, %v3657_v45  ;;  %v4530_v59 = vunpack.c.h.bf16 %v4548_v53 }
 0x30a   : > { %4208 = vst.msk [vmem:[%s6066_s19 + $0xb8] sm:$0xff] %vm346_vm1, %v4176_v5  ;;  %v4051_v17 = vmul.f32 0.1, %v4019_v49  ;;  %v4020_v19 = vadd.f32 %v6049_v46, %v3981_v9  ;;  %v3979_v43 = vld [vmem:[#allocation3 + $0xc8] sm:$0xff]  ;;  %3953 = vst.msk [vmem:[#allocation3 + $0xf8] sm:$0xff] %vm346_vm1, %v3921_v44 }
 0x30b   : > { %4206 = vst.msk [vmem:[%s6066_s19 + $0xa8] sm:$0xff] %vm346_vm1, %v4174_v52  ;;  %v4049_v6 = vmul.f32 0.1, %v4017_v8  ;;  %v4018_v54 = vadd.f32 %v6049_v46, %v3979_v43  ;;  %3951 = vst.msk [vmem:[#allocation3 + $0xe8] sm:$0xff] %vm346_vm1, %v3919_v30 }
 0x30c   : > { %v4083_v55 = vmax.f32 %v4019_v49, %v4051_v17  ;;  %v4052_v35 = vmul.f32 0.1, %v4020_v19 }
 0x30d   : > { %v4081_v33 = vmax.f32 %v4017_v8, %v4049_v6  ;;  %v4050_v36 = vmul.f32 0.1, %v4018_v54 }
 0x30e   : > { %v4179_v38 = vadd.f32 %v4525_v32, %v4083_v55  ;;  %v4084_v39 = vmax.f32 %v4020_v19, %v4052_v35 }
 0x30f   : > { %v4177_v40 = vadd.f32 %v4521_v14, %v4081_v33  ;;  %v4082_v41 = vmax.f32 %v4018_v54, %v4050_v36  ;;  %v3984_v42 = vld [vmem:[#allocation3 + $0xf0] sm:$0xff] }
 0x310   : > { %4211 = vst.msk [vmem:[%s6066_s19 + $0xd0] sm:$0xff] %vm346_vm1, %v4179_v38  ;;  %v4180_v47 = vadd.f32 %v4526_v20, %v4084_v39  ;;  %v4023_v50 = vadd.f32 %v6049_v46, %v3984_v42  ;;  %v3982_v16 = vld [vmem:[#allocation3 + $0xe0] sm:$0xff] }
 0x311   : > { %4209 = vst.msk [vmem:[%s6066_s19 + $0xc0] sm:$0xff] %vm346_vm1, %v4177_v40  ;;  %v4178_v56 = vadd.f32 %v4522_v34, %v4082_v41  ;;  %v4021_v57 = vadd.f32 %v6049_v46, %v3982_v16  ;;  %v3985_v28 = vld [vmem:[#allocation3 + $0xf8] sm:$0xff] }
 0x312   : > { %4212 = vst.msk [vmem:[%s6066_s19 + $0xd8] sm:$0xff] %vm346_vm1, %v4180_v47  ;;  %v4055_v61 = vmul.f32 0.1, %v4023_v50  ;;  %v4024_v63 = vadd.f32 %v6049_v46, %v3985_v28  ;;  %v3983_v25 = vld [vmem:[#allocation3 + $0xe8] sm:$0xff] }
 0x313   : > { %4210 = vst.msk [vmem:[%s6066_s19 + $0xc8] sm:$0xff] %vm346_vm1, %v4178_v56  ;;  %v4053_v0 = vmul.f32 0.1, %v4021_v57  ;;  %v4022_v4 = vadd.f32 %v6049_v46, %v3983_v25 }
 0x314   : > { %v4087_v7 = vmax.f32 %v4023_v50, %v4055_v61  ;;  %v4056_v10 = vmul.f32 0.1, %v4024_v63 }
 0x315   : > { %v4085_v58 = vmax.f32 %v4021_v57, %v4053_v0  ;;  %v4054_v31 = vmul.f32 0.1, %v4022_v4 }
 0x316   : > { %v4183_v21 = vadd.f32 %v4533_v29, %v4087_v7  ;;  %v4088_v26 = vmax.f32 %v4024_v63, %v4056_v10 }
 0x317   : > { %v4181_v22 = vadd.f32 %v4529_v3, %v4085_v58  ;;  %v4086_v48 = vmax.f32 %v4022_v4, %v4054_v31 }
 0x318   : > { %4215 = vst.msk [vmem:[%s6066_s19 + $0xf0] sm:$0xff] %vm346_vm1, %v4183_v21  ;;  %v4184_v24 = vadd.f32 %v4534_v13, %v4088_v26 }
 0x319   : > { %4213 = vst.msk [vmem:[%s6066_s19 + $0xe0] sm:$0xff] %vm346_vm1, %v4181_v22  ;;  %v4182_v27 = vadd.f32 %v4530_v59, %v4086_v48 }
 0x31a   : > { %4216 = vst.msk [vmem:[%s6066_s19 + $0xf8] sm:$0xff] %vm346_vm1, %v4184_v24 }
 0x31b   : > { %4214 = vst.msk [vmem:[%s6066_s19 + $0xe8] sm:$0xff] %vm346_vm1, %v4182_v27 }
 0x31c PF: > { %s15_s18 = sadd.s32 1, %s5101_s18  }
 0x31d   : > { %p12_p4 = scmp.ge.s32.totalorder %s15_s18, 4  }
 0x31f   :  { %14 = sbr.rel (!%p12_p4) target bundleno = 1 (0x1), region = 81 }

</bundles_post_ra>
